<compile_context>
chip_gen: v7x
topology: tpu7x:2x2x1
jax: 0.10.0
libtpu: 0.0.40
codegen_flags: <defaults>
</compile_context>

<pallas_src>
import functools

import jax
import jax.numpy as jnp
from jax.experimental import pallas as pl
from jax.experimental.pallas import tpu as pltpu

EPS = 1e-5          # BatchNorm2d default eps
LANE = 128          # TPU lane width


def _round_up(x, m):
    return (x + m - 1) // m * m


def _vmem_limit_bytes():
    # ~75% of the chip's physical VMEM: ~96 MiB on v5e/v6e (128 MiB),
    # ~48 MiB on v7x (64 MiB).  Falls back to a value safe on every generation.
    try:
        return int(pltpu.get_tpu_info().vmem_capacity_bytes * 3 // 4)
    except Exception:
        return 48 * 1024 * 1024


def _pick_tile_h(H, W, target_rows=512, max_rows=2048):
    """Row-tile height TH: must divide H, and TH*W must be a multiple of 128
    (lane-dense output stores) or equal H*W (full-extent block)."""
    valid = [th for th in range(1, H + 1)
             if H % th == 0 and ((th * W) % LANE == 0 or th == H)]
    capped = [th for th in valid if th * W <= max_rows] or valid
    reach = [th for th in capped if th * W >= target_rows]
    return min(reach) if reach else max(capped)


# --------------------------------------------------------------------------- #
# Shared per-tile conv: register-built bf16 im2col patch -> one MXU matmul
# --------------------------------------------------------------------------- #
def _conv_tile(x_ref, w_ref, tile_h):
    """x_ref: (1, H+2, W+2, Cin) bf16 padded sample; w_ref: (KP, CP) bf16.
    Returns the f32 conv tile (TH*W, CP) for row tile t = pl.program_id(1)."""
    Cin = x_ref.shape[-1]
    W = x_ref.shape[2] - 2
    KP = w_ref.shape[0]
    K = 9 * Cin
    TP = tile_h * W

    t = pl.program_id(1)
    h0 = t * tile_h
    if tile_h % 8 == 0:
        h0 = pl.multiple_of(h0, 8)          # sublane-alignment hint

    # im2col patch built in registers (no VMEM scratch, no zero-init, no masked
    # narrow stores); contraction tail zero-padded toward KP for the MXU.
    taps = []
    for kh in range(3):
        for kw in range(3):
            win = x_ref[:, pl.ds(h0 + kh, tile_h), kw:kw + W, :]   # (1,TH,W,Cin)
            taps.append(win.reshape(TP, Cin))
    if KP > K:
        taps.append(jnp.zeros((TP, KP - K), jnp.bfloat16))
    patch = jnp.concatenate(taps, axis=-1)                          # (TP, KP) bf16

    # Single lane-/contraction-dense MXU matmul: bf16 operands, f32 accumulation.
    return jnp.dot(patch, w_ref[...], preferred_element_type=jnp.float32)


# --------------------------------------------------------------------------- #
# Pass 1: stats only — per-channel sum / sum-of-squares, accumulated over tiles
# --------------------------------------------------------------------------- #
def conv_stats_kernel(x_ref, w_ref, sum_ref, ssq_ref, *, tile_h):
    acc = _conv_tile(x_ref, w_ref, tile_h)            # (TP, CP) f32
    CP = sum_ref.shape[-1]
    t = pl.program_id(1)

    @pl.when(t == 0)
    def _init():
        sum_ref[...] = jnp.zeros_like(sum_ref)
        ssq_ref[...] = jnp.zeros_like(ssq_ref)

    sum_ref[...] += jnp.sum(acc, axis=0, keepdims=True).reshape(1, 1, CP)
    # TODO(synk): E[x^2]-E[x]^2 in f32 can cancel for large-mean activations; a
    # shifted / Welford-style accumulation would be more robust if needed.
    ssq_ref[...] += jnp.sum(acc * acc, axis=0, keepdims=True).reshape(1, 1, CP)


# --------------------------------------------------------------------------- #
# Pass 2: recompute conv, fuse y*scale+shift, write final output lane-densely
# --------------------------------------------------------------------------- #
def conv_bn_apply_kernel(x_ref, w_ref, scale_ref, shift_ref, out_ref, *, tile_h):
    Cout = out_ref.shape[1]
    TP = out_ref.shape[2]
    acc = _conv_tile(x_ref, w_ref, tile_h)            # (TP, CP) f32
    y = acc * scale_ref[...] + shift_ref[...]          # per-channel scale/shift
    # Transpose in-kernel: stores become lane-dense (TP >= 128 lanes) and the
    # NCHW result needs only a free metadata reshape in the wrapper.
    yt = y.T                                           # (CP, TP) f32
    out_ref[...] = yt[:Cout, :].reshape(1, Cout, TP)


# --------------------------------------------------------------------------- #
# Wrapper
# --------------------------------------------------------------------------- #
def conv_bn2d(x_nchw, weight_oihw, gamma, beta, *, target_rows=512):
    """x_nchw: (N, Cin, H, W). weight_oihw: (Cout, Cin, 3, 3). Returns NCHW."""
    N, Cin, H, W = x_nchw.shape
    Cout = weight_oihw.shape[0]

    CP = _round_up(Cout, LANE)          # lane-dense channel padding (Cout -> 128)
    K = 9 * Cin
    KP = _round_up(K, LANE)             # contraction dim padded toward MXU depth

    TH = _pick_tile_h(H, W, target_rows=target_rows)
    num_t = H // TH
    TP = TH * W
    HP, WP = H + 2, W + 2
    vmem_limit = _vmem_limit_bytes()

    # ---- glue: NCHW -> NHWC, bf16, spatial zero pad (pad=1) ------------------
    # TODO(synk): for large spatial inputs on v7x, replace the resident padded
    # sample with per-row-tile halo blocks (element-offset indexing / manual
    # DMA) so input VMEM is O(TH*W*Cin) and this pad copy disappears.
    x_pad = jnp.pad(
        jnp.transpose(x_nchw, (0, 2, 3, 1)).astype(jnp.bfloat16),
        ((0, 0), (1, 1), (1, 1), (0, 0)))

    # (Cout,Cin,3,3) -> (kh,kw,ci,co) -> (9*Cin, Cout), zero-padded, bf16.
    w_mat = jnp.transpose(weight_oihw, (2, 3, 1, 0)).reshape(K, Cout)
    w_mat = jnp.pad(w_mat, ((0, KP - K), (0, CP - Cout))).astype(jnp.bfloat16)

    # ---- pass 1: per-channel sum / sum-of-squares ----------------------------
    psum, pssq = pl.pallas_call(
        functools.partial(conv_stats_kernel, tile_h=TH),
        out_shape=(jax.ShapeDtypeStruct((N, 1, CP), jnp.float32),
                   jax.ShapeDtypeStruct((N, 1, CP), jnp.float32)),
        grid_spec=pltpu.PrefetchScalarGridSpec(
            num_scalar_prefetch=0,
            grid=(N, num_t),
            in_specs=[
                # padded sample, resident across its row tiles (bf16)
                pl.BlockSpec((1, HP, WP, Cin), lambda n, t: (n, 0, 0, 0)),
                # padded weight matrix, resident for the whole grid
                pl.BlockSpec((KP, CP), lambda n, t: (0, 0)),
            ],
            out_specs=[
                pl.BlockSpec((1, 1, CP), lambda n, t: (n, 0, 0)),   # accumulators
                pl.BlockSpec((1, 1, CP), lambda n, t: (n, 0, 0)),
            ],
        ),
        compiler_params=pltpu.CompilerParams(
            # reduction (row-tile) axis is last and "arbitrary"; batch stays
            # "parallel" so v7x's two TensorCores split samples.
            dimension_semantics=("parallel", "arbitrary"),
            vmem_limit_bytes=vmem_limit),
    )(x_pad, w_mat)

    # ---- tiny per-channel combine (CP-sized glue) ----------------------------
    count = jnp.float32(N * H * W)
    tot_sum = jnp.sum(psum[:, 0, :], axis=0)                  # (CP,)
    tot_ssq = jnp.sum(pssq[:, 0, :], axis=0)                  # (CP,)
    mean = tot_sum / count
    var = jnp.maximum(tot_ssq / count - mean * mean, 0.0)     # biased (training BN)
    inv_std = jax.lax.rsqrt(var + EPS)
    g = jnp.pad(gamma.astype(jnp.float32), (0, CP - Cout))
    b = jnp.pad(beta.astype(jnp.float32), (0, CP - Cout))
    scale = (g * inv_std).reshape(1, CP)
    shift = (b - mean * g * inv_std).reshape(1, CP)
    # TODO(synk): BatchNorm2d running_mean/running_var EMA buffers are not
    # updated here (stateless forward; output matches training-mode BN).

    # ---- pass 2: recompute conv + normalize, write final output --------------
    out_flat = pl.pallas_call(
        functools.partial(conv_bn_apply_kernel, tile_h=TH),
        out_shape=jax.ShapeDtypeStruct((N, Cout, H * W), jnp.float32),
        grid_spec=pltpu.PrefetchScalarGridSpec(
            num_scalar_prefetch=0,
            grid=(N, num_t),
            in_specs=[
                pl.BlockSpec((1, HP, WP, Cin), lambda n, t: (n, 0, 0, 0)),
                pl.BlockSpec((KP, CP), lambda n, t: (0, 0)),
                pl.BlockSpec((1, CP), lambda n, t: (0, 0)),
                pl.BlockSpec((1, CP), lambda n, t: (0, 0)),
            ],
            out_specs=pl.BlockSpec((1, Cout, TP), lambda n, t: (n, 0, t)),
        ),
        compiler_params=pltpu.CompilerParams(
            dimension_semantics=("parallel", "parallel"),
            vmem_limit_bytes=vmem_limit),
    )(x_pad, w_mat, scale, shift)

    # free metadata reshape to NCHW (no trailing XLA slice/transpose round trip)
    return out_flat.reshape(N, Cout, H, W)


# --------------------------------------------------------------------------- #
# Pure-JAX reference matching PyTorch ConvBn2d.forward (training-mode BN)
# --------------------------------------------------------------------------- #
def reference_conv_bn2d(x_nchw, weight_oihw, gamma, beta):
    y = jax.lax.conv_general_dilated(
        x_nchw, weight_oihw, window_strides=(1, 1), padding=((1, 1), (1, 1)),
        dimension_numbers=("NCHW", "OIHW", "NCHW"))
    mean = jnp.mean(y, axis=(0, 2, 3), keepdims=True)
    var = jnp.mean((y - mean) ** 2, axis=(0, 2, 3), keepdims=True)
    g = gamma.reshape(1, -1, 1, 1)
    b = beta.reshape(1, -1, 1, 1)
    return (y - mean) * jax.lax.rsqrt(var + EPS) * g + b


if __name__ == "__main__":
    # small shapes consistent with the module: N=2, Cin=4, Cout=8, 16x16 spatial
    N, Cin, Cout, H, W = 2, 4, 8, 16, 16

    key = jax.random.PRNGKey(0)
    kx, kw = jax.random.split(key)
    x = jax.random.normal(kx, (N, Cin, H, W), jnp.float32)
    weight = jax.random.normal(kw, (Cout, Cin, 3, 3), jnp.float32) * 0.1
    gamma = jnp.ones((Cout,), jnp.float32)    # BatchNorm2d.weight init
    beta = jnp.zeros((Cout,), jnp.float32)    # BatchNorm2d.bias init

    fn = jax.jit(conv_bn2d)
    out = jax.block_until_ready(fn(x, weight, gamma, beta))
    assert out.shape == (N, Cout, H, W)

    # Tight structural check: reference computed with the same bf16-rounded
    # matmul operands (f32 accumulation everywhere) -> only accumulation-order
    # noise remains.
    xq = x.astype(jnp.bfloat16).astype(jnp.float32)
    wq = weight.astype(jnp.bfloat16).astype(jnp.float32)
    ref_q = reference_conv_bn2d(xq, wq, gamma, beta)
    err_q = jnp.max(jnp.abs(out - ref_q))
    assert jnp.allclose(out, ref_q, rtol=1e-3, atol=1e-3), \
        f"max abs err vs bf16-operand ref {err_q}"

    # Loose check vs exact f32 PyTorch-semantics reference (tolerance loosened
    # because the kernel feeds the MXU bf16 operands).
    ref = reference_conv_bn2d(x, weight, gamma, beta)
    err = jnp.max(jnp.abs(out - ref))
    assert jnp.allclose(out, ref, rtol=5e-2, atol=5e-2), \
        f"max abs err vs f32 ref {err}"

    print("KERNEL_OK")
</pallas_src>

<mosaic_0001>
module attributes {stable_mosaic.version = 11 : i64} {
  func.func @conv_stats_kernel(%arg0: i32, %arg1: i32, %arg2: memref<1x18x18x4xbf16, #tpu.memory_space<vmem>>, %arg3: memref<128x128xbf16, #tpu.memory_space<vmem>>, %arg4: memref<1x1x128xf32, #tpu.memory_space<vmem>>, %arg5: memref<1x1x128xf32, #tpu.memory_space<vmem>>) attributes {dimension_semantics = [#tpu.dimension_semantics<parallel>, #tpu.dimension_semantics<arbitrary>], iteration_bounds = array<i64: 2, 1>, scalar_prefetch = 0 : i64, scratch_operands = 0 : i64, tpu.core_type = #tpu.core_type<tc>, window_params = [{transform_indices = @transform_0, window_bounds = array<i64: 1, 18, 18, 4>}, {pipeline_mode = #tpu.pipeline_mode<synchronous>, transform_indices = @transform_1, window_bounds = array<i64: 128, 128>}, {transform_indices = @transform_2, window_bounds = array<i64: 1, 1, 128>}, {transform_indices = @transform_3, window_bounds = array<i64: 1, 1, 128>}]} {
    %c16_i32 = arith.constant 16 : i32
    %0 = arith.muli %arg1, %c16_i32 : i32
    %1 = tpu.assume_multiple %0, 8 : i32
    %c0_i32 = arith.constant 0 : i32
    %2 = arith.addi %1, %c0_i32 : i32
    %c0 = arith.constant 0 : index
    %3 = arith.index_cast %2 : i32 to index
    %c0_0 = arith.constant 0 : index
    %c0_1 = arith.constant 0 : index
    %4 = vector.load %arg2[%c0, %3, %c0_0, %c0_1] : memref<1x18x18x4xbf16, #tpu.memory_space<vmem>>, vector<1x16x16x4xbf16>
    %5 = vector.shape_cast %4 : vector<1x16x16x4xbf16> to vector<256x4xbf16>
    %c0_i32_2 = arith.constant 0 : i32
    %6 = arith.addi %1, %c0_i32_2 : i32
    %c0_3 = arith.constant 0 : index
    %7 = arith.index_cast %6 : i32 to index
    %c1 = arith.constant 1 : index
    %c0_4 = arith.constant 0 : index
    %8 = vector.load %arg2[%c0_3, %7, %c1, %c0_4] : memref<1x18x18x4xbf16, #tpu.memory_space<vmem>>, vector<1x16x16x4xbf16>
    %9 = vector.shape_cast %8 : vector<1x16x16x4xbf16> to vector<256x4xbf16>
    %c0_i32_5 = arith.constant 0 : i32
    %10 = arith.addi %1, %c0_i32_5 : i32
    %c0_6 = arith.constant 0 : index
    %11 = arith.index_cast %10 : i32 to index
    %c2 = arith.constant 2 : index
    %c0_7 = arith.constant 0 : index
    %12 = vector.load %arg2[%c0_6, %11, %c2, %c0_7] : memref<1x18x18x4xbf16, #tpu.memory_space<vmem>>, vector<1x16x16x4xbf16>
    %13 = vector.shape_cast %12 : vector<1x16x16x4xbf16> to vector<256x4xbf16>
    %c1_i32 = arith.constant 1 : i32
    %14 = arith.addi %1, %c1_i32 : i32
    %c0_8 = arith.constant 0 : index
    %15 = arith.index_cast %14 : i32 to index
    %c0_9 = arith.constant 0 : index
    %c0_10 = arith.constant 0 : index
    %16 = vector.load %arg2[%c0_8, %15, %c0_9, %c0_10] : memref<1x18x18x4xbf16, #tpu.memory_space<vmem>>, vector<1x16x16x4xbf16>
    %17 = vector.shape_cast %16 : vector<1x16x16x4xbf16> to vector<256x4xbf16>
    %c1_i32_11 = arith.constant 1 : i32
    %18 = arith.addi %1, %c1_i32_11 : i32
    %c0_12 = arith.constant 0 : index
    %19 = arith.index_cast %18 : i32 to index
    %c1_13 = arith.constant 1 : index
    %c0_14 = arith.constant 0 : index
    %20 = vector.load %arg2[%c0_12, %19, %c1_13, %c0_14] : memref<1x18x18x4xbf16, #tpu.memory_space<vmem>>, vector<1x16x16x4xbf16>
    %21 = vector.shape_cast %20 : vector<1x16x16x4xbf16> to vector<256x4xbf16>
    %c1_i32_15 = arith.constant 1 : i32
    %22 = arith.addi %1, %c1_i32_15 : i32
    %c0_16 = arith.constant 0 : index
    %23 = arith.index_cast %22 : i32 to index
    %c2_17 = arith.constant 2 : index
    %c0_18 = arith.constant 0 : index
    %24 = vector.load %arg2[%c0_16, %23, %c2_17, %c0_18] : memref<1x18x18x4xbf16, #tpu.memory_space<vmem>>, vector<1x16x16x4xbf16>
    %25 = vector.shape_cast %24 : vector<1x16x16x4xbf16> to vector<256x4xbf16>
    %c2_i32 = arith.constant 2 : i32
    %26 = arith.addi %1, %c2_i32 : i32
    %c0_19 = arith.constant 0 : index
    %27 = arith.index_cast %26 : i32 to index
    %c0_20 = arith.constant 0 : index
    %c0_21 = arith.constant 0 : index
    %28 = vector.load %arg2[%c0_19, %27, %c0_20, %c0_21] : memref<1x18x18x4xbf16, #tpu.memory_space<vmem>>, vector<1x16x16x4xbf16>
    %29 = vector.shape_cast %28 : vector<1x16x16x4xbf16> to vector<256x4xbf16>
    %c2_i32_22 = arith.constant 2 : i32
    %30 = arith.addi %1, %c2_i32_22 : i32
    %c0_23 = arith.constant 0 : index
    %31 = arith.index_cast %30 : i32 to index
    %c1_24 = arith.constant 1 : index
    %c0_25 = arith.constant 0 : index
    %32 = vector.load %arg2[%c0_23, %31, %c1_24, %c0_25] : memref<1x18x18x4xbf16, #tpu.memory_space<vmem>>, vector<1x16x16x4xbf16>
    %33 = vector.shape_cast %32 : vector<1x16x16x4xbf16> to vector<256x4xbf16>
    %c2_i32_26 = arith.constant 2 : i32
    %34 = arith.addi %1, %c2_i32_26 : i32
    %c0_27 = arith.constant 0 : index
    %35 = arith.index_cast %34 : i32 to index
    %c2_28 = arith.constant 2 : index
    %c0_29 = arith.constant 0 : index
    %36 = vector.load %arg2[%c0_27, %35, %c2_28, %c0_29] : memref<1x18x18x4xbf16, #tpu.memory_space<vmem>>, vector<1x16x16x4xbf16>
    %37 = vector.shape_cast %36 : vector<1x16x16x4xbf16> to vector<256x4xbf16>
    %cst = arith.constant 0.000000e+00 : bf16
    %38 = vector.broadcast %cst : bf16 to vector<256x92xbf16>
    %39 = tpu.concatenate %5, %9, %13, %17, %21, %25, %29, %33, %37, %38 in 1 : vector<256x4xbf16>, vector<256x4xbf16>, vector<256x4xbf16>, vector<256x4xbf16>, vector<256x4xbf16>, vector<256x4xbf16>, vector<256x4xbf16>, vector<256x4xbf16>, vector<256x4xbf16>, vector<256x92xbf16> -> vector<256x128xbf16>
    %c0_30 = arith.constant 0 : index
    %c0_31 = arith.constant 0 : index
    %40 = vector.load %arg3[%c0_30, %c0_31] : memref<128x128xbf16, #tpu.memory_space<vmem>>, vector<128x128xbf16>
    %cst_32 = arith.constant dense<0.000000e+00> : vector<256x128xf32>
    %41 = tpu.matmul %39, %40, %cst_32 {dimension_numbers = #tpu.dot_dimension_numbers<[1], [0], [0], [1], [0, 0, 1, 1], [], []>} : vector<256x128xbf16>, vector<128x128xbf16>, vector<256x128xf32> -> vector<256x128xf32>
    %c0_i32_33 = arith.constant 0 : i32
    %42 = arith.cmpi eq, %arg1, %c0_i32_33 : i32
    %43 = arith.extui %42 : i1 to i32
    %c0_i32_34 = arith.constant 0 : i32
    %44 = arith.cmpi ne, %43, %c0_i32_34 : i32
    scf.if %44 {
      %cst_49 = arith.constant 0.000000e+00 : f32
      %58 = vector.broadcast %cst_49 : f32 to vector<1x1x128xf32>
      %c0_50 = arith.constant 0 : index
      %c0_51 = arith.constant 0 : index
      %c0_52 = arith.constant 0 : index
      %59 = vector.load %arg4[%c0_50, %c0_51, %c0_52] : memref<1x1x128xf32, #tpu.memory_space<vmem>>, vector<1x1x128xf32>
      tpu.vector_store %arg4[%c0_50, %c0_51, %c0_52], %58 {strides = array<i32>} : memref<1x1x128xf32, #tpu.memory_space<vmem>>, vector<1x1x128xf32>,
      %cst_53 = arith.constant 0.000000e+00 : f32
      %60 = vector.broadcast %cst_53 : f32 to vector<1x1x128xf32>
      %c0_54 = arith.constant 0 : index
      %c0_55 = arith.constant 0 : index
      %c0_56 = arith.constant 0 : index
      %61 = vector.load %arg5[%c0_54, %c0_55, %c0_56] : memref<1x1x128xf32, #tpu.memory_space<vmem>>, vector<1x1x128xf32>
      tpu.vector_store %arg5[%c0_54, %c0_55, %c0_56], %60 {strides = array<i32>} : memref<1x1x128xf32, #tpu.memory_space<vmem>>, vector<1x1x128xf32>,
    } else {
    }
    %c0_35 = arith.constant 0 : index
    %c0_36 = arith.constant 0 : index
    %c0_37 = arith.constant 0 : index
    %45 = vector.load %arg4[%c0_35, %c0_36, %c0_37] : memref<1x1x128xf32, #tpu.memory_space<vmem>>, vector<1x1x128xf32>
    %cst_38 = arith.constant dense<0.000000e+00> : vector<128xf32>
    %46 = vector.multi_reduction <add>, %41, %cst_38 [0] : vector<256x128xf32> to vector<128xf32>
    %47 = vector.shape_cast %46 : vector<128xf32> to vector<1x128xf32>
    %48 = vector.shape_cast %47 : vector<1x128xf32> to vector<1x1x128xf32>
    %49 = arith.addf %45, %48 : vector<1x1x128xf32>
    %c0_39 = arith.constant 0 : index
    %c0_40 = arith.constant 0 : index
    %c0_41 = arith.constant 0 : index
    %50 = vector.load %arg4[%c0_39, %c0_40, %c0_41] : memref<1x1x128xf32, #tpu.memory_space<vmem>>, vector<1x1x128xf32>
    tpu.vector_store %arg4[%c0_39, %c0_40, %c0_41], %49 {strides = array<i32>} : memref<1x1x128xf32, #tpu.memory_space<vmem>>, vector<1x1x128xf32>,
    %c0_42 = arith.constant 0 : index
    %c0_43 = arith.constant 0 : index
    %c0_44 = arith.constant 0 : index
    %51 = vector.load %arg5[%c0_42, %c0_43, %c0_44] : memref<1x1x128xf32, #tpu.memory_space<vmem>>, vector<1x1x128xf32>
    %52 = arith.mulf %41, %41 : vector<256x128xf32>
    %cst_45 = arith.constant dense<0.000000e+00> : vector<128xf32>
    %53 = vector.multi_reduction <add>, %52, %cst_45 [0] : vector<256x128xf32> to vector<128xf32>
    %54 = vector.shape_cast %53 : vector<128xf32> to vector<1x128xf32>
    %55 = vector.shape_cast %54 : vector<1x128xf32> to vector<1x1x128xf32>
    %56 = arith.addf %51, %55 : vector<1x1x128xf32>
    %c0_46 = arith.constant 0 : index
    %c0_47 = arith.constant 0 : index
    %c0_48 = arith.constant 0 : index
    %57 = vector.load %arg5[%c0_46, %c0_47, %c0_48] : memref<1x1x128xf32, #tpu.memory_space<vmem>>, vector<1x1x128xf32>
    tpu.vector_store %arg5[%c0_46, %c0_47, %c0_48], %56 {strides = array<i32>} : memref<1x1x128xf32, #tpu.memory_space<vmem>>, vector<1x1x128xf32>,
    return
  }
  func.func @transform_0(%arg0: i32, %arg1: i32) -> (i32, i32, i32, i32) {
    %c0_i32 = arith.constant 0 : i32
    %c0_i32_0 = arith.constant 0 : i32
    %c0_i32_1 = arith.constant 0 : i32
    %c0_i32_2 = arith.constant 0 : i32
    return %arg0, %c0_i32, %c0_i32_0, %c0_i32_1 : i32, i32, i32, i32
  }
  func.func @transform_1(%arg0: i32, %arg1: i32) -> (i32, i32) {
    %c0_i32 = arith.constant 0 : i32
    %c0_i32_0 = arith.constant 0 : i32
    %c0_i32_1 = arith.constant 0 : i32
    return %c0_i32, %c0_i32_0 : i32, i32
  }
  func.func @transform_2(%arg0: i32, %arg1: i32) -> (i32, i32, i32) {
    %c0_i32 = arith.constant 0 : i32
    %c0_i32_0 = arith.constant 0 : i32
    %c0_i32_1 = arith.constant 0 : i32
    return %arg0, %c0_i32, %c0_i32_0 : i32, i32, i32
  }
  func.func @transform_3(%arg0: i32, %arg1: i32) -> (i32, i32, i32) {
    %c0_i32 = arith.constant 0 : i32
    %c0_i32_0 = arith.constant 0 : i32
    %c0_i32_1 = arith.constant 0 : i32
    return %arg0, %c0_i32, %c0_i32_0 : i32, i32, i32
  }
}

module attributes {stable_mosaic.version = 11 : i64} {
  func.func @conv_bn_apply_kernel(%arg0: i32, %arg1: i32, %arg2: memref<1x18x18x4xbf16, #tpu.memory_space<vmem>>, %arg3: memref<128x128xbf16, #tpu.memory_space<vmem>>, %arg4: memref<1x128xf32, #tpu.memory_space<vmem>>, %arg5: memref<1x128xf32, #tpu.memory_space<vmem>>, %arg6: memref<1x8x256xf32, #tpu.memory_space<vmem>>) attributes {dimension_semantics = [#tpu.dimension_semantics<parallel>, #tpu.dimension_semantics<parallel>], iteration_bounds = array<i64: 2, 1>, scalar_prefetch = 0 : i64, scratch_operands = 0 : i64, tpu.core_type = #tpu.core_type<tc>, window_params = [{transform_indices = @transform_0, window_bounds = array<i64: 1, 18, 18, 4>}, {pipeline_mode = #tpu.pipeline_mode<synchronous>, transform_indices = @transform_1, window_bounds = array<i64: 128, 128>}, {pipeline_mode = #tpu.pipeline_mode<synchronous>, transform_indices = @transform_2, window_bounds = array<i64: 1, 128>}, {pipeline_mode = #tpu.pipeline_mode<synchronous>, transform_indices = @transform_3, window_bounds = array<i64: 1, 128>}, {transform_indices = @transform_4, window_bounds = array<i64: 1, 8, 256>}]} {
    %c16_i32 = arith.constant 16 : i32
    %0 = arith.muli %arg1, %c16_i32 : i32
    %1 = tpu.assume_multiple %0, 8 : i32
    %c0_i32 = arith.constant 0 : i32
    %2 = arith.addi %1, %c0_i32 : i32
    %c0 = arith.constant 0 : index
    %3 = arith.index_cast %2 : i32 to index
    %c0_0 = arith.constant 0 : index
    %c0_1 = arith.constant 0 : index
    %4 = vector.load %arg2[%c0, %3, %c0_0, %c0_1] : memref<1x18x18x4xbf16, #tpu.memory_space<vmem>>, vector<1x16x16x4xbf16>
    %5 = vector.shape_cast %4 : vector<1x16x16x4xbf16> to vector<256x4xbf16>
    %c0_i32_2 = arith.constant 0 : i32
    %6 = arith.addi %1, %c0_i32_2 : i32
    %c0_3 = arith.constant 0 : index
    %7 = arith.index_cast %6 : i32 to index
    %c1 = arith.constant 1 : index
    %c0_4 = arith.constant 0 : index
    %8 = vector.load %arg2[%c0_3, %7, %c1, %c0_4] : memref<1x18x18x4xbf16, #tpu.memory_space<vmem>>, vector<1x16x16x4xbf16>
    %9 = vector.shape_cast %8 : vector<1x16x16x4xbf16> to vector<256x4xbf16>
    %c0_i32_5 = arith.constant 0 : i32
    %10 = arith.addi %1, %c0_i32_5 : i32
    %c0_6 = arith.constant 0 : index
    %11 = arith.index_cast %10 : i32 to index
    %c2 = arith.constant 2 : index
    %c0_7 = arith.constant 0 : index
    %12 = vector.load %arg2[%c0_6, %11, %c2, %c0_7] : memref<1x18x18x4xbf16, #tpu.memory_space<vmem>>, vector<1x16x16x4xbf16>
    %13 = vector.shape_cast %12 : vector<1x16x16x4xbf16> to vector<256x4xbf16>
    %c1_i32 = arith.constant 1 : i32
    %14 = arith.addi %1, %c1_i32 : i32
    %c0_8 = arith.constant 0 : index
    %15 = arith.index_cast %14 : i32 to index
    %c0_9 = arith.constant 0 : index
    %c0_10 = arith.constant 0 : index
    %16 = vector.load %arg2[%c0_8, %15, %c0_9, %c0_10] : memref<1x18x18x4xbf16, #tpu.memory_space<vmem>>, vector<1x16x16x4xbf16>
    %17 = vector.shape_cast %16 : vector<1x16x16x4xbf16> to vector<256x4xbf16>
    %c1_i32_11 = arith.constant 1 : i32
    %18 = arith.addi %1, %c1_i32_11 : i32
    %c0_12 = arith.constant 0 : index
    %19 = arith.index_cast %18 : i32 to index
    %c1_13 = arith.constant 1 : index
    %c0_14 = arith.constant 0 : index
    %20 = vector.load %arg2[%c0_12, %19, %c1_13, %c0_14] : memref<1x18x18x4xbf16, #tpu.memory_space<vmem>>, vector<1x16x16x4xbf16>
    %21 = vector.shape_cast %20 : vector<1x16x16x4xbf16> to vector<256x4xbf16>
    %c1_i32_15 = arith.constant 1 : i32
    %22 = arith.addi %1, %c1_i32_15 : i32
    %c0_16 = arith.constant 0 : index
    %23 = arith.index_cast %22 : i32 to index
    %c2_17 = arith.constant 2 : index
    %c0_18 = arith.constant 0 : index
    %24 = vector.load %arg2[%c0_16, %23, %c2_17, %c0_18] : memref<1x18x18x4xbf16, #tpu.memory_space<vmem>>, vector<1x16x16x4xbf16>
    %25 = vector.shape_cast %24 : vector<1x16x16x4xbf16> to vector<256x4xbf16>
    %c2_i32 = arith.constant 2 : i32
    %26 = arith.addi %1, %c2_i32 : i32
    %c0_19 = arith.constant 0 : index
    %27 = arith.index_cast %26 : i32 to index
    %c0_20 = arith.constant 0 : index
    %c0_21 = arith.constant 0 : index
    %28 = vector.load %arg2[%c0_19, %27, %c0_20, %c0_21] : memref<1x18x18x4xbf16, #tpu.memory_space<vmem>>, vector<1x16x16x4xbf16>
    %29 = vector.shape_cast %28 : vector<1x16x16x4xbf16> to vector<256x4xbf16>
    %c2_i32_22 = arith.constant 2 : i32
    %30 = arith.addi %1, %c2_i32_22 : i32
    %c0_23 = arith.constant 0 : index
    %31 = arith.index_cast %30 : i32 to index
    %c1_24 = arith.constant 1 : index
    %c0_25 = arith.constant 0 : index
    %32 = vector.load %arg2[%c0_23, %31, %c1_24, %c0_25] : memref<1x18x18x4xbf16, #tpu.memory_space<vmem>>, vector<1x16x16x4xbf16>
    %33 = vector.shape_cast %32 : vector<1x16x16x4xbf16> to vector<256x4xbf16>
    %c2_i32_26 = arith.constant 2 : i32
    %34 = arith.addi %1, %c2_i32_26 : i32
    %c0_27 = arith.constant 0 : index
    %35 = arith.index_cast %34 : i32 to index
    %c2_28 = arith.constant 2 : index
    %c0_29 = arith.constant 0 : index
    %36 = vector.load %arg2[%c0_27, %35, %c2_28, %c0_29] : memref<1x18x18x4xbf16, #tpu.memory_space<vmem>>, vector<1x16x16x4xbf16>
    %37 = vector.shape_cast %36 : vector<1x16x16x4xbf16> to vector<256x4xbf16>
    %cst = arith.constant 0.000000e+00 : bf16
    %38 = vector.broadcast %cst : bf16 to vector<256x92xbf16>
    %39 = tpu.concatenate %5, %9, %13, %17, %21, %25, %29, %33, %37, %38 in 1 : vector<256x4xbf16>, vector<256x4xbf16>, vector<256x4xbf16>, vector<256x4xbf16>, vector<256x4xbf16>, vector<256x4xbf16>, vector<256x4xbf16>, vector<256x4xbf16>, vector<256x4xbf16>, vector<256x92xbf16> -> vector<256x128xbf16>
    %c0_30 = arith.constant 0 : index
    %c0_31 = arith.constant 0 : index
    %40 = vector.load %arg3[%c0_30, %c0_31] : memref<128x128xbf16, #tpu.memory_space<vmem>>, vector<128x128xbf16>
    %cst_32 = arith.constant dense<0.000000e+00> : vector<256x128xf32>
    %41 = tpu.matmul %39, %40, %cst_32 {dimension_numbers = #tpu.dot_dimension_numbers<[1], [0], [0], [1], [0, 0, 1, 1], [], []>} : vector<256x128xbf16>, vector<128x128xbf16>, vector<256x128xf32> -> vector<256x128xf32>
    %c0_33 = arith.constant 0 : index
    %c0_34 = arith.constant 0 : index
    %42 = vector.load %arg4[%c0_33, %c0_34] : memref<1x128xf32, #tpu.memory_space<vmem>>, vector<1x128xf32>
    %43 = vector.broadcast %42 : vector<1x128xf32> to vector<256x128xf32>
    %44 = arith.mulf %41, %43 : vector<256x128xf32>
    %c0_35 = arith.constant 0 : index
    %c0_36 = arith.constant 0 : index
    %45 = vector.load %arg5[%c0_35, %c0_36] : memref<1x128xf32, #tpu.memory_space<vmem>>, vector<1x128xf32>
    %46 = vector.broadcast %45 : vector<1x128xf32> to vector<256x128xf32>
    %47 = arith.addf %44, %46 : vector<256x128xf32>
    %48 = tpu.transpose %47, [1, 0] : vector<256x128xf32> -> vector<128x256xf32>
    %49 = vector.extract_strided_slice %48 {offsets = [0, 0], sizes = [8, 256], strides = [1, 1]} : vector<128x256xf32> to vector<8x256xf32>
    %50 = vector.shape_cast %49 : vector<8x256xf32> to vector<1x8x256xf32>
    %c0_37 = arith.constant 0 : index
    %c0_38 = arith.constant 0 : index
    %c0_39 = arith.constant 0 : index
    %51 = vector.load %arg6[%c0_37, %c0_38, %c0_39] : memref<1x8x256xf32, #tpu.memory_space<vmem>>, vector<1x8x256xf32>
    tpu.vector_store %arg6[%c0_37, %c0_38, %c0_39], %50 {strides = array<i32>} : memref<1x8x256xf32, #tpu.memory_space<vmem>>, vector<1x8x256xf32>,
    return
  }
  func.func @transform_0(%arg0: i32, %arg1: i32) -> (i32, i32, i32, i32) {
    %c0_i32 = arith.constant 0 : i32
    %c0_i32_0 = arith.constant 0 : i32
    %c0_i32_1 = arith.constant 0 : i32
    %c0_i32_2 = arith.constant 0 : i32
    return %arg0, %c0_i32, %c0_i32_0, %c0_i32_1 : i32, i32, i32, i32
  }
  func.func @transform_1(%arg0: i32, %arg1: i32) -> (i32, i32) {
    %c0_i32 = arith.constant 0 : i32
    %c0_i32_0 = arith.constant 0 : i32
    %c0_i32_1 = arith.constant 0 : i32
    return %c0_i32, %c0_i32_0 : i32, i32
  }
  func.func @transform_2(%arg0: i32, %arg1: i32) -> (i32, i32) {
    %c0_i32 = arith.constant 0 : i32
    %c0_i32_0 = arith.constant 0 : i32
    %c0_i32_1 = arith.constant 0 : i32
    return %c0_i32, %c0_i32_0 : i32, i32
  }
  func.func @transform_3(%arg0: i32, %arg1: i32) -> (i32, i32) {
    %c0_i32 = arith.constant 0 : i32
    %c0_i32_0 = arith.constant 0 : i32
    %c0_i32_1 = arith.constant 0 : i32
    return %c0_i32, %c0_i32_0 : i32, i32
  }
  func.func @transform_4(%arg0: i32, %arg1: i32) -> (i32, i32, i32) {
    %c0_i32 = arith.constant 0 : i32
    %c0_i32_0 = arith.constant 0 : i32
    return %arg0, %c0_i32, %arg1 : i32, i32, i32
  }
}

</mosaic_0001>

<bundles_post_ra>
// kernel: conv_bn2d.2
= control target key start
LH: loop header
LB: loop body
LE: loop exit
PB: predicated region body
PF: predicated region fallthrough
CT: control target
= control target key end

     0   :  { %s4125_s12 = smov 0   ;;  %s4127_s13 = smov 0   ;;  %s5791_s0 = inlined_call_operand.vmem [shape: bf16[2,18,18,4], index: 0, kind: input, shape index: {}]   ;;  %s5792_s1 = inlined_call_operand.vmem [shape: bf16[128,128], index: 1, kind: input, shape index: {}]   ;;  %s5793_s2 = inlined_call_operand.vmem [shape: f32[2,1,128], index: 2, kind: output, shape index: {0}]   ;;  %s5794_s3 = inlined_call_operand.vmem [shape: f32[2,1,128], index: 3, kind: output, shape index: {1}]  }
   0x1   :  { %s4129_s14 = smov 0  }
   0x2 LB: > { %s26_s15 = sadd.s32 1, %s4090_s13  ;;  %p3518_p0 = scmp.ge.s32.totalorder %s4094_s14, 1  ;;  %s4094_s14 = sphi %s4129_s14, %s14_s14   ;;  %s4090_s13 = sphi %s4127_s13, %s5800_s13   ;;  %s4086_s12 = sphi %s4125_s12, %s5799_s12  }
   0x3   : > { %p28_p1 = scmp.ge.s32.totalorder %s26_s15, 2  ;;  %p152_p2 = scmp.lt.s32.totalorder %s4094_s14, 3 }
   0x5   : > { %s5802_s15 = smov (%p28_p1, %s26_s15), 0  ;;  %p153_p3 = pnand %p3518_p0, %p152_p2 }
   0x6   : > { %p177_p4 = scmp.lt.s32.totalorder (!%p153_p3), %s4086_s12, 1  ;;  %vm692_vm0 = vcmask (!%p153_p3), 1042432   ;;  %vm693_vm1 = vcmask (!%p153_p3), 1046532   ;;  %s4096_s20 = smov (!%p153_p3), 12   ;;  %vm241_vm3 = vsmask.f32 (!%p153_p3), 3328 }
   0x7   : > { %156 = sbr.rel (%p153_p3) target bundleno = 696 (0x2b8), region = 28  ;;  %vm4173_vm2 = vmor (!%p153_p3), %vm692_vm0, %vm693_vm1  ;;  %vm242_vm4 = vsmask.f32 (!%p153_p3), 7440  ;;  %s4097_s21 = smov (!%p153_p3), 20   ;;  %vm2767_vm6 = vcmask (!%p153_p3), 31744   ;;  %vm2816_vm7 = vcmask (!%p153_p3), 64512  }
   0x8   : > { %s4098_s22 = smov (!%p153_p3), 8   ;;  %vm4223_vm5 = vmor (!%p153_p3), %vm241_vm3, %vm242_vm4  ;;  %s4099_s27 = smov (!%p153_p3), 4   ;;  %vm2849_vm8 = vcmask (!%p153_p3), 97280   ;;  %vm2882_vm9 = vcmask (!%p153_p3), 130048   ;;  %vm2915_vm10 = vcmask (!%p153_p3), 162816   ;;  %vm2948_vm11 = vcmask (!%p153_p3), 195584  }
   0x9   : > { %s4100_s30 = smov (!%p153_p3), 16   ;;  %s4101_s6 = smov (!%p153_p3), 24   ;;  %vm2981_vm12 = vcmask (!%p153_p3), 228352   ;;  %vm3014_vm13 = vcmask (!%p153_p3), 261120   ;;  %vm3047_vm14 = vcmask (!%p153_p3), 293888  }
   0xa   : > { %s4102_s7 = smov (!%p153_p3), 28  }
   0xe   : > { %s5804_s12 = smov (!%p177_p4, %s4086_s12), 1 }
   0xf   : > { %s3954_s16 = smul.u32 216, %s5804_s12  ;;  %s5774_s26 = scalar_lea.vmem %s5794_s3, %s5804_s12 }
  0x11   : > { %s4149_s19 = scalar_lea.vmem %s5791_s0, %s3954_s16  ;;  %s4103_s16 = smov 32  }
  0x12   : > { %v3538_v0 = vld [vmem:[%s4149_s19 + $0x18] sm:$0xf]  ;;  %v4153_v1 = vld [vmem:[%s4149_s19 + $0x1c] sm:$0xf]  ;;  %v3536_v2 = vld [vmem:[%s4149_s19 + $0xc] sm:$0xf] }
  0x13   : > { %v893_v3 = vshll.u32 %v4153_v1, 16  ;;  %v897_v4 = vshrl.u32 %v4153_v1, 16  ;;  %v3745_v5 = vcombine.low %v3538_v0, %v4153_v1  ;;  %v884_v6 = vshrl.u32 %v3538_v0, 16  ;;  %v4160_v7 = vld [vmem:[%s4149_s19 + $0x10] sm:$0xf] }
  0x14   : > { %v887_v8 = vshll.u32 %v3538_v0, 16  ;;  %v869_v9 = vshll.u32 %v4160_v7, 16  ;;  %v873_v10 = vshrl.u32 %v4160_v7, 16  ;;  %v3744_v11 = vcombine.low %v3536_v2, %v4160_v7  ;;  %v4166_v12 = vld [vmem:[%s4149_s19 + $0x14] sm:$0x1] }
  0x15   : > { %v4168_v13 = vrot.slane %v897_v4, 4  ;;  %2321 = vrot.lane.b32.xlu1 %v3745_v5, %s4096_s20  ;;  %v886_v14 = vrot.slane %v884_v6, 4  ;;  %v860_v15 = vshrl.u32 %v3536_v2, 16  ;;  %v863_v16 = vshll.u32 %v3536_v2, 16  ;;  %v3584_v18 = vld [vmem:[%s4149_s19 + $0xc] sm:$0xe] }
  0x16   : > { %v889_v19 = vrot.slane %v887_v8, 5  ;;  %v4178_v20 = vrot.slane %v873_v10, 4  ;;  %2319 = vrot.lane.b32.xlu0 %v3744_v11, %s4096_s20  ;;  %v3600_v21 = vrot.slane %v3584_v18, 9  ;;  %v1309_v22 = vrot.slane %v4160_v7, 5  ;;  %v194_v23 = vld [vmem:[%s4149_s19 + $0x4] sm:$0xf] }
  0x17   : > { %v862_v24 = vrot.slane %v860_v15, 4  ;;  %v865_v25 = vrot.slane %v863_v16, 5  ;;  %v1312_v26 = vrot.slane %v4166_v12, 5  ;;  %v225_v27 = vld [vmem:[%s4149_s19 + $0x8] sm:$0x1]  ;;  %v697_v28 = vrot.slane %v194_v23, 5 }
  0x18   : > { %v890_v29 = vor.u32 %v889_v19, %v886_v14  ;;  %v1310_v30 = vsel %vm4173_vm2, %v3600_v21, %v1309_v22  ;;  %v1311_v31 = vrot.slane %v1309_v22, 4  ;;  %v628_v32 = vld [vmem:[%s4149_s19] sm:$0xe]  ;;  %v700_v33 = vrot.slane %v225_v27, 5  ;;  %v196_v34 = vld [vmem:[%s4149_s19 + $0x10] sm:$0xf] }
  0x19   : > { %v866_v35 = vor.u32 %v865_v25, %v862_v24  ;;  %v3520_v36 = vrot.slane %v628_v32, 9  ;;  %v699_v37 = vrot.slane %v697_v28, 4  ;;  %v4190_v38 = vld [vmem:[%s4149_s19 + $0x14] sm:$0x1]  ;;  %v629_v39 = vld [vmem:[%s4149_s19 + $0xc] sm:$0xe] }
  0x1a   : > { %v4193_v40 = vrot.slane %v890_v29, 4  ;;  %v1313_v41 = vsel %vm4173_vm2, %v1311_v31, %v1312_v26  ;;  %v3521_v42 = vrot.slane %v629_v39, 9  ;;  %v704_v43 = vrot.slane %v196_v34, 5  ;;  %v193_v44 = vld [vmem:[%s4149_s19] sm:$0xf] }
  0x1b   : > { %v4198_v45 = vrot.slane %v866_v35, 4  ;;  %v3776_v46 = vcombine.low %v1310_v30, %v1313_v41  ;;  %v698_v47 = vsel %vm4173_vm2, %v3520_v36, %v697_v28  ;;  %v701_v48 = vsel %vm4173_vm2, %v699_v37, %v700_v33  ;;  %v3585_v49 = vld [vmem:[%s4149_s19 + $0x18] sm:$0xe]  ;;  %v3569_v58 = vld [vmem:[%s4149_s19 + $0x20] sm:$0x1] }
  0x1c   : > { %v3728_v50 = vcombine.low %v698_v47, %v701_v48  ;;  %v705_v51 = vsel %vm4173_vm2, %v3521_v42, %v704_v43  ;;  %v706_v52 = vrot.slane %v704_v43, 4  ;;  %v707_v53 = vrot.slane %v4190_v38, 5  ;;  %v195_v63 = vld [vmem:[%s4149_s19 + $0xc] sm:$0xf]  ;;  %v4002_v19 = vld [vmem:[%s5792_s1] sm:$0xff]  }
  0x1d   : > { %2479 = vrot.lane.b32.xlu0 %v3776_v46, %s4097_s21  ;;  %v245_v54 = vshrl.u32 %v193_v44, 16  ;;  %v248_v55 = vshll.u32 %v193_v44, 16  ;;  %v254_v56 = vshll.u32 %v194_v23, 16  ;;  %v258_v57 = vshrl.u32 %v194_v23, 16  ;;  %3890 = vmatprep.subr.bf16.mxu0 %v4002_v19  ;;  %v4240_v43 = vld [vmem:[%s4149_s19 + $0x24] sm:$0xf] }
  0x1e   : > { %2223 = vrot.lane.b32.xlu1 %v3728_v50, %s4098_s22  ;;  %v708_v59 = vsel %vm4173_vm2, %v706_v52, %v707_v53  ;;  %v264_v60 = vshll.u32 %v225_v27, 16  ;;  %v3601_v61 = vrot.slane %v3585_v49, 9  ;;  %v1316_v62 = vrot.slane %v4153_v1, 5  ;;  %3938 = vmatprep.subr.bf16.mxu1 %v4002_v19  ;;  %v4247_v47 = vld [vmem:[%s4149_s19 + $0x28] sm:$0xf] }
  0x1f   : > { %v3729_v0 = vcombine.low %v705_v51, %v708_v59  ;;  %v247_v2 = vrot.slane %v245_v54, 4  ;;  %v250_v4 = vrot.slane %v248_v55, 5  ;;  %v256_v5 = vrot.slane %v254_v56, 5  ;;  %3891 = vmatpush3.bf16.msra.mxu0 %v4002_v19  ;;  %3946 = vmatpush3.bf16.msra.mxu1 %v4002_v19  ;;  %v4005_v48 = vld [vmem:[%s5792_s1 + $0x8] sm:$0xff]   ;;  %v4262_v53 = vld [vmem:[%s4149_s19 + $0x18] sm:$0xf] }
  0x20   : > { %v260_v6 = vrot.slane %v258_v57, 4  ;;  %v266_v8 = vrot.slane %v264_v60, 5  ;;  %v1317_v10 = vsel %vm4173_vm2, %v3601_v61, %v1316_v62  ;;  %v1318_v11 = vrot.slane %v1316_v62, 4  ;;  %3892 = vmatprep.subr.bf16.mxu0 %v4005_v48  ;;  %v4272_v57 = vld [vmem:[%s4149_s19 + $0x1c] sm:$0xf]  ;;  %3939 = vmatprep.subr.bf16.mxu1 %v4005_v48 }
  0x21   : > { %v251_v14 = vor.u32 %v250_v4, %v247_v2  ;;  %v1319_v15 = vrot.slane %v3569_v58, 5  ;;  %v269_v16 = vshrl.u32 %v195_v63, 16  ;;  %v272_v18 = vshll.u32 %v195_v63, 16  ;;  %v4280_v2 = vld [vmem:[%s4149_s19 + $0x2c] sm:$0x1] }
  0x22   : > { %2225 = vrot.lane.b32.xlu1 %v3729_v0, %s4098_s22  ;;  %v261_v22 = vor.u32 %v260_v6, %v256_v5  ;;  %v278_v23 = vshll.u32 %v196_v34, 16  ;;  %v282_v24 = vshrl.u32 %v196_v34, 16  ;;  %v288_v25 = vshll.u32 %v4190_v38, 16 }
  0x23   : > { %v252_v26 = vrot.slane %v251_v14, 4  ;;  %v1320_v27 = vsel %vm4173_vm2, %v1318_v11, %v1319_v15  ;;  %v271_v28 = vrot.slane %v269_v16, 4  ;;  %v274_v29 = vrot.slane %v272_v18, 5  ;;  %3893 = vmatpush3.bf16.msra.mxu0 %v4005_v48  ;;  %3947 = vmatpush3.bf16.msra.mxu1 %v4005_v48  ;;  %v197_v18 = vld [vmem:[%s4149_s19 + $0x18] sm:$0xf] }
  0x24   : > { %v262_v30 = vrot.slane %v261_v22, 4  ;;  %v3777_v31 = vcombine.low %v1317_v10, %v1320_v27  ;;  %v280_v32 = vrot.slane %v278_v23, 5  ;;  %v284_v33 = vrot.slane %v282_v24, 4  ;;  %v4290_v10 = vld [vmem:[%s4149_s19 + $0x20] sm:$0x1] }
  0x25   : > { %v257_v34 = vsel %vm4223_vm5, %v252_v26, %v256_v5  ;;  %v275_v35 = vor.u32 %v274_v29, %v271_v28  ;;  %v290_v36 = vrot.slane %v288_v25, 5  ;;  %v895_v37 = vrot.slane %v893_v3, 5  ;;  %v4299_v29 = vld [vmem:[%s4149_s19 + $0x1c] sm:$0xf] }
  0x26   : > { %v267_v38 = vsel %vm4223_vm5, %v262_v30, %v266_v8  ;;  %2481 = vrot.lane.b32.xlu1 %v3777_v31, %s4097_s21  ;;  %v285_v39 = vor.u32 %v284_v33, %v280_v32  ;;  %v903_v41 = vshll.u32 %v3569_v58, 16  ;;  %v871_v42 = vrot.slane %v869_v9, 5  ;;  %v4303_v33 = vld [vmem:[%s4149_s19 + $0x20] sm:$0x1] }
  0x27   : > { %v3712_v44 = vcombine.low %v257_v34, %v267_v38  ;;  %v276_v46 = vrot.slane %v275_v35, 4  ;;  %v896_v1 = vsel %vm4223_vm5, %v4193_v40, %v895_v37  ;;  %v900_v3 = vor.u32 %v4168_v13, %v895_v37  ;;  %v4009_v35 = vld [vmem:[%s5792_s1 + $0x18] sm:$0xff]  }
  0x28   : > { %v286_v49 = vrot.slane %v285_v39, 4  ;;  %v905_v7 = vrot.slane %v903_v41, 5  ;;  %v872_v9 = vsel %vm4223_vm5, %v4198_v45, %v871_v42  ;;  %v876_v50 = vor.u32 %v4178_v20, %v871_v42  ;;  %v4007_v45 = vld [vmem:[%s5792_s1 + $0x10] sm:$0xff]   ;;  %v3664_v41 = vld [vmem:[%s4149_s19 + $0x18] sm:$0xe] }
  0x29   : > { %2143 = vrot.lane.b32.xlu0 %v3712_v44, %s4099_s27  ;;  %v281_v13 = vsel %vm4223_vm5, %v276_v46, %v280_v32  ;;  %v901_v40 = vrot.slane %v900_v3, 4  ;;  %v879_v51 = vshll.u32 %v4166_v12, 16  ;;  %v1496_v52 = vshrl.u32 %v4240_v43, 16  ;;  %3894 = vmatprep.subr.bf16.mxu0 %v4007_v45 }
  0x2a   : > { %v291_v20 = vsel %vm4223_vm5, %v286_v49, %v290_v36  ;;  %v877_v54 = vrot.slane %v876_v50, 4  ;;  %v1499_v55 = vshll.u32 %v4240_v43, 16  ;;  %v1509_v56 = vshrl.u32 %v4247_v47, 16  ;;  %3940 = vmatprep.subr.bf16.mxu1 %v4007_v45  ;;  %3895 = vmatpush3.bf16.msra.mxu0 %v4007_v45 }
  0x2b   : > { %v3713_v12 = vcombine.low %v281_v13, %v291_v20  ;;  %v906_v58 = vsel %vm4223_vm5, %v901_v40, %v905_v7  ;;  %v881_v59 = vrot.slane %v879_v51, 5  ;;  %v1498_v60 = vrot.slane %v1496_v52, 4  ;;  %3948 = vmatpush3.bf16.msra.mxu1 %v4007_v45  ;;  %3896 = vmatprep.subr.bf16.mxu0 %v4009_v35  ;;  %v199_v40 = vld [vmem:[%s4149_s19 + $0x24] sm:$0xf]  ;;  %v200_v20 = vld [vmem:[%s4149_s19 + $0x28] sm:$0xf] }
  0x2c   : > { %v3761_v61 = vcombine.low %v896_v1, %v906_v58  ;;  %v1501_v62 = vrot.slane %v1499_v55, 5  ;;  %v3793_v63 = vcombine.low %v4240_v43, %v4247_v47  ;;  %v1472_v0 = vshrl.u32 %v4262_v53, 16  ;;  %3941 = vmatprep.subr.bf16.mxu1 %v4009_v35 }
  0x2d   : > { %2145 = vrot.lane.b32.xlu0 %v3713_v12, %s4099_s27  ;;  %v882_v4 = vsel %vm4223_vm5, %v877_v54, %v881_v59  ;;  %v1475_v5 = vshll.u32 %v4262_v53, 16  ;;  %v1485_v6 = vshrl.u32 %v4272_v57, 16  ;;  %v3792_v8 = vcombine.low %v4262_v53, %v4272_v57 }
  0x2e   : > { %2401 = vrot.lane.b32.xlu1 %v3761_v61, %s4100_s30  ;;  %v3760_v11 = vcombine.low %v872_v9, %v882_v4  ;;  %v1474_v14 = vrot.slane %v1472_v0, 4  ;;  %v1502_v15 = vor.u32 %v1501_v62, %v1498_v60  ;;  %v1505_v16 = vshll.u32 %v4247_v47, 16  ;;  %3897 = vmatpush3.bf16.msra.mxu0 %v4009_v35  ;;  %v4327_v61 = vld [vmem:[%s4149_s19 + $0x2c] sm:$0x1] }
  0x2f   : > { %v1477_v19 = vrot.slane %v1475_v5, 5  ;;  %v1511_v22 = vrot.slane %v1509_v56, 4  ;;  %v1515_v23 = vshll.u32 %v4280_v2, 16  ;;  %v1481_v24 = vshll.u32 %v4272_v57, 16  ;;  %3949 = vmatpush3.bf16.msra.mxu1 %v4009_v35 }
  0x30   : > { %v1503_v25 = vrot.slane %v1502_v15, 4  ;;  %v1507_v26 = vrot.slane %v1505_v16, 5  ;;  %v1487_v27 = vrot.slane %v1485_v6, 4  ;;  %v1491_v28 = vshll.u32 %v4290_v10, 16  ;;  %v3665_v6 = vld [vmem:[%s4149_s19 + $0x24] sm:$0xe] }
  0x31   : > { %2399 = vrot.lane.b32.xlu0 %v3760_v11, %s4100_s30  ;;  %v1517_v30 = vrot.slane %v1515_v23, 5  ;;  %v1478_v31 = vor.u32 %v1477_v19, %v1474_v14  ;;  %v1483_v32 = vrot.slane %v1481_v24, 5  ;;  %v293_v34 = vshrl.u32 %v197_v18, 16  ;;  %v4011_v23 = vld [vmem:[%s5792_s1 + $0x28] sm:$0xff]  }
  0x32   : > { %2577 = vrot.lane.b32.xlu1 %v3793_v63, %s4101_s6  ;;  %v1508_v36 = vsel %vm4223_vm5, %v1503_v25, %v1507_v26  ;;  %v1512_v37 = vor.u32 %v1511_v22, %v1507_v26  ;;  %v1493_v38 = vrot.slane %v1491_v28, 5  ;;  %v296_v39 = vshll.u32 %v197_v18, 16  ;;  %v631_v22 = vld [vmem:[%s4149_s19 + $0x24] sm:$0xe] }
  0x33   : > { %v1479_v42 = vrot.slane %v1478_v31, 4  ;;  %v1488_v43 = vor.u32 %v1487_v27, %v1483_v32  ;;  %v295_v44 = vrot.slane %v293_v34, 4  ;;  %v302_v46 = vshll.u32 %v4299_v29, 16  ;;  %v630_v34 = vld [vmem:[%s4149_s19 + $0x18] sm:$0xe] }
  0x34   : > { %v1513_v1 = vrot.slane %v1512_v37, 4  ;;  %v298_v3 = vrot.slane %v296_v39, 5  ;;  %v306_v48 = vshrl.u32 %v4299_v29, 16  ;;  %v312_v49 = vshll.u32 %v4303_v33, 16 }
  0x35   : > { %2575 = vrot.lane.b32.xlu0 %v3792_v8, %s4101_s6  ;;  %v1484_v7 = vsel %vm4223_vm5, %v1479_v42, %v1483_v32  ;;  %v1489_v9 = vrot.slane %v1488_v43, 4  ;;  %v304_v50 = vrot.slane %v302_v46, 5  ;;  %v3680_v13 = vrot.slane %v3664_v41, 9  ;;  %v4357_v43 = vld [vmem:[%s4149_s19 + $0x30] sm:$0xf] }
  0x36   : > { %v1518_v51 = vsel %vm4223_vm5, %v1513_v1, %v1517_v30  ;;  %v299_v52 = vor.u32 %v298_v3, %v295_v44  ;;  %v308_v53 = vrot.slane %v306_v48, 4  ;;  %v314_v45 = vrot.slane %v312_v49, 5  ;;  %v4014_v44 = vld [vmem:[%s5792_s1 + $0x30] sm:$0xff]  }
  0x37   : > { %v3809_v54 = vcombine.low %v1508_v36, %v1518_v51  ;;  %v1494_v55 = vsel %vm4223_vm5, %v1489_v9, %v1493_v38  ;;  %v1921_v56 = vrot.slane %v4272_v57, 5  ;;  %v1924_v12 = vrot.slane %v4290_v10, 5  ;;  %v4010_v57 = vld [vmem:[%s5792_s1 + $0x20] sm:$0xff]  }
  0x38   : > { %v3808_v58 = vcombine.low %v1484_v7, %v1494_v55  ;;  %v300_v59 = vrot.slane %v299_v52, 4  ;;  %v309_v60 = vor.u32 %v308_v53, %v304_v50  ;;  %v317_v62 = vshrl.u32 %v199_v40, 16  ;;  %3898 = vmatprep.subr.bf16.mxu0 %v4010_v57  ;;  %3942 = vmatprep.subr.bf16.mxu1 %v4010_v57  ;;  %v3540_v53 = vld [vmem:[%s4149_s19 + $0x24] sm:$0xf] }
  0x39   : > { %2657 = vrot.lane.b32.xlu1 %v3809_v54, %s4102_s7  ;;  %v1922_v63 = vsel %vm4173_vm2, %v3680_v13, %v1921_v56  ;;  %v1923_v0 = vrot.slane %v1921_v56, 4  ;;  %v320_v4 = vshll.u32 %v199_v40, 16  ;;  %v326_v5 = vshll.u32 %v200_v20, 16  ;;  %3899 = vmatpush3.bf16.msra.mxu0 %v4010_v57 }
  0x3a   : > { %2655 = vrot.lane.b32.xlu0 %v3808_v58, %s4102_s7  ;;  %v305_v8 = vsel %vm4223_vm5, %v300_v59, %v304_v50  ;;  %v310_v10 = vrot.slane %v309_v60, 4  ;;  %v319_v11 = vrot.slane %v317_v62, 4  ;;  %v330_v14 = vshrl.u32 %v200_v20, 16  ;;  %3950 = vmatpush3.bf16.msra.mxu1 %v4010_v57  ;;  %v4371_v50 = vld [vmem:[%s4149_s19 + $0x34] sm:$0xf] }
  0x3b   : > { %v1925_v15 = vsel %vm4173_vm2, %v1923_v0, %v1924_v12  ;;  %v322_v16 = vrot.slane %v320_v4, 5  ;;  %v328_v18 = vrot.slane %v326_v5, 5  ;;  %v336_v19 = vshll.u32 %v4327_v61, 16  ;;  %3900 = vmatprep.subr.bf16.mxu0 %v4011_v23  ;;  %3943 = vmatprep.subr.bf16.mxu1 %v4011_v23  ;;  %v3571_v59 = vld [vmem:[%s4149_s19 + $0x38] sm:$0x1] }
  0x3c   : > { %v315_v24 = vsel %vm4223_vm5, %v310_v10, %v314_v45  ;;  %v3824_v25 = vcombine.low %v1922_v63, %v1925_v15  ;;  %v332_v26 = vrot.slane %v330_v14, 4  ;;  %v3681_v27 = vrot.slane %v3665_v6, 9  ;;  %v4380_v45 = vld [vmem:[%s4149_s19 + $0x28] sm:$0xf]  ;;  %v3570_v57 = vld [vmem:[%s4149_s19 + $0x2c] sm:$0x1] }
  0x3d   : > { %v3714_v28 = vcombine.low %v305_v8, %v315_v24  ;;  %v323_v30 = vor.u32 %v322_v16, %v319_v11  ;;  %v338_v31 = vrot.slane %v336_v19, 5  ;;  %v1928_v32 = vrot.slane %v4247_v47, 5  ;;  %3901 = vmatpush3.bf16.msra.mxu0 %v4011_v23  ;;  %v3587_v8 = vld [vmem:[%s4149_s19 + $0x30] sm:$0xe]  ;;  %v4016_v24 = vld [vmem:[%s5792_s1 + $0x38] sm:$0xff]  }
  0x3e   : > { %2735 = vrot.lane.b32.xlu0 %v3824_v25, %s4103_s16  ;;  %v333_v35 = vor.u32 %v332_v26, %v328_v18  ;;  %v1931_v36 = vrot.slane %v4280_v2, 5  ;;  %v3523_v37 = vrot.slane %v631_v22, 9  ;;  %v718_v38 = vrot.slane %v200_v20, 5  ;;  %3951 = vmatpush3.bf16.msra.mxu1 %v4011_v23  ;;  %v3586_v23 = vld [vmem:[%s4149_s19 + $0x24] sm:$0xe] }
  0x3f   : > { %2147 = vrot.lane.b32.xlu1 %v3714_v28, %s4099_s27  ;;  %v324_v39 = vrot.slane %v323_v30, 4  ;;  %v1929_v41 = vsel %vm4173_vm2, %v3681_v27, %v1928_v32  ;;  %v1930_v42 = vrot.slane %v1928_v32, 4  ;;  %v721_v47 = vrot.slane %v4327_v61, 5  ;;  %3902 = vmatprep.subr.bf16.mxu0 %v4014_v44 }
  0x40   : > { %v334_v46 = vrot.slane %v333_v35, 4  ;;  %v719_v2 = vsel %vm4173_vm2, %v3523_v37, %v718_v38  ;;  %v720_v1 = vrot.slane %v718_v38, 4  ;;  %v3522_v3 = vrot.slane %v630_v34, 9  ;;  %3944 = vmatprep.subr.bf16.mxu1 %v4014_v44 }
  0x41   : > { %v329_v48 = vsel %vm4223_vm5, %v324_v39, %v328_v18  ;;  %v1932_v49 = vsel %vm4173_vm2, %v1930_v42, %v1931_v36  ;;  %v711_v7 = vrot.slane %v4299_v29, 5  ;;  %v714_v9 = vrot.slane %v4303_v33, 5  ;;  %3903 = vmatpush3.bf16.msra.mxu0 %v4014_v44  ;;  %v4407_v39 = vld [vmem:[%s4149_s19 + $0x3c] sm:$0xf] }
  0x42   : > { %v339_v13 = vsel %vm4223_vm5, %v334_v46, %v338_v31  ;;  %v3825_v40 = vcombine.low %v1929_v41, %v1932_v49  ;;  %v722_v51 = vsel %vm4173_vm2, %v720_v1, %v721_v47  ;;  %v932_v52 = vshrl.u32 %v4357_v43, 16  ;;  %3952 = vmatpush3.bf16.msra.mxu1 %v4014_v44  ;;  %3904 = vmatprep.subr.bf16.mxu0 %v4016_v24  ;;  %v4421_v49 = vld [vmem:[%s4149_s19 + $0x40] sm:$0xf] }
  0x43   : > { %v3715_v29 = vcombine.low %v329_v48, %v339_v13  ;;  %v3731_v20 = vcombine.low %v719_v2, %v722_v51  ;;  %v712_v33 = vsel %vm4173_vm2, %v3522_v3, %v711_v7  ;;  %v713_v54 = vrot.slane %v711_v7, 4  ;;  %3945 = vmatprep.subr.bf16.mxu1 %v4016_v24 }
  0x44   : > { %2737 = vrot.lane.b32.xlu0 %v3825_v40, %s4103_s16  ;;  %v934_v55 = vrot.slane %v932_v52, 4  ;;  %v935_v56 = vshll.u32 %v4357_v43, 16  ;;  %v945_v12 = vshrl.u32 %v4371_v50, 16  ;;  %v3747_v58 = vcombine.low %v4357_v43, %v4371_v50  ;;  %v3620_v52 = vld [vmem:[%s4149_s19 + $0x30] sm:$0xf] }
  0x45   : > { %2149 = vrot.lane.b32.xlu1 %v3715_v29, %s4099_s27  ;;  %v715_v60 = vsel %vm4173_vm2, %v713_v54, %v714_v9  ;;  %v908_v61 = vshrl.u32 %v3540_v53, 16  ;;  %v911_v62 = vshll.u32 %v3540_v53, 16  ;;  %v921_v63 = vshrl.u32 %v4380_v45, 16  ;;  %3905 = vmatpush3.bf16.msra.mxu0 %v4016_v24 }
  0x46   : > { %v3730_v0 = vcombine.low %v712_v33, %v715_v60  ;;  %v937_v4 = vrot.slane %v935_v56, 5  ;;  %v3746_v5 = vcombine.low %v3540_v53, %v4380_v45  ;;  %v941_v6 = vshll.u32 %v4371_v50, 16  ;;  %3953 = vmatpush3.bf16.msra.mxu1 %v4016_v24  ;;  %v4431_v53 = vld [vmem:[%s4149_s19 + $0x34] sm:$0xf] }
  0x47   : > { %v910_v10 = vrot.slane %v908_v61, 4  ;;  %v913_v11 = vrot.slane %v911_v62, 5  ;;  %v947_v14 = vrot.slane %v945_v12, 4  ;;  %v951_v15 = vshll.u32 %v3571_v59, 16 }
  0x48   : > { %2227 = vrot.lane.b32.xlu0 %v3730_v0, %s4098_s22  ;;  %v938_v16 = vor.u32 %v937_v4, %v934_v55  ;;  %v943_v18 = vrot.slane %v941_v6, 5  ;;  %v917_v19 = vshll.u32 %v4380_v45, 16  ;;  %v923_v22 = vrot.slane %v921_v63, 4  ;;  %v4446_v63 = vld [vmem:[%s4149_s19 + $0x38] sm:$0x1] }
  0x49   : > { %2229 = vrot.lane.b32.xlu1 %v3731_v20, %s4098_s22  ;;  %v953_v25 = vrot.slane %v951_v15, 5  ;;  %v914_v26 = vor.u32 %v913_v11, %v910_v10  ;;  %v927_v27 = vshll.u32 %v3570_v57, 16  ;;  %v3603_v28 = vrot.slane %v3587_v8, 9 }
  0x4a   : > { %v939_v30 = vrot.slane %v938_v16, 4  ;;  %v948_v31 = vor.u32 %v947_v14, %v943_v18  ;;  %v919_v32 = vrot.slane %v917_v19, 5  ;;  %v1330_v34 = vrot.slane %v4371_v50, 5 }
  0x4b   : > { %v915_v35 = vrot.slane %v914_v26, 4  ;;  %v929_v36 = vrot.slane %v927_v27, 5  ;;  %v1333_v37 = vrot.slane %v3571_v59, 5  ;;  %v3602_v38 = vrot.slane %v3586_v23, 9  ;;  %v4460_v26 = vld [vmem:[%s4149_s19 + $0x38] sm:$0x1] }
  0x4c   : > { %2323 = vrot.lane.b32.xlu0 %v3746_v5, %s4096_s20  ;;  %v944_v41 = vsel %vm4223_vm5, %v939_v30, %v943_v18  ;;  %v949_v42 = vrot.slane %v948_v31, 4  ;;  %v924_v47 = vor.u32 %v923_v22, %v919_v32  ;;  %v1331_v43 = vsel %vm4173_vm2, %v3603_v28, %v1330_v34  ;;  %v4457_v22 = vld [vmem:[%s4149_s19 + $0x34] sm:$0xf] }
  0x4d   : > { %2325 = vrot.lane.b32.xlu1 %v3747_v58, %s4096_s20  ;;  %v920_v44 = vsel %vm4223_vm5, %v915_v35, %v919_v32  ;;  %v1332_v46 = vrot.slane %v1330_v34, 4  ;;  %v1323_v2 = vrot.slane %v4380_v45, 5  ;;  %v1326_v1 = vrot.slane %v3570_v57, 5  ;;  %v4442_v58 = vld [vmem:[%s4149_s19 + $0x44] sm:$0x1] }
  0x4e   : > { %v954_v3 = vsel %vm4223_vm5, %v949_v42, %v953_v25  ;;  %v925_v48 = vrot.slane %v924_v47, 4  ;;  %v1544_v7 = vshrl.u32 %v4407_v39, 16  ;;  %v1547_v9 = vshll.u32 %v4407_v39, 16  ;;  %v201_v57 = vld [vmem:[%s4149_s19 + $0x30] sm:$0xf] }
  0x4f   : > { %v3763_v50 = vcombine.low %v944_v41, %v954_v3  ;;  %v1334_v13 = vsel %vm4173_vm2, %v1332_v46, %v1333_v37  ;;  %v1324_v40 = vsel %vm4173_vm2, %v3602_v38, %v1323_v2  ;;  %v1325_v51 = vrot.slane %v1323_v2, 4  ;;  %v3666_v34 = vld [vmem:[%s4149_s19 + $0x30] sm:$0xe] }
  0x50   : > { %v930_v45 = vsel %vm4223_vm5, %v925_v48, %v929_v36  ;;  %v3779_v29 = vcombine.low %v1331_v43, %v1334_v13  ;;  %v1546_v20 = vrot.slane %v1544_v7, 4  ;;  %v1549_v33 = vrot.slane %v1547_v9, 5 }
  0x51   : > { %2405 = vrot.lane.b32.xlu1 %v3763_v50, %s4100_s30  ;;  %v3762_v54 = vcombine.low %v920_v44, %v930_v45  ;;  %v1327_v55 = vsel %vm4173_vm2, %v1325_v51, %v1326_v1  ;;  %v1557_v56 = vshrl.u32 %v4421_v49, 16  ;;  %v3795_v12 = vcombine.low %v4407_v39, %v4421_v49  ;;  %v203_v1 = vld [vmem:[%s4149_s19 + $0x3c] sm:$0xf]  ;;  %v204_v50 = vld [vmem:[%s4149_s19 + $0x40] sm:$0xf] }
  0x52   : > { %v3778_v59 = vcombine.low %v1324_v40, %v1327_v55  ;;  %v1520_v60 = vshrl.u32 %v3620_v52, 16  ;;  %v1523_v61 = vshll.u32 %v3620_v52, 16  ;;  %v1533_v62 = vshrl.u32 %v4431_v53, 16  ;;  %v230_v45 = vld [vmem:[%s4149_s19 + $0x44] sm:$0x1] }
  0x53   : > { %2403 = vrot.lane.b32.xlu0 %v3762_v54, %s4100_s30  ;;  %v3794_v0 = vcombine.low %v3620_v52, %v4431_v53  ;;  %v1550_v4 = vor.u32 %v1549_v33, %v1546_v20  ;;  %v1553_v5 = vshll.u32 %v4421_v49, 16  ;;  %v1559_v6 = vrot.slane %v1557_v56, 4  ;;  %v3667_v55 = vld [vmem:[%s4149_s19 + $0x3c] sm:$0xe] }
  0x54   : > { %v1522_v8 = vrot.slane %v1520_v60, 4  ;;  %v1525_v10 = vrot.slane %v1523_v61, 5  ;;  %v1563_v11 = vshll.u32 %v4442_v58, 16  ;;  %v1529_v14 = vshll.u32 %v4431_v53, 16 }
  0x55   : > { %2485 = vrot.lane.b32.xlu1 %v3779_v29, %s4097_s21  ;;  %v1551_v15 = vrot.slane %v1550_v4, 4  ;;  %v1555_v16 = vrot.slane %v1553_v5, 5  ;;  %v1535_v18 = vrot.slane %v1533_v62, 4  ;;  %v1539_v19 = vshll.u32 %v4446_v63, 16 }
  0x56   : > { %v1565_v23 = vrot.slane %v1563_v11, 5  ;;  %v1526_v24 = vor.u32 %v1525_v10, %v1522_v8  ;;  %v1531_v25 = vrot.slane %v1529_v14, 5  ;;  %v341_v27 = vshrl.u32 %v201_v57, 16 }
  0x57   : > { %2483 = vrot.lane.b32.xlu0 %v3778_v59, %s4097_s21  ;;  %v1556_v28 = vsel %vm4223_vm5, %v1551_v15, %v1555_v16  ;;  %v1560_v30 = vor.u32 %v1559_v6, %v1555_v16  ;;  %v1541_v31 = vrot.slane %v1539_v19, 5  ;;  %v344_v32 = vshll.u32 %v201_v57, 16  ;;  %v633_v57 = vld [vmem:[%s4149_s19 + $0x3c] sm:$0xe] }
  0x58   : > { %v1527_v35 = vrot.slane %v1526_v24, 4  ;;  %v1536_v36 = vor.u32 %v1535_v18, %v1531_v25  ;;  %v343_v37 = vrot.slane %v341_v27, 4  ;;  %v350_v38 = vshll.u32 %v4457_v22, 16 }
  0x59   : > { %2581 = vrot.lane.b32.xlu1 %v3795_v12, %s4101_s6  ;;  %v1561_v39 = vrot.slane %v1560_v30, 4  ;;  %v346_v41 = vrot.slane %v344_v32, 5  ;;  %v354_v42 = vshrl.u32 %v4457_v22, 16  ;;  %v360_v47 = vshll.u32 %v4460_v26, 16 }
  0x5a   : > { %v1532_v43 = vsel %vm4223_vm5, %v1527_v35, %v1531_v25  ;;  %v1537_v44 = vrot.slane %v1536_v36, 4  ;;  %v352_v46 = vrot.slane %v350_v38, 5  ;;  %v3682_v2 = vrot.slane %v3666_v34, 9 }
  0x5b   : > { %2579 = vrot.lane.b32.xlu0 %v3794_v0, %s4101_s6  ;;  %v1566_v3 = vsel %vm4223_vm5, %v1561_v39, %v1565_v23  ;;  %v347_v48 = vor.u32 %v346_v41, %v343_v37  ;;  %v356_v7 = vrot.slane %v354_v42, 4  ;;  %v362_v9 = vrot.slane %v360_v47, 5  ;;  %v632_v23 = vld [vmem:[%s4149_s19 + $0x30] sm:$0xe]  ;;  %v3547_v47 = vld [vmem:[%s4149_s19 + $0x4c] sm:$0xf] }
  0x5c   : > { %v3811_v13 = vcombine.low %v1556_v28, %v1566_v3  ;;  %v1542_v40 = vsel %vm4223_vm5, %v1537_v44, %v1541_v31  ;;  %v1935_v51 = vrot.slane %v4431_v53, 5  ;;  %v1938_v52 = vrot.slane %v4446_v63, 5  ;;  %v4520_v3 = vld [vmem:[%s4149_s19 + $0x40] sm:$0xf] }
  0x5d   : > { %v3810_v29 = vcombine.low %v1532_v43, %v1542_v40  ;;  %v348_v20 = vrot.slane %v347_v48, 4  ;;  %v357_v33 = vor.u32 %v356_v7, %v352_v46  ;;  %v365_v54 = vshrl.u32 %v203_v1, 16 }
  0x5e   : > { %2661 = vrot.lane.b32.xlu1 %v3811_v13, %s4102_s7  ;;  %v1936_v56 = vsel %vm4173_vm2, %v3682_v2, %v1935_v51  ;;  %v1937_v12 = vrot.slane %v1935_v51, 4  ;;  %v368_v59 = vshll.u32 %v203_v1, 16  ;;  %v374_v60 = vshll.u32 %v204_v50, 16  ;;  %v3544_v1 = vld [vmem:[%s4149_s19 + $0x3c] sm:$0xf] }
  0x5f   : > { %2659 = vrot.lane.b32.xlu0 %v3810_v29, %s4102_s7  ;;  %v353_v53 = vsel %vm4223_vm5, %v348_v20, %v352_v46  ;;  %v358_v61 = vrot.slane %v357_v33, 4  ;;  %v367_v62 = vrot.slane %v365_v54, 4  ;;  %v378_v63 = vshrl.u32 %v204_v50, 16  ;;  %v3573_v51 = vld [vmem:[%s4149_s19 + $0x50] sm:$0x1] }
  0x60   : > { %v1939_v0 = vsel %vm4173_vm2, %v1937_v12, %v1938_v52  ;;  %v370_v4 = vrot.slane %v368_v59, 5  ;;  %v376_v5 = vrot.slane %v374_v60, 5  ;;  %v384_v6 = vshll.u32 %v230_v45, 16  ;;  %v3572_v12 = vld [vmem:[%s4149_s19 + $0x44] sm:$0x1] }
  0x61   : > { %v363_v8 = vsel %vm4223_vm5, %v358_v61, %v362_v9  ;;  %v3826_v10 = vcombine.low %v1936_v56, %v1939_v0  ;;  %v380_v11 = vrot.slane %v378_v63, 4  ;;  %v3683_v14 = vrot.slane %v3667_v55, 9  ;;  %v3589_v59 = vld [vmem:[%s4149_s19 + $0x48] sm:$0xe] }
  0x62   : > { %v3716_v15 = vcombine.low %v353_v53, %v363_v8  ;;  %v371_v16 = vor.u32 %v370_v4, %v367_v62  ;;  %v386_v18 = vrot.slane %v384_v6, 5  ;;  %v1942_v19 = vrot.slane %v4421_v49, 5  ;;  %v4502_v49 = vld [vmem:[%s4149_s19 + $0x48] sm:$0xf]  ;;  %v3588_v6 = vld [vmem:[%s4149_s19 + $0x3c] sm:$0xe] }
  0x63   : > { %2739 = vrot.lane.b32.xlu0 %v3826_v10, %s4103_s16  ;;  %v381_v24 = vor.u32 %v380_v11, %v376_v5  ;;  %v1945_v25 = vrot.slane %v4442_v58, 5  ;;  %v3525_v27 = vrot.slane %v633_v57, 9  ;;  %v732_v28 = vrot.slane %v204_v50, 5 }
  0x64   : > { %2151 = vrot.lane.b32.xlu1 %v3716_v15, %s4099_s27  ;;  %v372_v30 = vrot.slane %v371_v16, 4  ;;  %v1943_v31 = vsel %vm4173_vm2, %v3683_v14, %v1942_v19  ;;  %v1944_v32 = vrot.slane %v1942_v19, 4  ;;  %v735_v34 = vrot.slane %v230_v45, 5 }
  0x65   : > { %v382_v35 = vrot.slane %v381_v24, 4  ;;  %v733_v36 = vsel %vm4173_vm2, %v3525_v27, %v732_v28  ;;  %v734_v58 = vrot.slane %v732_v28, 4  ;;  %v3524_v37 = vrot.slane %v632_v23, 9  ;;  %v4540_v27 = vld [vmem:[%s4149_s19 + $0x54] sm:$0xf] }
  0x66   : > { %v377_v38 = vsel %vm4223_vm5, %v372_v30, %v376_v5  ;;  %v1946_v39 = vsel %vm4173_vm2, %v1944_v32, %v1945_v25  ;;  %v725_v41 = vrot.slane %v4457_v22, 5  ;;  %v728_v42 = vrot.slane %v4460_v26, 5 }
  0x67   : > { %v387_v43 = vsel %vm4223_vm5, %v382_v35, %v386_v18  ;;  %v3827_v44 = vcombine.low %v1943_v31, %v1946_v39  ;;  %v736_v46 = vsel %vm4173_vm2, %v734_v58, %v735_v34  ;;  %v980_v2 = vshrl.u32 %v4502_v49, 16 }
  0x68   : > { %v3717_v48 = vcombine.low %v377_v38, %v387_v43  ;;  %v3733_v7 = vcombine.low %v733_v36, %v736_v46  ;;  %v726_v22 = vsel %vm4173_vm2, %v3524_v37, %v725_v41  ;;  %v727_v26 = vrot.slane %v725_v41, 4  ;;  %v4554_v38 = vld [vmem:[%s4149_s19 + $0x58] sm:$0xf]  ;;  %v3624_v46 = vld [vmem:[%s4149_s19 + $0x48] sm:$0xf] }
  0x69   : > { %2741 = vrot.lane.b32.xlu0 %v3827_v44, %s4103_s16  ;;  %v982_v9 = vrot.slane %v980_v2, 4  ;;  %v983_v50 = vshll.u32 %v4502_v49, 16  ;;  %v993_v13 = vshrl.u32 %v3547_v47, 16  ;;  %v3749_v40 = vcombine.low %v4502_v49, %v3547_v47  ;;  %v4564_v2 = vld [vmem:[%s4149_s19 + $0x4c] sm:$0xf] }
  0x6a   : > { %2153 = vrot.lane.b32.xlu1 %v3717_v48, %s4099_s27  ;;  %v729_v52 = vsel %vm4173_vm2, %v727_v26, %v728_v42  ;;  %v956_v45 = vshrl.u32 %v3544_v1, 16  ;;  %v959_v29 = vshll.u32 %v3544_v1, 16  ;;  %v969_v20 = vshrl.u32 %v4520_v3, 16 }
  0x6b   : > { %v3732_v33 = vcombine.low %v726_v22, %v729_v52  ;;  %v985_v54 = vrot.slane %v983_v50, 5  ;;  %v3748_v55 = vcombine.low %v3544_v1, %v4520_v3  ;;  %v989_v56 = vshll.u32 %v3547_v47, 16 }
  0x6c   : > { %v958_v60 = vrot.slane %v956_v45, 4  ;;  %v961_v53 = vrot.slane %v959_v29, 5  ;;  %v995_v61 = vrot.slane %v993_v13, 4  ;;  %v999_v62 = vshll.u32 %v3573_v51, 16  ;;  %v4575_v13 = vld [vmem:[%s4149_s19 + $0x5c] sm:$0x1] }
  0x6d   : > { %2231 = vrot.lane.b32.xlu0 %v3732_v33, %s4098_s22  ;;  %v986_v63 = vor.u32 %v985_v54, %v982_v9  ;;  %v991_v0 = vrot.slane %v989_v56, 5  ;;  %v965_v4 = vshll.u32 %v4520_v3, 16  ;;  %v971_v5 = vrot.slane %v969_v20, 4  ;;  %v4579_v29 = vld [vmem:[%s4149_s19 + $0x50] sm:$0x1] }
  0x6e   : > { %2233 = vrot.lane.b32.xlu1 %v3733_v7, %s4098_s22  ;;  %v1001_v57 = vrot.slane %v999_v62, 5  ;;  %v962_v8 = vor.u32 %v961_v53, %v958_v60  ;;  %v975_v10 = vshll.u32 %v3572_v12, 16  ;;  %v3605_v11 = vrot.slane %v3589_v59, 9  ;;  %v205_v56 = vld [vmem:[%s4149_s19 + $0x48] sm:$0xf] }
  0x6f   : > { %v987_v14 = vrot.slane %v986_v63, 4  ;;  %v996_v15 = vor.u32 %v995_v61, %v991_v0  ;;  %v967_v16 = vrot.slane %v965_v4, 5  ;;  %v1344_v18 = vrot.slane %v3547_v47, 5  ;;  %v4590_v4 = vld [vmem:[%s4149_s19 + $0x4c] sm:$0xf] }
  0x70   : > { %v963_v19 = vrot.slane %v962_v8, 4  ;;  %v977_v23 = vrot.slane %v975_v10, 5  ;;  %v1347_v24 = vrot.slane %v3573_v51, 5  ;;  %v3604_v25 = vrot.slane %v3588_v6, 9  ;;  %v4593_v8 = vld [vmem:[%s4149_s19 + $0x50] sm:$0x1] }
  0x71   : > { %2327 = vrot.lane.b32.xlu0 %v3748_v55, %s4096_s20  ;;  %v992_v28 = vsel %vm4223_vm5, %v987_v14, %v991_v0  ;;  %v997_v30 = vrot.slane %v996_v15, 4  ;;  %v972_v31 = vor.u32 %v971_v5, %v967_v16  ;;  %v1345_v32 = vsel %vm4173_vm2, %v3605_v11, %v1344_v18 }
  0x72   : > { %2329 = vrot.lane.b32.xlu1 %v3749_v40, %s4096_s20  ;;  %v968_v34 = vsel %vm4223_vm5, %v963_v19, %v967_v16  ;;  %v1346_v49 = vrot.slane %v1344_v18, 4  ;;  %v1337_v35 = vrot.slane %v4520_v3, 5  ;;  %v1340_v36 = vrot.slane %v3572_v12, 5  ;;  %v3668_v18 = vld [vmem:[%s4149_s19 + $0x48] sm:$0xe] }
  0x73   : > { %v1002_v58 = vsel %vm4223_vm5, %v997_v30, %v1001_v57  ;;  %v973_v37 = vrot.slane %v972_v31, 4  ;;  %v1592_v39 = vshrl.u32 %v4540_v27, 16  ;;  %v1595_v41 = vshll.u32 %v4540_v27, 16 }
  0x74   : > { %v3765_v42 = vcombine.low %v992_v28, %v1002_v58  ;;  %v1348_v47 = vsel %vm4173_vm2, %v1346_v49, %v1347_v24  ;;  %v1338_v43 = vsel %vm4173_vm2, %v3604_v25, %v1337_v35  ;;  %v1339_v44 = vrot.slane %v1337_v35, 4 }
  0x75   : > { %v978_v1 = vsel %vm4223_vm5, %v973_v37, %v977_v23  ;;  %v3781_v3 = vcombine.low %v1345_v32, %v1348_v47  ;;  %v1594_v48 = vrot.slane %v1592_v39, 4  ;;  %v1597_v7 = vrot.slane %v1595_v41, 5 }
  0x76   : > { %2409 = vrot.lane.b32.xlu1 %v3765_v42, %s4100_s30  ;;  %v3764_v22 = vcombine.low %v968_v34, %v978_v1  ;;  %v1341_v26 = vsel %vm4173_vm2, %v1339_v44, %v1340_v36  ;;  %v1605_v9 = vshrl.u32 %v4554_v38, 16  ;;  %v3797_v50 = vcombine.low %v4540_v27, %v4554_v38  ;;  %v207_v36 = vld [vmem:[%s4149_s19 + $0x54] sm:$0xf]  ;;  %v208_v42 = vld [vmem:[%s4149_s19 + $0x58] sm:$0xf] }
  0x77   : > { %v3780_v40 = vcombine.low %v1338_v43, %v1341_v26  ;;  %v1568_v51 = vshrl.u32 %v3624_v46, 16  ;;  %v1571_v52 = vshll.u32 %v3624_v46, 16  ;;  %v1581_v45 = vshrl.u32 %v4564_v2, 16 }
  0x78   : > { %2407 = vrot.lane.b32.xlu0 %v3764_v22, %s4100_s30  ;;  %v3796_v20 = vcombine.low %v3624_v46, %v4564_v2  ;;  %v1598_v33 = vor.u32 %v1597_v7, %v1594_v48  ;;  %v1601_v54 = vshll.u32 %v4554_v38, 16  ;;  %v1607_v55 = vrot.slane %v1605_v9, 4  ;;  %v232_v7 = vld [vmem:[%s4149_s19 + $0x5c] sm:$0x1] }
  0x79   : > { %v1570_v12 = vrot.slane %v1568_v51, 4  ;;  %v1573_v59 = vrot.slane %v1571_v52, 5  ;;  %v1611_v60 = vshll.u32 %v4575_v13, 16  ;;  %v1577_v53 = vshll.u32 %v4564_v2, 16  ;;  %v3669_v51 = vld [vmem:[%s4149_s19 + $0x54] sm:$0xe] }
  0x7a   : > { %2489 = vrot.lane.b32.xlu1 %v3781_v3, %s4097_s21  ;;  %v1599_v61 = vrot.slane %v1598_v33, 4  ;;  %v1603_v62 = vrot.slane %v1601_v54, 5  ;;  %v1583_v63 = vrot.slane %v1581_v45, 4  ;;  %v1587_v0 = vshll.u32 %v4579_v29, 16 }
  0x7b   : > { %v1613_v5 = vrot.slane %v1611_v60, 5  ;;  %v1574_v6 = vor.u32 %v1573_v59, %v1570_v12  ;;  %v1579_v57 = vrot.slane %v1577_v53, 5  ;;  %v389_v10 = vshrl.u32 %v205_v56, 16 }
  0x7c   : > { %2487 = vrot.lane.b32.xlu0 %v3780_v40, %s4097_s21  ;;  %v1604_v11 = vsel %vm4223_vm5, %v1599_v61, %v1603_v62  ;;  %v1608_v14 = vor.u32 %v1607_v55, %v1603_v62  ;;  %v1589_v15 = vrot.slane %v1587_v0, 5  ;;  %v392_v16 = vshll.u32 %v205_v56, 16  ;;  %v635_v56 = vld [vmem:[%s4149_s19 + $0x54] sm:$0xe] }
  0x7d   : > { %v1575_v19 = vrot.slane %v1574_v6, 4  ;;  %v1584_v23 = vor.u32 %v1583_v63, %v1579_v57  ;;  %v391_v24 = vrot.slane %v389_v10, 4  ;;  %v398_v25 = vshll.u32 %v4590_v4, 16 }
  0x7e   : > { %2585 = vrot.lane.b32.xlu1 %v3797_v50, %s4101_s6  ;;  %v1609_v27 = vrot.slane %v1608_v14, 4  ;;  %v394_v28 = vrot.slane %v392_v16, 5  ;;  %v402_v30 = vshrl.u32 %v4590_v4, 16  ;;  %v408_v31 = vshll.u32 %v4593_v8, 16 }
  0x7f   : > { %v1580_v32 = vsel %vm4223_vm5, %v1575_v19, %v1579_v57  ;;  %v1585_v34 = vrot.slane %v1584_v23, 4  ;;  %v400_v49 = vrot.slane %v398_v25, 5  ;;  %v3684_v35 = vrot.slane %v3668_v18, 9  ;;  %v4635_v19 = vld [vmem:[%s4149_s19 + $0x60] sm:$0xf] }
  0x80   : > { %2583 = vrot.lane.b32.xlu0 %v3796_v20, %s4101_s6  ;;  %v1614_v58 = vsel %vm4223_vm5, %v1609_v27, %v1613_v5  ;;  %v395_v37 = vor.u32 %v394_v28, %v391_v24  ;;  %v404_v39 = vrot.slane %v402_v30, 4  ;;  %v410_v41 = vrot.slane %v408_v31, 5  ;;  %v634_v5 = vld [vmem:[%s4149_s19 + $0x48] sm:$0xe] }
  0x81   : > { %v3813_v47 = vcombine.low %v1604_v11, %v1614_v58  ;;  %v1590_v43 = vsel %vm4223_vm5, %v1585_v34, %v1589_v15  ;;  %v1949_v44 = vrot.slane %v4564_v2, 5  ;;  %v1952_v46 = vrot.slane %v4579_v29, 5  ;;  %v3548_v58 = vld [vmem:[%s4149_s19 + $0x54] sm:$0xf] }
  0x82   : > { %v3812_v1 = vcombine.low %v1580_v32, %v1590_v43  ;;  %v396_v3 = vrot.slane %v395_v37, 4  ;;  %v405_v48 = vor.u32 %v404_v39, %v400_v49  ;;  %v413_v22 = vshrl.u32 %v207_v36, 16  ;;  %v4648_v32 = vld [vmem:[%s4149_s19 + $0x64] sm:$0xf]  ;;  %v4657_v37 = vld [vmem:[%s4149_s19 + $0x58] sm:$0xf] }
  0x83   : > { %2665 = vrot.lane.b32.xlu1 %v3813_v47, %s4102_s7  ;;  %v1950_v26 = vsel %vm4173_vm2, %v3684_v35, %v1949_v44  ;;  %v1951_v9 = vrot.slane %v1949_v44, 4  ;;  %v416_v50 = vshll.u32 %v207_v36, 16  ;;  %v422_v40 = vshll.u32 %v208_v42, 16 }
  0x84   : > { %2663 = vrot.lane.b32.xlu0 %v3812_v1, %s4102_s7  ;;  %v401_v2 = vsel %vm4223_vm5, %v396_v3, %v400_v49  ;;  %v406_v52 = vrot.slane %v405_v48, 4  ;;  %v415_v45 = vrot.slane %v413_v22, 4  ;;  %v426_v29 = vshrl.u32 %v208_v42, 16 }
  0x85   : > { %v1953_v20 = vsel %vm4173_vm2, %v1951_v9, %v1952_v46  ;;  %v418_v33 = vrot.slane %v416_v50, 5  ;;  %v424_v54 = vrot.slane %v422_v40, 5  ;;  %v432_v55 = vshll.u32 %v232_v7, 16  ;;  %v3575_v46 = vld [vmem:[%s4149_s19 + $0x68] sm:$0x1] }
  0x86   : > { %v411_v12 = vsel %vm4223_vm5, %v406_v52, %v410_v41  ;;  %v3828_v59 = vcombine.low %v1950_v26, %v1953_v20  ;;  %v428_v60 = vrot.slane %v426_v29, 4  ;;  %v3685_v53 = vrot.slane %v3669_v51, 9  ;;  %v3574_v51 = vld [vmem:[%s4149_s19 + $0x5c] sm:$0x1] }
  0x87   : > { %v3718_v61 = vcombine.low %v401_v2, %v411_v12  ;;  %v419_v62 = vor.u32 %v418_v33, %v415_v45  ;;  %v434_v63 = vrot.slane %v432_v55, 5  ;;  %v1956_v0 = vrot.slane %v4554_v38, 5  ;;  %v4639_v25 = vpop.permute.xlu1 %2321  ;;  %v3591_v2 = vld [vmem:[%s4149_s19 + $0x60] sm:$0xe] }
  0x88   : > { %2743 = vrot.lane.b32.xlu0 %v3828_v59, %s4103_s16  ;;  %v429_v6 = vor.u32 %v428_v60, %v424_v54  ;;  %v1959_v57 = vrot.slane %v4575_v13, 5  ;;  %v3527_v10 = vrot.slane %v635_v56, 9  ;;  %v746_v11 = vrot.slane %v208_v42, 5  ;;  %v4671_v22 = vpop.permute.xlu0 %2319  ;;  %v3590_v59 = vld [vmem:[%s4149_s19 + $0x54] sm:$0xe] }
  0x89   : > { %2155 = vrot.lane.b32.xlu1 %v3718_v61, %s4099_s27  ;;  %v420_v14 = vrot.slane %v419_v62, 4  ;;  %v1957_v15 = vsel %vm4173_vm2, %v3685_v53, %v1956_v0  ;;  %v1958_v16 = vrot.slane %v1956_v0, 4  ;;  %v749_v18 = vrot.slane %v232_v7, 5 }
  0x8a   : > { %v430_v38 = vrot.slane %v429_v6, 4  ;;  %v747_v23 = vsel %vm4173_vm2, %v3527_v10, %v746_v11  ;;  %v748_v13 = vrot.slane %v746_v11, 4  ;;  %v3526_v24 = vrot.slane %v634_v5, 9 }
  0x8b   : > { %v425_v27 = vsel %vm4223_vm5, %v420_v14, %v424_v54  ;;  %v1960_v28 = vsel %vm4173_vm2, %v1958_v16, %v1959_v57  ;;  %v739_v30 = vrot.slane %v4590_v4, 5  ;;  %v742_v31 = vrot.slane %v4593_v8, 5  ;;  %v4687_v16 = vld [vmem:[%s4149_s19 + $0x6c] sm:$0xf] }
  0x8c   : > { %v435_v34 = vsel %vm4223_vm5, %v430_v38, %v434_v63  ;;  %v3829_v49 = vcombine.low %v1957_v15, %v1960_v28  ;;  %v750_v35 = vsel %vm4173_vm2, %v748_v13, %v749_v18  ;;  %v1028_v36 = vshrl.u32 %v4635_v19, 16 }
  0x8d   : > { %v3719_v39 = vcombine.low %v425_v27, %v435_v34  ;;  %v3735_v41 = vcombine.low %v747_v23, %v750_v35  ;;  %v740_v4 = vsel %vm4173_vm2, %v3526_v24, %v739_v30  ;;  %v741_v8 = vrot.slane %v739_v30, 4  ;;  %v4703_v34 = vld [vmem:[%s4149_s19 + $0x70] sm:$0xf] }
  0x8e   : > { %2745 = vrot.lane.b32.xlu0 %v3829_v49, %s4103_s16  ;;  %v1030_v42 = vrot.slane %v1028_v36, 4  ;;  %v1031_v47 = vshll.u32 %v4635_v19, 16  ;;  %v1041_v43 = vshrl.u32 %v4648_v32, 16  ;;  %v3751_v44 = vcombine.low %v4635_v19, %v4648_v32 }
  0x8f   : > { %2157 = vrot.lane.b32.xlu1 %v3719_v39, %s4099_s27  ;;  %v743_v1 = vsel %vm4173_vm2, %v741_v8, %v742_v31  ;;  %v1004_v3 = vshrl.u32 %v3548_v58, 16  ;;  %v1007_v48 = vshll.u32 %v3548_v58, 16  ;;  %v1017_v7 = vshrl.u32 %v4657_v37, 16  ;;  %v4689_v18 = vpop.permute.xlu0 %2479 }
  0x90   : > { %v3734_v26 = vcombine.low %v740_v4, %v743_v1  ;;  %v1033_v9 = vrot.slane %v1031_v47, 5  ;;  %v3750_v50 = vcombine.low %v3548_v58, %v4657_v37  ;;  %v1037_v40 = vshll.u32 %v4648_v32, 16  ;;  %v4677_v52 = vpop.permute.xlu1 %2223  ;;  %v4715_v4 = vld [vmem:[%s4149_s19 + $0x64] sm:$0xf] }
  0x91   : > { %v1006_v45 = vrot.slane %v1004_v3, 4  ;;  %v1009_v29 = vrot.slane %v1007_v48, 5  ;;  %v1043_v20 = vrot.slane %v1041_v43, 4  ;;  %v1047_v33 = vshll.u32 %v3575_v46, 16 }
  0x92   : > { %2235 = vrot.lane.b32.xlu0 %v3734_v26, %s4098_s22  ;;  %v1034_v54 = vor.u32 %v1033_v9, %v1030_v42  ;;  %v1039_v55 = vrot.slane %v1037_v40, 5  ;;  %v1013_v56 = vshll.u32 %v4657_v37, 16  ;;  %v1019_v12 = vrot.slane %v1017_v7, 4  ;;  %v4728_v7 = vld [vmem:[%s4149_s19 + $0x74] sm:$0x1] }
  0x93   : > { %2237 = vrot.lane.b32.xlu1 %v3735_v41, %s4098_s22  ;;  %v1049_v60 = vrot.slane %v1047_v33, 5  ;;  %v1010_v53 = vor.u32 %v1009_v29, %v1006_v45  ;;  %v1023_v61 = vshll.u32 %v3574_v51, 16  ;;  %v3607_v62 = vrot.slane %v3591_v2, 9  ;;  %v4712_v41 = vld [vmem:[%s4149_s19 + $0x60] sm:$0xf] }
  0x94   : > { %v1035_v63 = vrot.slane %v1034_v54, 4  ;;  %v1044_v0 = vor.u32 %v1043_v20, %v1039_v55  ;;  %v1015_v5 = vrot.slane %v1013_v56, 5  ;;  %v1358_v6 = vrot.slane %v4648_v32, 5  ;;  %v4684_v57 = vpop.permute.xlu1 %2225  ;;  %v4734_v2 = vld [vmem:[%s4149_s19 + $0x68] sm:$0x1] }
  0x95   : > { %v1011_v10 = vrot.slane %v1010_v53, 4  ;;  %v1025_v11 = vrot.slane %v1023_v61, 5  ;;  %v1361_v14 = vrot.slane %v3575_v46, 5  ;;  %v3606_v15 = vrot.slane %v3590_v59, 9 }
  0x96   : > { %2331 = vrot.lane.b32.xlu0 %v3750_v50, %s4096_s20  ;;  %v1040_v19 = vsel %vm4223_vm5, %v1035_v63, %v1039_v55  ;;  %v1045_v38 = vrot.slane %v1044_v0, 4  ;;  %v1020_v23 = vor.u32 %v1019_v12, %v1015_v5  ;;  %v1359_v13 = vsel %vm4173_vm2, %v3607_v62, %v1358_v6 }
  0x97   : > { %2333 = vrot.lane.b32.xlu1 %v3751_v44, %s4096_s20  ;;  %v1016_v24 = vsel %vm4223_vm5, %v1011_v10, %v1015_v5  ;;  %v1360_v27 = vrot.slane %v1358_v6, 4  ;;  %v1351_v28 = vrot.slane %v4657_v37, 5  ;;  %v1354_v30 = vrot.slane %v3574_v51, 5  ;;  %v4044_v6 = vld [vmem:[%s4149_s19 + $0x4] sm:$0xf] }
  0x98   : > { %v1050_v31 = vsel %vm4223_vm5, %v1045_v38, %v1049_v60  ;;  %v1021_v32 = vrot.slane %v1020_v23, 4  ;;  %v1640_v49 = vshrl.u32 %v4687_v16, 16  ;;  %v1643_v35 = vshll.u32 %v4687_v16, 16  ;;  %v4719_v44 = vpop.permute.xlu1 %2481  ;;  %v4045_v10 = vld [vmem:[%s4149_s19] sm:$0xf] }
  0x99   : > { %v3767_v36 = vcombine.low %v1040_v19, %v1050_v31  ;;  %v1362_v58 = vsel %vm4173_vm2, %v1360_v27, %v1361_v14  ;;  %v1352_v39 = vsel %vm4173_vm2, %v3606_v15, %v1351_v28  ;;  %v1353_v37 = vrot.slane %v1351_v28, 4  ;;  %v209_v14 = vld [vmem:[%s4149_s19 + $0x60] sm:$0xf]  ;;  %v4755_v23 = vld [vmem:[%s4149_s19 + $0x64] sm:$0xf] }
  0x9a   : > { %v1026_v8 = vsel %vm4223_vm5, %v1021_v32, %v1025_v11  ;;  %v3783_v42 = vcombine.low %v1359_v13, %v1362_v58  ;;  %v1642_v47 = vrot.slane %v1640_v49, 4  ;;  %v1645_v43 = vrot.slane %v1643_v35, 5  ;;  %v4759_v28 = vld [vmem:[%s4149_s19 + $0x68] sm:$0x1] }
  0x9b   : > { %2413 = vrot.lane.b32.xlu1 %v3767_v36, %s4100_s30  ;;  %v3766_v46 = vcombine.low %v1016_v24, %v1026_v8  ;;  %v1355_v1 = vsel %vm4173_vm2, %v1353_v37, %v1354_v30  ;;  %v1653_v3 = vshrl.u32 %v4703_v34, 16  ;;  %v3799_v48 = vcombine.low %v4687_v16, %v4703_v34  ;;  %v2144_v26 = vpop.permute.xlu0 %2143 }
  0x9c   : > { %v3782_v9 = vcombine.low %v1352_v39, %v1355_v1  ;;  %v1616_v50 = vshrl.u32 %v4712_v41, 16  ;;  %v1619_v40 = vshll.u32 %v4712_v41, 16  ;;  %v1629_v51 = vshrl.u32 %v4715_v4, 16 }
  0x9d   : > { %2411 = vrot.lane.b32.xlu0 %v3766_v46, %s4100_s30  ;;  %v3798_v45 = vcombine.low %v4712_v41, %v4715_v4  ;;  %v1646_v29 = vor.u32 %v1645_v43, %v1642_v47  ;;  %v1649_v20 = vshll.u32 %v4703_v34, 16  ;;  %v1655_v33 = vrot.slane %v1653_v3, 4  ;;  %v3670_v41 = vld [vmem:[%s4149_s19 + $0x60] sm:$0xe] }
  0x9e   : > { %v1618_v54 = vrot.slane %v1616_v50, 4  ;;  %v1621_v55 = vrot.slane %v1619_v40, 5  ;;  %v1659_v56 = vshll.u32 %v4728_v7, 16  ;;  %v1625_v12 = vshll.u32 %v4715_v4, 16 }
  0x9f   : > { %2493 = vrot.lane.b32.xlu1 %v3783_v42, %s4097_s21  ;;  %v1647_v59 = vrot.slane %v1646_v29, 4  ;;  %v1651_v60 = vrot.slane %v1649_v20, 5  ;;  %v1631_v53 = vrot.slane %v1629_v51, 4  ;;  %v1635_v61 = vshll.u32 %v4734_v2, 16  ;;  %v4744_v62 = vpop.permute.xlu0 %2145 }
  0xa0   : > { %v1661_v63 = vrot.slane %v1659_v56, 5  ;;  %v1622_v0 = vor.u32 %v1621_v55, %v1618_v54  ;;  %v1627_v5 = vrot.slane %v1625_v12, 5  ;;  %v3696_v11 = vcombine.low %v4045_v10, %v4044_v6  ;;  %v4749_v15 = vpop.permute.xlu1 %2401  ;;  %v4046_v55 = vld [vmem:[%s4149_s19 + $0x10] sm:$0xf]  ;;  %v4047_v56 = vld [vmem:[%s4149_s19 + $0xc] sm:$0xf] }
  0xa1   : > { %2491 = vrot.lane.b32.xlu0 %v3782_v9, %s4097_s21  ;;  %v1652_v16 = vsel %vm4223_vm5, %v1647_v59, %v1651_v60  ;;  %v1656_v19 = vor.u32 %v1655_v33, %v1651_v60  ;;  %v1637_v38 = vrot.slane %v1635_v61, 5  ;;  %v437_v32 = vshrl.u32 %v209_v14, 16  ;;  %v4783_v9 = vld [vmem:[%s4149_s19 + $0x70] sm:$0xf] }
  0xa2   : > { %v1623_v13 = vrot.slane %v1622_v0, 4  ;;  %v1632_v24 = vor.u32 %v1631_v53, %v1627_v5  ;;  %v2770_v27 = vsel %vm2767_vm6, %v3696_v11, %v2144_v26  ;;  %v440_v49 = vshll.u32 %v209_v14, 16  ;;  %v211_v26 = vld [vmem:[%s4149_s19 + $0x6c] sm:$0xf] }
  0xa3   : > { %2589 = vrot.lane.b32.xlu1 %v3799_v48, %s4101_s6  ;;  %v1657_v30 = vrot.slane %v1656_v19, 4  ;;  %v4764_v31 = vsel %vm2816_vm7, %v2770_v27, %v4677_v52  ;;  %v4766_v35 = vpop.permute.xlu0 %2399  ;;  %v446_v39 = vshll.u32 %v4755_v23, 16  ;;  %v450_v37 = vshrl.u32 %v4755_v23, 16 }
  0xa4   : > { %v1628_v36 = vsel %vm4223_vm5, %v1623_v13, %v1627_v5  ;;  %v1633_v58 = vrot.slane %v1632_v24, 4  ;;  %v439_v8 = vrot.slane %v437_v32, 4  ;;  %v442_v42 = vrot.slane %v440_v49, 5  ;;  %v4777_v43 = vpop.permute.xlu1 %2577 }
  0xa5   : > { %2587 = vrot.lane.b32.xlu0 %v3798_v45, %s4101_s6  ;;  %v1662_v52 = vsel %vm4223_vm5, %v1657_v30, %v1661_v63  ;;  %v456_v47 = vshll.u32 %v4759_v28, 16  ;;  %v448_v3 = vrot.slane %v446_v39, 5  ;;  %v452_v48 = vrot.slane %v450_v37, 4 }
  0xa6   : > { %v3815_v46 = vcombine.low %v1652_v16, %v1662_v52  ;;  %v1638_v1 = vsel %vm4223_vm5, %v1633_v58, %v1637_v38  ;;  %v443_v40 = vor.u32 %v442_v42, %v439_v8  ;;  %v3686_v45 = vrot.slane %v3670_v41, 9  ;;  %v3671_v16 = vld [vmem:[%s4149_s19 + $0x6c] sm:$0xe] }
  0xa7   : > { %v3814_v50 = vcombine.low %v1628_v36, %v1638_v1  ;;  %v458_v51 = vrot.slane %v456_v47, 5  ;;  %v4785_v29 = vpop.permute.xlu0 %2575  ;;  %v453_v20 = vor.u32 %v452_v48, %v448_v3  ;;  %v1963_v33 = vrot.slane %v4715_v4, 5  ;;  %v637_v41 = vld [vmem:[%s4149_s19 + $0x6c] sm:$0xe] }
  0xa8   : > { %2669 = vrot.lane.b32.xlu1 %v3815_v46, %s4102_s7  ;;  %v1966_v54 = vrot.slane %v4734_v2, 5  ;;  %v3697_v12 = vcombine.low %v4047_v56, %v4046_v55  ;;  %v444_v59 = vrot.slane %v443_v40, 4  ;;  %v461_v60 = vshrl.u32 %v211_v26, 16  ;;  %v234_v2 = vld [vmem:[%s4149_s19 + $0x74] sm:$0x1] }
  0xa9   : > { %2667 = vrot.lane.b32.xlu0 %v3814_v50, %s4102_s7  ;;  %v464_v53 = vshll.u32 %v211_v26, 16  ;;  %v470_v61 = vshll.u32 %v4783_v9, 16  ;;  %v454_v63 = vrot.slane %v453_v20, 4  ;;  %v1964_v0 = vsel %vm4173_vm2, %v3686_v45, %v1963_v33 }
  0xaa   : > { %v1965_v5 = vrot.slane %v1963_v33, 4  ;;  %v2773_v4 = vsel %vm2767_vm6, %v3697_v12, %v4744_v62  ;;  %v449_v6 = vsel %vm4223_vm5, %v444_v59, %v448_v3  ;;  %v463_v11 = vrot.slane %v461_v60, 4  ;;  %v3554_v60 = vld [vmem:[%s4149_s19 + $0x78] sm:$0xf] }
  0xab   : > { %v2820_v10 = vsel %vm2816_vm7, %v2773_v4, %v4684_v57  ;;  %v466_v14 = vrot.slane %v464_v53, 5  ;;  %v4804_v19 = vpop.permute.xlu1 %2657  ;;  %v459_v38 = vsel %vm4223_vm5, %v454_v63, %v458_v51  ;;  %v472_v62 = vrot.slane %v470_v61, 5  ;;  %v3552_v63 = vld [vmem:[%s4149_s19 + $0x6c] sm:$0xf] }
  0xac   : > { %v1967_v13 = vsel %vm4173_vm2, %v1965_v5, %v1966_v54  ;;  %v474_v24 = vshrl.u32 %v4783_v9, 16  ;;  %v4811_v27 = vpop.permute.xlu0 %2655  ;;  %v3720_v30 = vcombine.low %v449_v6, %v459_v38  ;;  %v480_v49 = vshll.u32 %v234_v2, 16 }
  0xad   : > { %v3830_v32 = vcombine.low %v1964_v0, %v1967_v13  ;;  %v467_v57 = vor.u32 %v466_v14, %v463_v11  ;;  %v3687_v58 = vrot.slane %v3671_v16, 9  ;;  %v1970_v39 = vrot.slane %v4703_v34, 5  ;;  %v636_v34 = vld [vmem:[%s4149_s19 + $0x60] sm:$0xe] }
  0xae   : > { %v476_v36 = vrot.slane %v474_v24, 4  ;;  %v1973_v37 = vrot.slane %v4728_v7, 5  ;;  %2159 = vrot.lane.b32.xlu1 %v3720_v30, %s4099_s27  ;;  %v482_v8 = vrot.slane %v480_v49, 5  ;;  %v2853_v1 = vsel %vm2849_vm8, %v2820_v10, %v4639_v25  ;;  %v3577_v30 = vld [vmem:[%s4149_s19 + $0x80] sm:$0x1] }
  0xaf   : > { %2747 = vrot.lane.b32.xlu0 %v3830_v32, %s4103_s16  ;;  %v468_v52 = vrot.slane %v467_v57, 4  ;;  %v1971_v47 = vsel %vm4173_vm2, %v3687_v58, %v1970_v39  ;;  %v1972_v46 = vrot.slane %v1970_v39, 4  ;;  %v2886_v48 = vsel %vm2882_vm9, %v2853_v1, %v4749_v15  ;;  %v4879_v57 = vld [vmem:[%s4149_s19 + $0x74] sm:$0x1] }
  0xb0   : > { %v477_v42 = vor.u32 %v476_v36, %v472_v62  ;;  %v4823_v3 = vpop.permute.xlu0 %2735  ;;  %v2851_v26 = vsel %vm2849_vm8, %v4764_v31, %v4671_v22  ;;  %v3529_v50 = vrot.slane %v637_v41, 9  ;;  %v760_v20 = vrot.slane %v4783_v9, 5 }
  0xb1   : > { %v473_v7 = vsel %vm4223_vm5, %v468_v52, %v472_v62  ;;  %v4832_v40 = vpop.permute.xlu1 %2147  ;;  %v1974_v25 = vsel %vm4173_vm2, %v1972_v46, %v1973_v37  ;;  %v2884_v45 = vsel %vm2882_vm9, %v2851_v26, %v4766_v35  ;;  %v763_v15 = vrot.slane %v234_v2, 5 }
  0xb2   : > { %v478_v51 = vrot.slane %v477_v42, 4  ;;  %v3831_v33 = vcombine.low %v1971_v47, %v1974_v25  ;;  %v3528_v54 = vrot.slane %v636_v34, 9  ;;  %v753_v22 = vrot.slane %v4755_v23, 5  ;;  %v4850_v23 = vld [vmem:[%s4149_s19 + $0x7c] sm:$0xf] }
  0xb3   : > { %v761_v55 = vsel %vm4173_vm2, %v3529_v50, %v760_v20  ;;  %v762_v56 = vrot.slane %v760_v20, 4  ;;  %v756_v12 = vrot.slane %v4759_v28, 5  ;;  %v2919_v61 = vsel %vm2915_vm10, %v2886_v48, %v4719_v44  ;;  %v4858_v28 = vld [vmem:[%s4149_s19 + $0x70] sm:$0xf]  ;;  %v4048_v50 = vld [vmem:[%s4149_s19 + $0x18] sm:$0xf] }
  0xb4   : > { %v483_v31 = vsel %vm4223_vm5, %v478_v51, %v482_v8  ;;  %2749 = vrot.lane.b32.xlu0 %v3831_v33, %s4103_s16  ;;  %v754_v9 = vsel %vm4173_vm2, %v3528_v54, %v753_v22  ;;  %v755_v59 = vrot.slane %v753_v22, 4  ;;  %v2952_v2 = vsel %vm2948_vm11, %v2919_v61, %v4777_v43  ;;  %v4049_v51 = vld [vmem:[%s4149_s19 + $0x1c] sm:$0xf] }
  0xb5   : > { %v3721_v35 = vcombine.low %v473_v7, %v483_v31  ;;  %v764_v53 = vsel %vm4173_vm2, %v762_v56, %v763_v15  ;;  %v2917_v6 = vsel %vm2915_vm10, %v2884_v45, %v4689_v18  ;;  %v1076_v11 = vshrl.u32 %v3554_v60, 16  ;;  %v3593_v7 = vld [vmem:[%s4149_s19 + $0x78] sm:$0xe]  ;;  %v3592_v45 = vld [vmem:[%s4149_s19 + $0x6c] sm:$0xe] }
  0xb6   : > { %v4860_v0 = vpop.permute.xlu0 %2737  ;;  %v3737_v5 = vcombine.low %v761_v55, %v764_v53  ;;  %v757_v4 = vsel %vm4173_vm2, %v755_v59, %v756_v12  ;;  %v1079_v14 = vshll.u32 %v3554_v60, 16  ;;  %v1089_v16 = vshrl.u32 %v4850_v23, 16 }
  0xb7   : > { %2161 = vrot.lane.b32.xlu1 %v3721_v35, %s4099_s27  ;;  %v4869_v44 = vpop.permute.xlu1 %2149  ;;  %v3736_v10 = vcombine.low %v754_v9, %v757_v4  ;;  %v2950_v38 = vsel %vm2948_vm11, %v2917_v6, %v4785_v29  ;;  %v1052_v13 = vshrl.u32 %v3552_v63, 16  ;;  %v1055_v62 = vshll.u32 %v3552_v63, 16 }
  0xb8   : > { %v1065_v24 = vshrl.u32 %v4858_v28, 16  ;;  %v1078_v43 = vrot.slane %v1076_v11, 4  ;;  %v1081_v18 = vrot.slane %v1079_v14, 5  ;;  %v3752_v32 = vcombine.low %v3552_v63, %v4858_v28  ;;  %v3634_v11 = vld [vmem:[%s4149_s19 + $0x84] sm:$0xf] }
  0xb9   : > { %2239 = vrot.lane.b32.xlu0 %v3736_v10, %s4098_s22  ;;  %v3753_v29 = vcombine.low %v3554_v60, %v4850_v23  ;;  %v1054_v36 = vrot.slane %v1052_v13, 4  ;;  %v1057_v58 = vrot.slane %v1055_v62, 5  ;;  %v2985_v39 = vsel %vm2981_vm12, %v2952_v2, %v4804_v19  ;;  %v4925_v14 = vld [vmem:[%s4149_s19 + $0x88] sm:$0xf] }
  0xba   : > { %v4881_v49 = vpop.permute.xlu0 %2227  ;;  %v1082_v41 = vor.u32 %v1081_v18, %v1078_v43  ;;  %v1085_v52 = vshll.u32 %v4850_v23, 16  ;;  %v1091_v8 = vrot.slane %v1089_v16, 4  ;;  %v1095_v42 = vshll.u32 %v3577_v30, 16 }
  0xbb   : > { %2241 = vrot.lane.b32.xlu1 %v3737_v5, %s4098_s22  ;;  %v4887_v37 = vpop.permute.xlu1 %2229  ;;  %v1058_v47 = vor.u32 %v1057_v58, %v1054_v36  ;;  %v1061_v46 = vshll.u32 %v4858_v28, 16  ;;  %v1067_v1 = vrot.slane %v1065_v24, 4  ;;  %v1071_v34 = vshll.u32 %v4879_v57, 16  ;;  %v3632_v24 = vld [vmem:[%s4149_s19 + $0x78] sm:$0xf] }
  0xbc   : > { %v2983_v19 = vsel %vm2981_vm12, %v2950_v38, %v4811_v27  ;;  %v1083_v48 = vrot.slane %v1082_v41, 4  ;;  %v1087_v26 = vrot.slane %v1085_v52, 5  ;;  %v3698_v25 = vcombine.low %v4048_v50, %v4049_v51  ;;  %v4944_v58 = vld [vmem:[%s4149_s19 + $0x7c] sm:$0xf] }
  0xbd   : > { %2335 = vrot.lane.b32.xlu0 %v3752_v32, %s4096_s20  ;;  %v1097_v20 = vrot.slane %v1095_v42, 5  ;;  %v1059_v33 = vrot.slane %v1058_v47, 4  ;;  %v1063_v15 = vrot.slane %v1061_v46, 5  ;;  %v1073_v54 = vrot.slane %v1071_v34, 5  ;;  %v4050_v32 = vld [vmem:[%s4149_s19 + $0x24] sm:$0xf] }
  0xbe   : > { %v4902_v31 = vpop.permute.xlu0 %2323  ;;  %v1088_v55 = vsel %vm4223_vm5, %v1083_v48, %v1087_v26  ;;  %v1092_v27 = vor.u32 %v1091_v8, %v1087_v26  ;;  %v3609_v56 = vrot.slane %v3593_v7, 9  ;;  %v1372_v12 = vrot.slane %v4850_v23, 5  ;;  %v4960_v26 = vld [vmem:[%s4149_s19 + $0x80] sm:$0x1] }
  0xbf   : > { %2337 = vrot.lane.b32.xlu1 %v3753_v29, %s4096_s20  ;;  %v4900_v22 = vpop.permute.xlu1 %2325  ;;  %v1068_v35 = vor.u32 %v1067_v1, %v1063_v15  ;;  %v4909_v9 = vsel %vm2767_vm6, %v3698_v25, %v4832_v40  ;;  %v1375_v59 = vrot.slane %v3577_v30, 5  ;;  %v3608_v60 = vrot.slane %v3592_v45, 9  ;;  %v4955_v1 = vld [vmem:[%s4149_s19 + $0x8c] sm:$0x1] }
  0xc0   : > { %v1093_v53 = vrot.slane %v1092_v27, 4  ;;  %v1064_v61 = vsel %vm4223_vm5, %v1059_v33, %v1063_v15  ;;  %v1374_v63 = vrot.slane %v1372_v12, 4  ;;  %v1365_v5 = vrot.slane %v4858_v28, 5 }
  0xc1   : > { %v1069_v4 = vrot.slane %v1068_v35, 4  ;;  %v1368_v23 = vrot.slane %v4879_v57, 5  ;;  %v1373_v6 = vsel %vm4173_vm2, %v3609_v56, %v1372_v12  ;;  %v3016_v62 = vsel %vm3014_vm13, %v2983_v19, %v4823_v3  ;;  %v4051_v57 = vld [vmem:[%s4149_s19 + $0x28] sm:$0xf]  ;;  %v213_v35 = vld [vmem:[%s4149_s19 + $0x78] sm:$0xf] }
  0xc2   : > { %v1098_v40 = vsel %vm4223_vm5, %v1093_v53, %v1097_v20  ;;  %v1376_v10 = vsel %vm4173_vm2, %v1374_v63, %v1375_v59  ;;  %v1367_v28 = vrot.slane %v1365_v5, 4  ;;  %v1366_v13 = vsel %vm4173_vm2, %v3608_v60, %v1365_v5  ;;  %3906 = vmatprep.mubr.msk.bf16.mxu0 %vm3047_vm14, %v3016_v62  ;;  %v4980_v63 = vld [vmem:[%s4149_s19 + $0x7c] sm:$0xf] }
  0xc3   : > { %v4915_v2 = vpop.permute.xlu1 %2405  ;;  %v3769_v16 = vcombine.low %v1088_v55, %v1098_v40  ;;  %v1074_v38 = vsel %vm4223_vm5, %v1069_v4, %v1073_v54  ;;  %v3699_v29 = vcombine.low %v4050_v32, %v4051_v57  ;;  %v3018_v36 = vsel %vm3014_vm13, %v2985_v39, %v4860_v0 }
  0xc4   : > { %v3768_v43 = vcombine.low %v1064_v61, %v1074_v38  ;;  %v1369_v18 = vsel %vm4173_vm2, %v1367_v28, %v1368_v23  ;;  %v3785_v3 = vcombine.low %v1373_v6, %v1376_v10  ;;  %v1688_v41 = vshrl.u32 %v3634_v11, 16  ;;  %3907 = vmatmul.mubr.msk.bf16.vlgmr.msra.gmra.mrb[0].mxu0 %vm3047_vm14, %v3018_v36  ;;  %v4987_v10 = vld [vmem:[%s4149_s19 + $0x80] sm:$0x1] }
  0xc5   : > { %v4934_v30 = vpop.permute.xlu0 %2403  ;;  %2417 = vrot.lane.b32.xlu1 %v3769_v16, %s4100_s30  ;;  %v1691_v52 = vshll.u32 %v3634_v11, 16  ;;  %v1701_v8 = vshrl.u32 %v4925_v14, 16  ;;  %v3784_v47 = vcombine.low %v1366_v13, %v1369_v18  ;;  %v2779_v0 = vsel %vm2767_vm6, %v3699_v29, %v4869_v44  ;;  %v3672_v16 = vld [vmem:[%s4149_s19 + $0x78] sm:$0xe] }
  0xc6   : > { %2415 = vrot.lane.b32.xlu0 %v3768_v43, %s4100_s30  ;;  %v1664_v39 = vshrl.u32 %v3632_v24, 16  ;;  %v1667_v46 = vshll.u32 %v3632_v24, 16  ;;  %v1690_v34 = vrot.slane %v1688_v41, 4  ;;  %v3801_v19 = vcombine.low %v3634_v11, %v4925_v14 }
  0xc7   : > { %v4949_v42 = vpop.permute.xlu1 %2485  ;;  %v1693_v7 = vrot.slane %v1691_v52, 5  ;;  %v1677_v48 = vshrl.u32 %v4944_v58, 16  ;;  %v3800_v45 = vcombine.low %v3632_v24, %v4944_v58  ;;  %v2824_v44 = vsel %vm2816_vm7, %v2779_v0, %v4887_v37 }
  0xc8   : > { %v1666_v51 = vrot.slane %v1664_v39, 4  ;;  %v1669_v25 = vrot.slane %v1667_v46, 5  ;;  %v1697_v33 = vshll.u32 %v4925_v14, 16  ;;  %v1703_v15 = vrot.slane %v1701_v8, 4  ;;  %v215_v46 = vld [vmem:[%s4149_s19 + $0x84] sm:$0xf] }
  0xc9   : > { %v4962_v50 = vpop.permute.xlu0 %2483  ;;  %2497 = vrot.lane.b32.xlu1 %v3785_v3, %s4097_s21  ;;  %v1694_v20 = vor.u32 %v1693_v7, %v1690_v34  ;;  %v1707_v54 = vshll.u32 %v4955_v1, 16  ;;  %v1673_v56 = vshll.u32 %v4944_v58, 16  ;;  %v1679_v12 = vrot.slane %v1677_v48, 4 }
  0xca   : > { %2495 = vrot.lane.b32.xlu0 %v3784_v47, %s4097_s21  ;;  %v1670_v27 = vor.u32 %v1669_v25, %v1666_v51  ;;  %v1683_v37 = vshll.u32 %v4960_v26, 16  ;;  %v2822_v59 = vsel %vm2816_vm7, %v4909_v9, %v4881_v49  ;;  %v1699_v53 = vrot.slane %v1697_v33, 5  ;;  %v5011_v51 = vld [vmem:[%s4149_s19 + $0x88] sm:$0xf] }
  0xcb   : > { %v4970_v55 = vpop.permute.xlu1 %2581  ;;  %v1695_v60 = vrot.slane %v1694_v20, 4  ;;  %v1709_v61 = vrot.slane %v1707_v54, 5  ;;  %v1675_v23 = vrot.slane %v1673_v56, 5  ;;  %v2857_v6 = vsel %vm2849_vm8, %v2824_v44, %v4900_v22  ;;  %v236_v54 = vld [vmem:[%s4149_s19 + $0x8c] sm:$0x1] }
  0xcc   : > { %v1671_v4 = vrot.slane %v1670_v27, 4  ;;  %v1685_v40 = vrot.slane %v1683_v37, 5  ;;  %v1704_v9 = vor.u32 %v1703_v15, %v1699_v53  ;;  %v485_v28 = vshrl.u32 %v213_v35, 16 }
  0xcd   : > { %v4982_v5 = vpop.permute.xlu0 %2579  ;;  %2593 = vrot.lane.b32.xlu1 %v3801_v19, %s4101_s6  ;;  %v1700_v49 = vsel %vm4223_vm5, %v1695_v60, %v1699_v53  ;;  %v488_v11 = vshll.u32 %v213_v35, 16  ;;  %v1680_v13 = vor.u32 %v1679_v12, %v1675_v23  ;;  %v494_v62 = vshll.u32 %v4980_v63, 16 }
  0xce   : > { %2591 = vrot.lane.b32.xlu0 %v3800_v45, %s4101_s6  ;;  %v1676_v38 = vsel %vm4223_vm5, %v1671_v4, %v1675_v23  ;;  %v498_v22 = vshrl.u32 %v4980_v63, 16  ;;  %v1705_v43 = vrot.slane %v1704_v9, 4  ;;  %v487_v18 = vrot.slane %v485_v28, 4 }
  0xcf   : > { %v490_v32 = vrot.slane %v488_v11, 5  ;;  %v504_v57 = vshll.u32 %v4987_v10, 16  ;;  %v1681_v36 = vrot.slane %v1680_v13, 4  ;;  %v496_v3 = vrot.slane %v494_v62, 5 }
  0xd0   : > { %v4998_v24 = vpop.permute.xlu1 %2661  ;;  %v500_v41 = vrot.slane %v498_v22, 4  ;;  %v3688_v52 = vrot.slane %v3672_v16, 9  ;;  %v1710_v8 = vsel %vm4223_vm5, %v1705_v43, %v1709_v61  ;;  %v1977_v39 = vrot.slane %v4944_v58, 5 }
  0xd1   : > { %v5001_v29 = vpop.permute.xlu0 %2659  ;;  %v491_v47 = vor.u32 %v490_v32, %v487_v18  ;;  %v506_v0 = vrot.slane %v504_v57, 5  ;;  %v3817_v34 = vcombine.low %v1700_v49, %v1710_v8  ;;  %v1686_v7 = vsel %vm4223_vm5, %v1681_v36, %v1685_v40  ;;  %v639_v49 = vld [vmem:[%s4149_s19 + $0x84] sm:$0xe] }
  0xd2   : > { %v501_v19 = vor.u32 %v500_v41, %v496_v3  ;;  %v1980_v48 = vrot.slane %v4960_v26, 5  ;;  %v3816_v25 = vcombine.low %v1676_v38, %v1686_v7  ;;  %v1978_v44 = vsel %vm4173_vm2, %v3688_v52, %v1977_v39  ;;  %v638_v38 = vld [vmem:[%s4149_s19 + $0x78] sm:$0xe] }
  0xd3   : > { %v492_v45 = vrot.slane %v491_v47, 4  ;;  %v1979_v20 = vrot.slane %v1977_v39, 4  ;;  %2673 = vrot.lane.b32.xlu1 %v3817_v34, %s4102_s7  ;;  %v2855_v58 = vsel %vm2849_vm8, %v2822_v59, %v4902_v31  ;;  %v2890_v26 = vsel %vm2882_vm9, %v2857_v6, %v4915_v2  ;;  %v3673_v59 = vld [vmem:[%s4149_s19 + $0x84] sm:$0xe]  ;;  %v5057_v39 = vld [vmem:[%s4149_s19 + $0x90] sm:$0xf] }
  0xd4   : > { %v502_v15 = vrot.slane %v501_v19, 4  ;;  %v509_v27 = vshrl.u32 %v215_v46, 16  ;;  %2671 = vrot.lane.b32.xlu0 %v3816_v25, %s4102_s7  ;;  %v512_v35 = vshll.u32 %v215_v46, 16  ;;  %v518_v31 = vshll.u32 %v5011_v51, 16 }
  0xd5   : > { %v5015_v33 = vpop.permute.xlu0 %2739  ;;  %v497_v12 = vsel %vm4223_vm5, %v492_v45, %v496_v3  ;;  %v1981_v37 = vsel %vm4173_vm2, %v1979_v20, %v1980_v48  ;;  %v522_v61 = vshrl.u32 %v5011_v51, 16  ;;  %v528_v6 = vshll.u32 %v236_v54, 16  ;;  %v5064_v48 = vld [vmem:[%s4149_s19 + $0x94] sm:$0xf] }
  0xd6   : > { %v5023_v56 = vpop.permute.xlu1 %2151  ;;  %v507_v2 = vsel %vm4223_vm5, %v502_v15, %v506_v0  ;;  %v3832_v60 = vcombine.low %v1978_v44, %v1981_v37  ;;  %v511_v53 = vrot.slane %v509_v27, 4  ;;  %v514_v23 = vrot.slane %v512_v35, 5  ;;  %v3556_v44 = vld [vmem:[%s4149_s19 + $0x84] sm:$0xf] }
  0xd7   : > { %v3722_v4 = vcombine.low %v497_v12, %v507_v2  ;;  %v520_v40 = vrot.slane %v518_v31, 5  ;;  %v524_v9 = vrot.slane %v522_v61, 4  ;;  %v3689_v28 = vrot.slane %v3673_v59, 9 }
  0xd8   : > { %v1984_v11 = vrot.slane %v4925_v14, 5  ;;  %v1987_v16 = vrot.slane %v4955_v1, 5  ;;  %2751 = vrot.lane.b32.xlu0 %v3832_v60, %s4103_s16  ;;  %v2888_v13 = vsel %vm2882_vm9, %v2855_v58, %v4934_v30  ;;  %v515_v62 = vor.u32 %v514_v23, %v511_v53  ;;  %v5094_v60 = vld [vmem:[%s4149_s19 + $0x98] sm:$0x1] }
  0xd9   : > { %2163 = vrot.lane.b32.xlu1 %v3722_v4, %s4099_s27  ;;  %v530_v22 = vrot.slane %v528_v6, 5  ;;  %v2923_v43 = vsel %vm2915_vm10, %v2890_v26, %v4949_v42  ;;  %v525_v32 = vor.u32 %v524_v9, %v520_v40  ;;  %v3531_v57 = vrot.slane %v639_v49, 9 }
  0xda   : > { %v1985_v14 = vsel %vm4173_vm2, %v3689_v28, %v1984_v11  ;;  %v1986_v1 = vrot.slane %v1984_v11, 4  ;;  %v516_v3 = vrot.slane %v515_v62, 4  ;;  %v774_v30 = vrot.slane %v5011_v51, 5 }
  0xdb   : > { %v5045_v18 = vpop.permute.xlu0 %2741  ;;  %v777_v41 = vrot.slane %v236_v54, 5  ;;  %v3530_v52 = vrot.slane %v638_v38, 9  ;;  %v526_v8 = vrot.slane %v525_v32, 4  ;;  %v767_v47 = vrot.slane %v4980_v63, 5  ;;  %v5084_v54 = vld [vmem:[%s4149_s19 + $0x88] sm:$0xf] }
  0xdc   : > { %v5049_v36 = vpop.permute.xlu1 %2153  ;;  %v1988_v42 = vsel %vm4173_vm2, %v1986_v1, %v1987_v16  ;;  %v770_v0 = vrot.slane %v4987_v10, 5  ;;  %v521_v46 = vsel %vm4223_vm5, %v516_v3, %v520_v40  ;;  %v2921_v7 = vsel %vm2915_vm10, %v2888_v13, %v4962_v50  ;;  %v3595_v1 = vld [vmem:[%s4149_s19 + $0x90] sm:$0xe] }
  0xdd   : > { %v3833_v34 = vcombine.low %v1985_v14, %v1988_v42  ;;  %v776_v19 = vrot.slane %v774_v30, 4  ;;  %v531_v63 = vsel %vm4223_vm5, %v526_v8, %v530_v22  ;;  %v775_v10 = vsel %vm4173_vm2, %v3531_v57, %v774_v30  ;;  %v4052_v42 = vld [vmem:[%s4149_s19 + $0x30] sm:$0xf] }
  0xde   : > { %v768_v25 = vsel %vm4173_vm2, %v3530_v52, %v767_v47  ;;  %v769_v45 = vrot.slane %v767_v47, 4  ;;  %v3723_v50 = vcombine.low %v521_v46, %v531_v63  ;;  %v2956_v15 = vsel %vm2948_vm11, %v2923_v43, %v4970_v55  ;;  %v4053_v47 = vld [vmem:[%s4149_s19 + $0x34] sm:$0xf]  ;;  %v3594_v46 = vld [vmem:[%s4149_s19 + $0x84] sm:$0xe] }
  0xdf   : > { %v5066_v51 = vpop.permute.xlu0 %2231  ;;  %2753 = vrot.lane.b32.xlu0 %v3833_v34, %s4103_s16  ;;  %v778_v58 = vsel %vm4173_vm2, %v776_v19, %v777_v41  ;;  %v1124_v26 = vshrl.u32 %v5057_v39, 16  ;;  %v2954_v12 = vsel %vm2948_vm11, %v2921_v7, %v4982_v5  ;;  %v1127_v37 = vshll.u32 %v5057_v39, 16  ;;  %v5100_v5 = vld [vmem:[%s4149_s19 + $0x8c] sm:$0x1] }
  0xe0   : > { %v5075_v20 = vpop.permute.xlu1 %2233  ;;  %v771_v27 = vsel %vm4173_vm2, %v769_v45, %v770_v0  ;;  %v1137_v35 = vshrl.u32 %v5064_v48, 16  ;;  %2165 = vrot.lane.b32.xlu1 %v3723_v50, %s4099_s27  ;;  %v3739_v31 = vcombine.low %v775_v10, %v778_v58  ;;  %v1100_v2 = vshrl.u32 %v3556_v44, 16 }
  0xe1   : > { %v3738_v59 = vcombine.low %v768_v25, %v771_v27  ;;  %v1126_v55 = vrot.slane %v1124_v26, 4  ;;  %v1129_v53 = vrot.slane %v1127_v37, 5  ;;  %v3755_v61 = vcombine.low %v5057_v39, %v5064_v48  ;;  %v5139_v26 = vld [vmem:[%s4149_s19 + $0x9c] sm:$0xf] }
  0xe2   : > { %v1103_v4 = vshll.u32 %v3556_v44, 16  ;;  %v1113_v23 = vshrl.u32 %v5084_v54, 16  ;;  %v1102_v49 = vrot.slane %v1100_v2, 4  ;;  %v3754_v9 = vcombine.low %v3556_v44, %v5084_v54  ;;  %v4055_v2 = vld [vmem:[%s4149_s19 + $0x40] sm:$0xf] }
  0xe3   : > { %v5104_v6 = vpop.permute.xlu0 %2327  ;;  %2243 = vrot.lane.b32.xlu0 %v3738_v59, %s4098_s22  ;;  %v2989_v28 = vsel %vm2981_vm12, %v2956_v15, %v4998_v24  ;;  %v1133_v11 = vshll.u32 %v5064_v48, 16  ;;  %v1130_v38 = vor.u32 %v1129_v53, %v1126_v55  ;;  %v1139_v13 = vrot.slane %v1137_v35, 4  ;;  %v4054_v55 = vld [vmem:[%s4149_s19 + $0x3c] sm:$0xf]  ;;  %v5152_v53 = vld [vmem:[%s4149_s19 + $0xa0] sm:$0xf] }
  0xe4   : > { %v5102_v40 = vpop.permute.xlu1 %2329  ;;  %v1105_v16 = vrot.slane %v1103_v4, 5  ;;  %v1143_v62 = vshll.u32 %v5094_v60, 16  ;;  %2245 = vrot.lane.b32.xlu1 %v3739_v31, %s4098_s22  ;;  %v1109_v43 = vshll.u32 %v5084_v54, 16  ;;  %v1115_v32 = vrot.slane %v1113_v23, 4 }
  0xe5   : > { %v1135_v22 = vrot.slane %v1133_v11, 5  ;;  %v1119_v14 = vshll.u32 %v5100_v5, 16  ;;  %v2987_v24 = vsel %vm2981_vm12, %v2954_v12, %v5001_v29  ;;  %v1131_v57 = vrot.slane %v1130_v38, 4  ;;  %v5165_v11 = vld [vmem:[%s4149_s19 + $0x94] sm:$0xf] }
  0xe6   : > { %v1145_v3 = vrot.slane %v1143_v62, 5  ;;  %v1106_v30 = vor.u32 %v1105_v16, %v1102_v49  ;;  %v1111_v8 = vrot.slane %v1109_v43, 5  ;;  %v3700_v0 = vcombine.low %v4052_v42, %v4053_v47  ;;  %v5192_v42 = vld [vmem:[%s4149_s19 + $0x98] sm:$0x1] }
  0xe7   : > { %2339 = vrot.lane.b32.xlu0 %v3754_v9, %s4096_s20  ;;  %v1140_v52 = vor.u32 %v1139_v13, %v1135_v22  ;;  %v3020_v39 = vsel %vm3014_vm13, %v2987_v24, %v5015_v33  ;;  %v1136_v29 = vsel %vm4223_vm5, %v1131_v57, %v1135_v22  ;;  %v1121_v7 = vrot.slane %v1119_v14, 5  ;;  %v3636_v9 = vld [vmem:[%s4149_s19 + $0x90] sm:$0xf]  ;;  %v5182_v57 = vld [vmem:[%s4149_s19 + $0xa4] sm:$0x1] }
  0xe8   : > { %v5118_v41 = vpop.permute.xlu1 %2409  ;;  %v1107_v34 = vrot.slane %v1106_v30, 4  ;;  %v3611_v19 = vrot.slane %v3595_v1, 9  ;;  %3910 = vmatprep.mubr.msk.bf16.mxu0 %vm3047_vm14, %v3020_v39  ;;  %2341 = vrot.lane.b32.xlu1 %v3755_v61, %s4096_s20  ;;  %v1116_v25 = vor.u32 %v1115_v32, %v1111_v8  ;;  %v1386_v45 = vrot.slane %v5064_v48, 5 }
  0xe9   : > { %v1141_v10 = vrot.slane %v1140_v52, 4  ;;  %v1389_v33 = vrot.slane %v5094_v60, 5  ;;  %v3610_v50 = vrot.slane %v3594_v46, 9  ;;  %v1379_v58 = vrot.slane %v5084_v54, 5 }
  0xea   : > { %v5129_v63 = vpop.permute.xlu0 %2407  ;;  %v1112_v44 = vsel %vm4223_vm5, %v1107_v34, %v1111_v8  ;;  %v1382_v15 = vrot.slane %v5100_v5, 5  ;;  %v1117_v48 = vrot.slane %v1116_v25, 4  ;;  %v1387_v37 = vsel %vm4173_vm2, %v3611_v19, %v1386_v45 }
  0xeb   : > { %v1146_v12 = vsel %vm4223_vm5, %v1141_v10, %v1145_v3  ;;  %v1388_v35 = vrot.slane %v1386_v45, 4  ;;  %v1380_v54 = vsel %vm4173_vm2, %v3610_v50, %v1379_v58  ;;  %v1381_v59 = vrot.slane %v1379_v58, 4  ;;  %v217_v10 = vld [vmem:[%s4149_s19 + $0x90] sm:$0xf]  ;;  %v5206_v50 = vld [vmem:[%s4149_s19 + $0x94] sm:$0xf] }
  0xec   : > { %v5141_v27 = vpop.permute.xlu1 %2489  ;;  %v3771_v31 = vcombine.low %v1136_v29, %v1146_v12  ;;  %v3701_v60 = vcombine.low %v4054_v55, %v4055_v2  ;;  %v1122_v4 = vsel %vm4223_vm5, %v1117_v48, %v1121_v7  ;;  %v3022_v5 = vsel %vm3014_vm13, %v2989_v28, %v5045_v18 }
  0xed   : > { %v1390_v23 = vsel %vm4173_vm2, %v1388_v35, %v1389_v33  ;;  %v1736_v49 = vshrl.u32 %v5139_v26, 16  ;;  %v3770_v16 = vcombine.low %v1112_v44, %v1122_v4  ;;  %v2782_v38 = vsel %vm2767_vm6, %v3700_v0, %v5023_v56  ;;  %3911 = vmatmul.mubr.msk.bf16.gmra.mrb[4].mxu0 %vm3047_vm14, %v3022_v5  ;;  %v3674_v4 = vld [vmem:[%s4149_s19 + $0x90] sm:$0xe] }
  0xee   : > { %v5154_v61 = vpop.permute.xlu0 %2487  ;;  %2421 = vrot.lane.b32.xlu1 %v3771_v31, %s4100_s30  ;;  %v3787_v13 = vcombine.low %v1387_v37, %v1390_v23  ;;  %v1383_v62 = vsel %vm4173_vm2, %v1381_v59, %v1382_v15  ;;  %v2785_v18 = vsel %vm2767_vm6, %v3701_v60, %v5049_v36  ;;  %v1739_v43 = vshll.u32 %v5139_v26, 16  ;;  %v5214_v31 = vld [vmem:[%s4149_s19 + $0x98] sm:$0x1] }
  0xef   : > { %v1738_v28 = vrot.slane %v1736_v49, 4  ;;  %v1749_v32 = vshrl.u32 %v5152_v53, 16  ;;  %2419 = vrot.lane.b32.xlu0 %v3770_v16, %s4100_s30  ;;  %v3786_v56 = vcombine.low %v1380_v54, %v1383_v62  ;;  %v1712_v14 = vshrl.u32 %v3636_v9, 16 }
  0xf0   : > { %v5172_v22 = vpop.permute.xlu1 %2585  ;;  %v1715_v1 = vshll.u32 %v3636_v9, 16  ;;  %v1725_v24 = vshrl.u32 %v5165_v11, 16  ;;  %v1741_v36 = vrot.slane %v1739_v43, 5  ;;  %v3803_v30 = vcombine.low %v5139_v26, %v5152_v53 }
  0xf1   : > { %v3802_v52 = vcombine.low %v3636_v9, %v5165_v11  ;;  %v2828_v8 = vsel %vm2816_vm7, %v2785_v18, %v5075_v20  ;;  %v1714_v47 = vrot.slane %v1712_v14, 4  ;;  %v1745_v39 = vshll.u32 %v5152_v53, 16  ;;  %v219_v14 = vld [vmem:[%s4149_s19 + $0x9c] sm:$0xf] }
  0xf2   : > { %v5184_v3 = vpop.permute.xlu0 %2583  ;;  %2501 = vrot.lane.b32.xlu1 %v3787_v13, %s4097_s21  ;;  %v1717_v0 = vrot.slane %v1715_v1, 5  ;;  %v1751_v46 = vrot.slane %v1749_v32, 4  ;;  %v1742_v29 = vor.u32 %v1741_v36, %v1738_v28  ;;  %v1755_v34 = vshll.u32 %v5182_v57, 16 }
  0xf3   : > { %v1721_v7 = vshll.u32 %v5165_v11, 16  ;;  %v1727_v19 = vrot.slane %v1725_v24, 4  ;;  %2499 = vrot.lane.b32.xlu0 %v3786_v56, %s4097_s21  ;;  %v2826_v20 = vsel %vm2816_vm7, %v2782_v38, %v5066_v51  ;;  %v1747_v45 = vrot.slane %v1745_v39, 5  ;;  %v220_v39 = vld [vmem:[%s4149_s19 + $0xa0] sm:$0xf] }
  0xf4   : > { %v1718_v33 = vor.u32 %v1717_v0, %v1714_v47  ;;  %v1731_v44 = vshll.u32 %v5192_v42, 16  ;;  %v1743_v15 = vrot.slane %v1742_v29, 4  ;;  %v1757_v26 = vrot.slane %v1755_v34, 5  ;;  %v238_v34 = vld [vmem:[%s4149_s19 + $0xa4] sm:$0x1] }
  0xf5   : > { %v5199_v25 = vpop.permute.xlu1 %2665  ;;  %v1723_v12 = vrot.slane %v1721_v7, 5  ;;  %v2861_v48 = vsel %vm2849_vm8, %v2828_v8, %v5102_v40  ;;  %v1752_v37 = vor.u32 %v1751_v46, %v1747_v45  ;;  %v533_v54 = vshrl.u32 %v217_v10, 16 }
  0xf6   : > { %v5208_v58 = vpop.permute.xlu0 %2663  ;;  %2597 = vrot.lane.b32.xlu1 %v3803_v30, %s4101_s6  ;;  %v1719_v35 = vrot.slane %v1718_v33, 4  ;;  %v1733_v51 = vrot.slane %v1731_v44, 5  ;;  %v1748_v59 = vsel %vm4223_vm5, %v1743_v15, %v1747_v45  ;;  %v536_v2 = vshll.u32 %v217_v10, 16 }
  0xf7   : > { %v1728_v55 = vor.u32 %v1727_v19, %v1723_v12  ;;  %v542_v60 = vshll.u32 %v5206_v50, 16  ;;  %2595 = vrot.lane.b32.xlu0 %v3802_v52, %s4101_s6  ;;  %v1753_v40 = vrot.slane %v1752_v37, 4  ;;  %v535_v5 = vrot.slane %v533_v54, 4 }
  0xf8   : > { %v1724_v23 = vsel %vm4223_vm5, %v1719_v35, %v1723_v12  ;;  %v546_v49 = vshrl.u32 %v5206_v50, 16  ;;  %v538_v38 = vrot.slane %v536_v2, 5  ;;  %v552_v62 = vshll.u32 %v5214_v31, 16  ;;  %v641_v2 = vld [vmem:[%s4149_s19 + $0x9c] sm:$0xe] }
  0xf9   : > { %v1729_v16 = vrot.slane %v1728_v55, 4  ;;  %v544_v13 = vrot.slane %v542_v60, 5  ;;  %v1758_v28 = vsel %vm4223_vm5, %v1753_v40, %v1757_v26  ;;  %v2859_v43 = vsel %vm2849_vm8, %v2826_v20, %v5104_v6 }
  0xfa   : > { %v5224_v9 = vpop.permute.xlu0 %2743  ;;  %v548_v32 = vrot.slane %v546_v49, 4  ;;  %v3690_v56 = vrot.slane %v3674_v4, 9  ;;  %v3819_v1 = vcombine.low %v1748_v59, %v1758_v28  ;;  %v539_v36 = vor.u32 %v538_v38, %v535_v5  ;;  %v640_v5 = vld [vmem:[%s4149_s19 + $0x90] sm:$0xe] }
  0xfb   : > { %v5227_v18 = vpop.permute.xlu1 %2155  ;;  %v1734_v24 = vsel %vm4223_vm5, %v1729_v16, %v1733_v51  ;;  %v554_v30 = vrot.slane %v552_v62, 5  ;;  %v1991_v47 = vrot.slane %v5165_v11, 5  ;;  %v1994_v0 = vrot.slane %v5192_v42, 5 }
  0xfc   : > { %v3818_v52 = vcombine.low %v1724_v23, %v1734_v24  ;;  %v549_v8 = vor.u32 %v548_v32, %v544_v13  ;;  %2677 = vrot.lane.b32.xlu1 %v3819_v1, %s4102_s7  ;;  %v540_v6 = vrot.slane %v539_v36, 4  ;;  %v784_v46 = vrot.slane %v5214_v31, 5 }
  0xfd   : > { %v2894_v29 = vsel %vm2882_vm9, %v2861_v48, %v5118_v41  ;;  %v557_v7 = vshrl.u32 %v219_v14, 16  ;;  %v1992_v11 = vsel %vm4173_vm2, %v3690_v56, %v1991_v47  ;;  %v1993_v10 = vrot.slane %v1991_v47, 4  ;;  %v3675_v41 = vld [vmem:[%s4149_s19 + $0x9c] sm:$0xe] }
  0xfe   : > { %2675 = vrot.lane.b32.xlu0 %v3818_v52, %s4102_s7  ;;  %v550_v19 = vrot.slane %v549_v8, 4  ;;  %v560_v42 = vshll.u32 %v219_v14, 16  ;;  %v545_v45 = vsel %vm4223_vm5, %v540_v6, %v544_v13  ;;  %v566_v44 = vshll.u32 %v220_v39, 16  ;;  %v5280_v52 = vld [vmem:[%s4149_s19 + $0xa8] sm:$0xf] }
  0xff   : > { %v559_v33 = vrot.slane %v557_v7, 4  ;;  %v570_v15 = vshrl.u32 %v220_v39, 16  ;;  %v1995_v48 = vsel %vm4173_vm2, %v1993_v10, %v1994_v0  ;;  %v576_v35 = vshll.u32 %v238_v34, 16  ;;  %v5291_v6 = vld [vmem:[%s4149_s19 + $0xac] sm:$0xf] }
 0x100   : > { %v5247_v20 = vpop.permute.xlu0 %2745  ;;  %v555_v12 = vsel %vm4223_vm5, %v550_v19, %v554_v30  ;;  %v562_v37 = vrot.slane %v560_v42, 5  ;;  %v3834_v54 = vcombine.low %v1992_v11, %v1995_v48  ;;  %v568_v59 = vrot.slane %v566_v44, 5  ;;  %v5303_v10 = vld [vmem:[%s4149_s19 + $0xa0] sm:$0xf] }
 0x101   : > { %v5252_v26 = vpop.permute.xlu1 %2157  ;;  %v3724_v51 = vcombine.low %v545_v45, %v555_v12  ;;  %v572_v55 = vrot.slane %v570_v15, 4  ;;  %v2892_v60 = vsel %vm2882_vm9, %v2859_v43, %v5129_v63  ;;  %v578_v40 = vrot.slane %v576_v35, 5 }
 0x102   : > { %v563_v4 = vor.u32 %v562_v37, %v559_v33  ;;  %v3691_v23 = vrot.slane %v3675_v41, 9  ;;  %2755 = vrot.lane.b32.xlu0 %v3834_v54, %s4103_s16  ;;  %v791_v38 = vrot.slane %v238_v34, 5  ;;  %v1998_v13 = vrot.slane %v5152_v53, 5 }
 0x103   : > { %2167 = vrot.lane.b32.xlu1 %v3724_v51, %s4099_s27  ;;  %v573_v16 = vor.u32 %v572_v55, %v568_v59  ;;  %v2001_v62 = vrot.slane %v5182_v57, 5  ;;  %v2927_v43 = vsel %vm2915_vm10, %v2894_v29, %v5141_v27  ;;  %v3533_v32 = vrot.slane %v641_v2, 9  ;;  %v5318_v51 = vld [vmem:[%s4149_s19 + $0xb0] sm:$0x1] }
 0x104   : > { %v5262_v49 = vpop.permute.xlu0 %2235  ;;  %v564_v63 = vrot.slane %v563_v4, 4  ;;  %v788_v56 = vrot.slane %v220_v39, 5  ;;  %v1999_v1 = vsel %vm4173_vm2, %v3691_v23, %v1998_v13  ;;  %v2000_v24 = vrot.slane %v1998_v13, 4  ;;  %v5325_v4 = vld [vmem:[%s4149_s19 + $0xa4] sm:$0x1] }
 0x105   : > { %v5268_v28 = vpop.permute.xlu1 %2237  ;;  %v574_v14 = vrot.slane %v573_v16, 4  ;;  %v3532_v36 = vrot.slane %v640_v5, 9  ;;  %v2925_v57 = vsel %vm2915_vm10, %v2892_v60, %v5154_v61  ;;  %v781_v27 = vrot.slane %v5206_v50, 5  ;;  %v3560_v61 = vld [vmem:[%s4149_s19 + $0x9c] sm:$0xf] }
 0x106   : > { %v569_v53 = vsel %vm4223_vm5, %v564_v63, %v568_v59  ;;  %v790_v30 = vrot.slane %v788_v56, 4  ;;  %v2002_v47 = vsel %vm4173_vm2, %v2000_v24, %v2001_v62  ;;  %v789_v0 = vsel %vm4173_vm2, %v3533_v32, %v788_v56  ;;  %v3597_v56 = vld [vmem:[%s4149_s19 + $0xa8] sm:$0xe] }
 0x107   : > { %v579_v8 = vsel %vm4223_vm5, %v574_v14, %v578_v40  ;;  %v2960_v39 = vsel %vm2948_vm11, %v2927_v43, %v5172_v22  ;;  %v3835_v7 = vcombine.low %v1999_v1, %v2002_v47  ;;  %v2958_v11 = vsel %vm2948_vm11, %v2925_v57, %v5184_v3  ;;  %v3596_v57 = vld [vmem:[%s4149_s19 + $0x9c] sm:$0xe] }
 0x108   : > { %v5296_v50 = vpop.permute.xlu0 %2331  ;;  %v3725_v34 = vcombine.low %v569_v53, %v579_v8  ;;  %v792_v19 = vsel %vm4173_vm2, %v790_v30, %v791_v38  ;;  %v782_v22 = vsel %vm4173_vm2, %v3532_v36, %v781_v27  ;;  %v783_v42 = vrot.slane %v781_v27, 4  ;;  %v4057_v8 = vld [vmem:[%s4149_s19 + $0x4c] sm:$0xf] }
 0x109   : > { %v5294_v29 = vpop.permute.xlu1 %2333  ;;  %v1172_v45 = vshrl.u32 %v5280_v52, 16  ;;  %v1175_v33 = vshll.u32 %v5280_v52, 16  ;;  %2757 = vrot.lane.b32.xlu0 %v3835_v7, %s4103_s16  ;;  %v3741_v44 = vcombine.low %v789_v0, %v792_v19  ;;  %v1185_v15 = vshrl.u32 %v5291_v6, 16 }
 0x10a   : > { %2169 = vrot.lane.b32.xlu1 %v3725_v34, %s4099_s27  ;;  %v1148_v3 = vshrl.u32 %v3560_v61, 16  ;;  %v1151_v41 = vshll.u32 %v3560_v61, 16  ;;  %v785_v12 = vsel %vm4173_vm2, %v783_v42, %v784_v46  ;;  %v1161_v35 = vshrl.u32 %v5303_v10, 16 }
 0x10b   : > { %v1174_v48 = vrot.slane %v1172_v45, 4  ;;  %v1177_v37 = vrot.slane %v1175_v33, 5  ;;  %v3740_v59 = vcombine.low %v782_v22, %v785_v12  ;;  %v3757_v55 = vcombine.low %v5280_v52, %v5291_v6  ;;  %v4056_v52 = vld [vmem:[%s4149_s19 + $0x48] sm:$0xf] }
 0x10c   : > { %v1150_v2 = vrot.slane %v1148_v3, 4  ;;  %v1153_v60 = vrot.slane %v1151_v41, 5  ;;  %v3756_v31 = vcombine.low %v3560_v61, %v5303_v10  ;;  %v2993_v46 = vsel %vm2981_vm12, %v2960_v39, %v5199_v25  ;;  %v3642_v41 = vld [vmem:[%s4149_s19 + $0xb4] sm:$0xf] }
 0x10d   : > { %v5320_v54 = vpop.permute.xlu1 %2413  ;;  %v1178_v40 = vor.u32 %v1177_v37, %v1174_v48  ;;  %v1181_v23 = vshll.u32 %v5291_v6, 16  ;;  %2247 = vrot.lane.b32.xlu0 %v3740_v59, %s4098_s22  ;;  %v1187_v16 = vrot.slane %v1185_v15, 4  ;;  %v1191_v38 = vshll.u32 %v5318_v51, 16  ;;  %v4059_v15 = vld [vmem:[%s4149_s19 + $0x58] sm:$0xf] }
 0x10e   : > { %2249 = vrot.lane.b32.xlu1 %v3741_v44, %s4098_s22  ;;  %v1154_v13 = vor.u32 %v1153_v60, %v1150_v2  ;;  %v1157_v62 = vshll.u32 %v5303_v10, 16  ;;  %v1163_v43 = vrot.slane %v1161_v35, 4  ;;  %v1167_v32 = vshll.u32 %v5325_v4, 16  ;;  %v4058_v44 = vld [vmem:[%s4149_s19 + $0x54] sm:$0xf] }
 0x10f   : > { %v5331_v5 = vpop.permute.xlu0 %2411  ;;  %v1179_v63 = vrot.slane %v1178_v40, 4  ;;  %v1183_v25 = vrot.slane %v1181_v23, 5  ;;  %v2991_v1 = vsel %vm2981_vm12, %v2958_v11, %v5208_v58  ;;  %v1193_v24 = vrot.slane %v1191_v38, 5  ;;  %v5371_v35 = vld [vmem:[%s4149_s19 + $0xb8] sm:$0xf] }
 0x110   : > { %v1155_v36 = vrot.slane %v1154_v13, 4  ;;  %v1159_v53 = vrot.slane %v1157_v62, 5  ;;  %v3702_v47 = vcombine.low %v4056_v52, %v4057_v8  ;;  %v3024_v0 = vsel %vm3014_vm13, %v2991_v1, %v5224_v9  ;;  %v5388_v23 = vld [vmem:[%s4149_s19 + $0xac] sm:$0xf] }
 0x111   : > { %v5339_v14 = vpop.permute.xlu1 %2493  ;;  %v1184_v30 = vsel %vm4223_vm5, %v1179_v63, %v1183_v25  ;;  %v1188_v27 = vor.u32 %v1187_v16, %v1183_v25  ;;  %2343 = vrot.lane.b32.xlu0 %v3756_v31, %s4096_s20  ;;  %v1169_v34 = vrot.slane %v1167_v32, 5  ;;  %v3613_v7 = vrot.slane %v3597_v56, 9  ;;  %3914 = vmatprep.mubr.msk.bf16.mxu0 %vm3047_vm14, %v3024_v0  ;;  %v5398_v32 = vld [vmem:[%s4149_s19 + $0xbc] sm:$0x1] }
 0x112   : > { %2345 = vrot.lane.b32.xlu1 %v3757_v55, %s4096_s20  ;;  %v1160_v58 = vsel %vm4223_vm5, %v1155_v36, %v1159_v53  ;;  %v1164_v61 = vor.u32 %v1163_v43, %v1159_v53  ;;  %v1400_v11 = vrot.slane %v5291_v6, 5  ;;  %v1403_v9 = vrot.slane %v5318_v51, 5  ;;  %v5403_v53 = vld [vmem:[%s4149_s19 + $0xb0] sm:$0x1] }
 0x113   : > { %v5350_v39 = vpop.permute.xlu0 %2491  ;;  %v1189_v19 = vrot.slane %v1188_v27, 4  ;;  %v3612_v22 = vrot.slane %v3596_v57, 9  ;;  %v1393_v45 = vrot.slane %v5303_v10, 5  ;;  %v1396_v33 = vrot.slane %v5325_v4, 5  ;;  %v3640_v4 = vld [vmem:[%s4149_s19 + $0xa8] sm:$0xf] }
 0x114   : > { %v1165_v42 = vrot.slane %v1164_v61, 4  ;;  %v3703_v3 = vcombine.low %v4058_v44, %v4059_v15  ;;  %v1401_v6 = vsel %vm4173_vm2, %v3613_v7, %v1400_v11  ;;  %v1402_v48 = vrot.slane %v1400_v11, 4  ;;  %v5419_v11 = vld [vmem:[%s4149_s19 + $0xa8] sm:$0xf] }
 0x115   : > { %v1194_v12 = vsel %vm4223_vm5, %v1189_v19, %v1193_v24  ;;  %v3026_v37 = vsel %vm3014_vm13, %v2993_v46, %v5247_v20  ;;  %v5373_v10 = vpop.permute.xlu1 %2589  ;;  %v1394_v2 = vsel %vm4173_vm2, %v3612_v22, %v1393_v45  ;;  %v1395_v60 = vrot.slane %v1393_v45, 4 }
 0x116   : > { %v3773_v59 = vcombine.low %v1184_v30, %v1194_v12  ;;  %v1170_v55 = vsel %vm4223_vm5, %v1165_v42, %v1169_v34  ;;  %3915 = vmatmul.mubr.msk.bf16.gmra.mrb[8].mxu0 %vm3047_vm14, %v3026_v37  ;;  %v2788_v20 = vsel %vm2767_vm6, %v3702_v47, %v5227_v18  ;;  %v1404_v46 = vsel %vm4173_vm2, %v1402_v48, %v1403_v9  ;;  %v5429_v12 = vld [vmem:[%s4149_s19 + $0xb0] sm:$0x1] }
 0x117   : > { %v5375_v51 = vpop.permute.xlu0 %2587  ;;  %v3772_v31 = vcombine.low %v1160_v58, %v1170_v55  ;;  %v1784_v40 = vshrl.u32 %v3642_v41, 16  ;;  %v3789_v16 = vcombine.low %v1401_v6, %v1404_v46  ;;  %v1397_v38 = vsel %vm4173_vm2, %v1395_v60, %v1396_v33  ;;  %v5424_v33 = vld [vmem:[%s4149_s19 + $0xac] sm:$0xf] }
 0x118   : > { %2425 = vrot.lane.b32.xlu1 %v3773_v59, %s4100_s30  ;;  %v1787_v13 = vshll.u32 %v3642_v41, 16  ;;  %v1797_v62 = vshrl.u32 %v5371_v35, 16  ;;  %v3788_v63 = vcombine.low %v1394_v2, %v1397_v38  ;;  %v2791_v18 = vsel %vm2767_vm6, %v3703_v3, %v5252_v26 }
 0x119   : > { %2423 = vrot.lane.b32.xlu0 %v3772_v31, %s4100_s30  ;;  %v1786_v25 = vrot.slane %v1784_v40, 4  ;;  %v1760_v43 = vshrl.u32 %v3640_v4, 16  ;;  %v3805_v1 = vcombine.low %v3642_v41, %v5371_v35  ;;  %v1763_v24 = vshll.u32 %v3640_v4, 16 }
 0x11a   : > { %v1789_v56 = vrot.slane %v1787_v13, 5  ;;  %v1773_v36 = vshrl.u32 %v5388_v23, 16  ;;  %v3804_v27 = vcombine.low %v3640_v4, %v5388_v23  ;;  %v2832_v26 = vsel %vm2816_vm7, %v2791_v18, %v5268_v28  ;;  %v5411_v8 = vpop.permute.xlu1 %2669  ;;  %v3676_v4 = vld [vmem:[%s4149_s19 + $0xa8] sm:$0xe] }
 0x11b   : > { %v5405_v57 = vpop.permute.xlu0 %2667  ;;  %v1762_v30 = vrot.slane %v1760_v43, 4  ;;  %v1793_v52 = vshll.u32 %v5371_v35, 16  ;;  %v1765_v47 = vrot.slane %v1763_v24, 5  ;;  %v1799_v58 = vrot.slane %v1797_v62, 4 }
 0x11c   : > { %2505 = vrot.lane.b32.xlu1 %v3789_v16, %s4097_s21  ;;  %v1790_v0 = vor.u32 %v1789_v56, %v1786_v25  ;;  %v1803_v61 = vshll.u32 %v5398_v32, 16  ;;  %v1769_v7 = vshll.u32 %v5388_v23, 16  ;;  %v1775_v19 = vrot.slane %v1773_v36, 4 }
 0x11d   : > { %2503 = vrot.lane.b32.xlu0 %v3788_v63, %s4097_s21  ;;  %v1795_v34 = vrot.slane %v1793_v52, 5  ;;  %v1779_v28 = vshll.u32 %v5403_v53, 16  ;;  %v2830_v9 = vsel %vm2816_vm7, %v2788_v20, %v5262_v49  ;;  %v1766_v45 = vor.u32 %v1765_v47, %v1762_v30 }
 0x11e   : > { %v1791_v22 = vrot.slane %v1790_v0, 4  ;;  %v1805_v42 = vrot.slane %v1803_v61, 5  ;;  %v1771_v15 = vrot.slane %v1769_v7, 5  ;;  %v2865_v41 = vsel %vm2849_vm8, %v2832_v26, %v5294_v29  ;;  %v5457_v26 = vld [vmem:[%s4149_s19 + $0xb8] sm:$0xf] }
 0x11f   : > { %v1800_v44 = vor.u32 %v1799_v58, %v1795_v34  ;;  %v1781_v3 = vrot.slane %v1779_v28, 5  ;;  %v1767_v49 = vrot.slane %v1766_v45, 4  ;;  %v581_v48 = vshrl.u32 %v5419_v11, 16  ;;  %v5465_v61 = vld [vmem:[%s4149_s19 + $0xbc] sm:$0x1] }
 0x120   : > { %2601 = vrot.lane.b32.xlu1 %v3805_v1, %s4101_s6  ;;  %v1796_v6 = vsel %vm4223_vm5, %v1791_v22, %v1795_v34  ;;  %v584_v37 = vshll.u32 %v5419_v11, 16  ;;  %v1776_v2 = vor.u32 %v1775_v19, %v1771_v15  ;;  %v590_v29 = vshll.u32 %v5424_v33, 16  ;;  %v5442_v31 = vpop.permute.xlu1 %2159  ;;  %v5450_v1 = vld [vmem:[%s4149_s19 + $0xb4] sm:$0xf] }
 0x121   : > { %v5436_v59 = vpop.permute.xlu0 %2747  ;;  %2599 = vrot.lane.b32.xlu0 %v3804_v27, %s4101_s6  ;;  %v1801_v55 = vrot.slane %v1800_v44, 4  ;;  %v594_v60 = vshrl.u32 %v5424_v33, 16  ;;  %v1772_v20 = vsel %vm4223_vm5, %v1767_v49, %v1771_v15  ;;  %v583_v46 = vrot.slane %v581_v48, 4 }
 0x122   : > { %v586_v40 = vrot.slane %v584_v37, 5  ;;  %v600_v16 = vshll.u32 %v5429_v12, 16  ;;  %v1777_v13 = vrot.slane %v1776_v2, 4  ;;  %v592_v62 = vrot.slane %v590_v29, 5  ;;  %v643_v37 = vld [vmem:[%s4149_s19 + $0xb4] sm:$0xe] }
 0x123   : > { %v1806_v38 = vsel %vm4223_vm5, %v1801_v55, %v1805_v42  ;;  %v596_v63 = vrot.slane %v594_v60, 4  ;;  %v3692_v56 = vrot.slane %v3676_v4, 9  ;;  %v2005_v30 = vrot.slane %v5388_v23, 5  ;;  %v3677_v42 = vld [vmem:[%s4149_s19 + $0xb4] sm:$0xe] }
 0x124   : > { %v3821_v18 = vcombine.low %v1796_v6, %v1806_v38  ;;  %v587_v25 = vor.u32 %v586_v40, %v583_v46  ;;  %v602_v43 = vrot.slane %v600_v16, 5  ;;  %v1782_v24 = vsel %vm4223_vm5, %v1777_v13, %v1781_v3  ;;  %v642_v4 = vld [vmem:[%s4149_s19 + $0xa8] sm:$0xe] }
 0x125   : > { %v597_v36 = vor.u32 %v596_v63, %v592_v62  ;;  %v2008_v27 = vrot.slane %v5403_v53, 5  ;;  %v3820_v52 = vcombine.low %v1772_v20, %v1782_v24  ;;  %v2863_v47 = vsel %vm2849_vm8, %v2830_v9, %v5296_v50 }
 0x126   : > { %2681 = vrot.lane.b32.xlu1 %v3821_v18, %s4102_s7  ;;  %v588_v0 = vrot.slane %v587_v25, 4  ;;  %v2898_v58 = vsel %vm2882_vm9, %v2865_v41, %v5320_v54  ;;  %v5467_v34 = vpop.permute.xlu0 %2749  ;;  %v2006_v53 = vsel %vm4173_vm2, %v3692_v56, %v2005_v30  ;;  %v2007_v7 = vrot.slane %v2005_v30, 4  ;;  %v5509_v30 = vld [vmem:[%s4149_s19 + $0xc0] sm:$0xf] }
 0x127   : > { %v598_v23 = vrot.slane %v597_v36, 4  ;;  %v605_v19 = vshrl.u32 %v5450_v1, 16  ;;  %2679 = vrot.lane.b32.xlu0 %v3820_v52, %s4102_s7  ;;  %v608_v54 = vshll.u32 %v5450_v1, 16  ;;  %v614_v9 = vshll.u32 %v5457_v26, 16 }
 0x128   : > { %v593_v50 = vsel %vm4223_vm5, %v588_v0, %v592_v62  ;;  %v618_v22 = vshrl.u32 %v5457_v26, 16  ;;  %v2009_v44 = vsel %vm4173_vm2, %v2007_v7, %v2008_v27  ;;  %v624_v3 = vshll.u32 %v5465_v61, 16  ;;  %v3564_v7 = vld [vmem:[%s4149_s19 + $0xb4] sm:$0xf] }
 0x129   : > { %v5472_v28 = vpop.permute.xlu1 %2161  ;;  %v603_v45 = vsel %vm4223_vm5, %v598_v23, %v602_v43  ;;  %v607_v15 = vrot.slane %v605_v19, 4  ;;  %v3836_v6 = vcombine.low %v2006_v53, %v2009_v44  ;;  %v610_v49 = vrot.slane %v608_v54, 5 }
 0x12a   : > { %v3726_v41 = vcombine.low %v593_v50, %v603_v45  ;;  %v616_v48 = vrot.slane %v614_v9, 5  ;;  %v2896_v55 = vsel %vm2882_vm9, %v2863_v47, %v5331_v5  ;;  %v620_v2 = vrot.slane %v618_v22, 4  ;;  %v5534_v22 = vld [vmem:[%s4149_s19 + $0xb8] sm:$0xf] }
 0x12b   : > { %v3693_v29 = vrot.slane %v3677_v42, 9  ;;  %v2012_v60 = vrot.slane %v5371_v35, 5  ;;  %2759 = vrot.lane.b32.xlu0 %v3836_v6, %s4103_s16  ;;  %v611_v46 = vor.u32 %v610_v49, %v607_v15  ;;  %v626_v40 = vrot.slane %v624_v3, 5  ;;  %v5498_v5 = vpop.permute.xlu0 %2239 }
 0x12c   : > { %2171 = vrot.lane.b32.xlu1 %v3726_v41, %s4099_s27  ;;  %v2015_v16 = vrot.slane %v5398_v32, 5  ;;  %v2931_v38 = vsel %vm2915_vm10, %v2898_v58, %v5339_v14  ;;  %v621_v13 = vor.u32 %v620_v2, %v616_v48  ;;  %v3535_v63 = vrot.slane %v643_v37, 9  ;;  %v5516_v58 = vld [vmem:[%s4149_s19 + $0xc4] sm:$0xf] }
 0x12d   : > { %v5491_v20 = vpop.permute.xlu1 %2241  ;;  %v2013_v35 = vsel %vm4173_vm2, %v3693_v29, %v2012_v60  ;;  %v2014_v62 = vrot.slane %v2012_v60, 4  ;;  %v612_v18 = vrot.slane %v611_v46, 4  ;;  %v802_v25 = vrot.slane %v5457_v26, 5 }
 0x12e   : > { %v805_v43 = vrot.slane %v5465_v61, 5  ;;  %v3534_v56 = vrot.slane %v642_v4, 9  ;;  %v622_v32 = vrot.slane %v621_v13, 4  ;;  %v795_v24 = vrot.slane %v5424_v33, 5 }
 0x12f   : > { %v2016_v14 = vsel %vm4173_vm2, %v2014_v62, %v2015_v16  ;;  %v798_v36 = vrot.slane %v5429_v12, 5  ;;  %v617_v27 = vsel %vm4223_vm5, %v612_v18, %v616_v48  ;;  %v2929_v47 = vsel %vm2915_vm10, %v2896_v55, %v5350_v39  ;;  %v5536_v42 = vpop.permute.xlu0 %2335  ;;  %v5546_v48 = vld [vmem:[%s4149_s19 + $0xc8] sm:$0x1] }
 0x130   : > { %v3837_v52 = vcombine.low %v2013_v35, %v2016_v14  ;;  %v804_v0 = vrot.slane %v802_v25, 4  ;;  %v627_v61 = vsel %vm4223_vm5, %v622_v32, %v626_v40  ;;  %v803_v23 = vsel %vm4173_vm2, %v3535_v63, %v802_v25 }
 0x131   : > { %v796_v12 = vsel %vm4173_vm2, %v3534_v56, %v795_v24  ;;  %v797_v53 = vrot.slane %v795_v24, 4  ;;  %v5525_v19 = vpop.permute.xlu1 %2337  ;;  %v3727_v50 = vcombine.low %v617_v27, %v627_v61  ;;  %v2964_v54 = vsel %vm2948_vm11, %v2931_v38, %v5373_v10 }
 0x132   : > { %2761 = vrot.lane.b32.xlu0 %v3837_v52, %s4103_s16  ;;  %v806_v39 = vsel %vm4173_vm2, %v804_v0, %v805_v43  ;;  %v1220_v9 = vshrl.u32 %v5509_v30, 16  ;;  %v2962_v44 = vsel %vm2948_vm11, %v2929_v47, %v5375_v51  ;;  %v1223_v15 = vshll.u32 %v5509_v30, 16  ;;  %v5552_v51 = vld [vmem:[%s4149_s19 + $0xbc] sm:$0x1]  ;;  %v3599_v43 = vld [vmem:[%s4149_s19 + $0xc0] sm:$0xe] }
 0x133   : > { %v799_v45 = vsel %vm4173_vm2, %v797_v53, %v798_v36  ;;  %v1233_v3 = vshrl.u32 %v5516_v58, 16  ;;  %2173 = vrot.lane.b32.xlu1 %v3727_v50, %s4099_s27  ;;  %v3743_v10 = vcombine.low %v803_v23, %v806_v39  ;;  %v1196_v49 = vshrl.u32 %v3564_v7, 16  ;;  %v4060_v52 = vld [vmem:[%s4149_s19 + $0x60] sm:$0xf]  ;;  %v4061_v47 = vld [vmem:[%s4149_s19 + $0x64] sm:$0xf] }
 0x134   : > { %v3742_v41 = vcombine.low %v796_v12, %v799_v45  ;;  %v1222_v6 = vrot.slane %v1220_v9, 4  ;;  %v1225_v37 = vrot.slane %v1223_v15, 5  ;;  %v3759_v55 = vcombine.low %v5509_v30, %v5516_v58  ;;  %v3598_v23 = vld [vmem:[%s4149_s19 + $0xb4] sm:$0xe] }
 0x135   : > { %v1199_v2 = vshll.u32 %v3564_v7, 16  ;;  %v1209_v29 = vshrl.u32 %v5534_v22, 16  ;;  %v1198_v60 = vrot.slane %v1196_v49, 4  ;;  %v3758_v4 = vcombine.low %v3564_v7, %v5534_v22 }
 0x136   : > { %2251 = vrot.lane.b32.xlu0 %v3742_v41, %s4098_s22  ;;  %v2997_v46 = vsel %vm2981_vm12, %v2964_v54, %v5411_v8  ;;  %v1229_v40 = vshll.u32 %v5516_v58, 16  ;;  %v1226_v38 = vor.u32 %v1225_v37, %v1222_v6  ;;  %v1235_v13 = vrot.slane %v1233_v3, 4  ;;  %v5591_v41 = vld [vmem:[%s4149_s19 + $0xcc] sm:$0xf] }
 0x137   : > { %v1201_v16 = vrot.slane %v1199_v2, 5  ;;  %v1239_v35 = vshll.u32 %v5546_v48, 16  ;;  %v5560_v62 = vpop.permute.xlu1 %2417  ;;  %2253 = vrot.lane.b32.xlu1 %v3743_v10, %s4098_s22  ;;  %v1205_v18 = vshll.u32 %v5534_v22, 16  ;;  %v1211_v25 = vrot.slane %v1209_v29, 4  ;;  %v4063_v29 = vld [vmem:[%s4149_s19 + $0x70] sm:$0xf] }
 0x138   : > { %v1231_v63 = vrot.slane %v1229_v40, 5  ;;  %v1215_v8 = vshll.u32 %v5552_v51, 16  ;;  %v5566_v56 = vpop.permute.xlu0 %2415  ;;  %v2995_v32 = vsel %vm2981_vm12, %v2962_v44, %v5405_v57  ;;  %v1227_v14 = vrot.slane %v1226_v38, 4 }
 0x139   : > { %v1241_v24 = vrot.slane %v1239_v35, 5  ;;  %v1202_v36 = vor.u32 %v1201_v16, %v1198_v60  ;;  %v1207_v27 = vrot.slane %v1205_v18, 5  ;;  %v3704_v0 = vcombine.low %v4060_v52, %v4061_v47  ;;  %v5602_v60 = vld [vmem:[%s4149_s19 + $0xd0] sm:$0xf]  ;;  %v5613_v35 = vld [vmem:[%s4149_s19 + $0xc4] sm:$0xf] }
 0x13a   : > { %2347 = vrot.lane.b32.xlu0 %v3758_v4, %s4096_s20  ;;  %v1236_v30 = vor.u32 %v1235_v13, %v1231_v63  ;;  %v3028_v61 = vsel %vm3014_vm13, %v2995_v32, %v5436_v59  ;;  %v1232_v12 = vsel %vm4223_vm5, %v1227_v14, %v1231_v63  ;;  %v1217_v57 = vrot.slane %v1215_v8, 5  ;;  %v3644_v13 = vld [vmem:[%s4149_s19 + $0xc0] sm:$0xf]  ;;  %v3663_v52 = vld [vmem:[%s4149_s19 + $0xd4] sm:$0x1] }
 0x13b   : > { %v1203_v53 = vrot.slane %v1202_v36, 4  ;;  %v3615_v7 = vrot.slane %v3599_v43, 9  ;;  %3918 = vmatprep.mubr.msk.bf16.mxu0 %vm3047_vm14, %v3028_v61  ;;  %v5579_v50 = vpop.permute.xlu1 %2497  ;;  %2349 = vrot.lane.b32.xlu1 %v3759_v55, %s4096_s20  ;;  %v1212_v54 = vor.u32 %v1211_v25, %v1207_v27  ;;  %v1414_v9 = vrot.slane %v5516_v58, 5 }
 0x13c   : > { %v1237_v39 = vrot.slane %v1236_v30, 4  ;;  %v1417_v59 = vrot.slane %v5546_v48, 5  ;;  %v5584_v45 = vpop.permute.xlu0 %2495  ;;  %v3614_v15 = vrot.slane %v3598_v23, 9  ;;  %v1407_v3 = vrot.slane %v5534_v22, 5  ;;  %v4062_v22 = vld [vmem:[%s4149_s19 + $0x6c] sm:$0xf] }
 0x13d   : > { %v1208_v44 = vsel %vm4223_vm5, %v1203_v53, %v1207_v27  ;;  %v1410_v10 = vrot.slane %v5552_v51, 5  ;;  %v1213_v6 = vrot.slane %v1212_v54, 4  ;;  %v1415_v49 = vsel %vm4173_vm2, %v3615_v7, %v1414_v9  ;;  %v3662_v23 = vld [vmem:[%s4149_s19 + $0xc8] sm:$0x1] }
 0x13e   : > { %v1242_v58 = vsel %vm4223_vm5, %v1237_v39, %v1241_v24  ;;  %v1416_v48 = vrot.slane %v1414_v9, 4  ;;  %v1408_v55 = vsel %vm4173_vm2, %v3614_v15, %v1407_v3  ;;  %v1409_v2 = vrot.slane %v1407_v3, 4 }
 0x13f   : > { %v3775_v37 = vcombine.low %v1232_v12, %v1242_v58  ;;  %v3705_v51 = vcombine.low %v4062_v22, %v4063_v29  ;;  %v1218_v4 = vsel %vm4223_vm5, %v1213_v6, %v1217_v57  ;;  %v3030_v16 = vsel %vm3014_vm13, %v2997_v46, %v5467_v34  ;;  %v5620_v43 = vpop.permute.xlu1 %2593 }
 0x140   : > { %v1418_v40 = vsel %vm4173_vm2, %v1416_v48, %v1417_v59  ;;  %v1832_v38 = vshrl.u32 %v5591_v41, 16  ;;  %v3774_v63 = vcombine.low %v1208_v44, %v1218_v4  ;;  %v2794_v18 = vsel %vm2767_vm6, %v3704_v0, %v5442_v31  ;;  %v5622_v32 = vpop.permute.xlu0 %2591  ;;  %3919 = vmatmul.mubr.msk.bf16.gmra.mrb[12].mxu0 %vm3047_vm14, %v3030_v16  ;;  %v3679_v44 = vld [vmem:[%s4149_s19 + $0xcc] sm:$0xe] }
 0x141   : > { %2429 = vrot.lane.b32.xlu1 %v3775_v37, %s4100_s30  ;;  %v3791_v25 = vcombine.low %v1415_v49, %v1418_v40  ;;  %v1411_v8 = vsel %vm4173_vm2, %v1409_v2, %v1410_v10  ;;  %v2797_v34 = vsel %vm2767_vm6, %v3705_v51, %v5472_v28  ;;  %v1835_v14 = vshll.u32 %v5591_v41, 16 }
 0x142   : > { %v1834_v46 = vrot.slane %v1832_v38, 4  ;;  %v1845_v24 = vshrl.u32 %v5602_v60, 16  ;;  %2427 = vrot.lane.b32.xlu0 %v3774_v63, %s4100_s30  ;;  %v3790_v31 = vcombine.low %v1408_v55, %v1411_v8  ;;  %v1808_v36 = vshrl.u32 %v3644_v13, 16  ;;  %v3678_v55 = vld [vmem:[%s4149_s19 + $0xc0] sm:$0xe] }
 0x143   : > { %v1811_v30 = vshll.u32 %v3644_v13, 16  ;;  %v1821_v27 = vshrl.u32 %v5613_v35, 16  ;;  %v1837_v47 = vrot.slane %v1835_v14, 5  ;;  %v3807_v28 = vcombine.low %v5591_v41, %v5602_v60 }
 0x144   : > { %v3806_v0 = vcombine.low %v3644_v13, %v5613_v35  ;;  %v2836_v61 = vsel %vm2816_vm7, %v2797_v34, %v5491_v20  ;;  %v1810_v12 = vrot.slane %v1808_v36, 4  ;;  %v1841_v57 = vshll.u32 %v5602_v60, 16 }
 0x145   : > { %2509 = vrot.lane.b32.xlu1 %v3791_v25, %s4097_s21  ;;  %v1813_v53 = vrot.slane %v1811_v30, 5  ;;  %v1847_v7 = vrot.slane %v1845_v24, 4  ;;  %v1838_v39 = vor.u32 %v1837_v47, %v1834_v46  ;;  %v1851_v54 = vshll.u32 %v3663_v52, 16  ;;  %v2674_v41 = vpop.permute.xlu1 %2673 }
 0x146   : > { %v1817_v9 = vshll.u32 %v5613_v35, 16  ;;  %v1823_v59 = vrot.slane %v1821_v27, 4  ;;  %2507 = vrot.lane.b32.xlu0 %v3790_v31, %s4097_s21  ;;  %v2834_v20 = vsel %vm2816_vm7, %v2794_v18, %v5498_v5  ;;  %v1843_v15 = vrot.slane %v1841_v57, 5  ;;  %v2672_v58 = vpop.permute.xlu0 %2671  ;;  %s5768_s21 = scalar_lea.vmem %s5793_s2, %s5804_s12 }
 0x147   : > { %v1814_v3 = vor.u32 %v1813_v53, %v1810_v12  ;;  %v1827_v10 = vshll.u32 %v3662_v23, 16  ;;  %v1839_v6 = vrot.slane %v1838_v39, 4  ;;  %v1853_v49 = vrot.slane %v1851_v54, 5 }
 0x148   : > { %v1819_v48 = vrot.slane %v1817_v9, 5  ;;  %v2869_v37 = vsel %vm2849_vm8, %v2836_v61, %v5525_v19  ;;  %v1848_v2 = vor.u32 %v1847_v7, %v1843_v15  ;;  %v2867_v29 = vsel %vm2849_vm8, %v2834_v20, %v5536_v42 }
 0x149   : > { %2605 = vrot.lane.b32.xlu1 %v3807_v28, %s4101_s6  ;;  %v1815_v22 = vrot.slane %v1814_v3, 4  ;;  %v3695_v5 = vrot.slane %v3679_v44, 9  ;;  %v1829_v4 = vrot.slane %v1827_v10, 5  ;;  %v2026_v40 = vrot.slane %v5602_v60, 5 }
 0x14a   : > { %v1824_v51 = vor.u32 %v1823_v59, %v1819_v48  ;;  %v2029_v16 = vrot.slane %v3663_v52, 5  ;;  %2603 = vrot.lane.b32.xlu0 %v3806_v0, %s4101_s6  ;;  %v1844_v38 = vsel %vm4223_vm5, %v1839_v6, %v1843_v15  ;;  %v1849_v19 = vrot.slane %v1848_v2, 4  ;;  %v2752_v18 = vpop.permute.xlu0 %2751 }
 0x14b   : > { %v3694_v13 = vrot.slane %v3678_v55, 9  ;;  %v2019_v63 = vrot.slane %v5613_v35, 5  ;;  %v1820_v25 = vsel %vm4223_vm5, %v1815_v22, %v1819_v48  ;;  %v2028_v8 = vrot.slane %v2026_v40, 4  ;;  %v2164_v31 = vpop.permute.xlu1 %2163  ;;  %v4066_v22 = vld [vmem:[%s4149_s19 + $0x84] sm:$0xf] }
 0x14c   : > { %v1825_v42 = vrot.slane %v1824_v51, 4  ;;  %v2022_v34 = vrot.slane %v3662_v23, 5  ;;  %v1854_v60 = vsel %vm4223_vm5, %v1849_v19, %v1853_v49  ;;  %v2027_v46 = vsel %vm4173_vm2, %v3695_v5, %v2026_v40 }
 0x14d   : > { %v2020_v14 = vsel %vm4173_vm2, %v3694_v13, %v2019_v63  ;;  %v2021_v24 = vrot.slane %v2019_v63, 4  ;;  %v3823_v36 = vcombine.low %v1844_v38, %v1854_v60  ;;  %v2030_v30 = vsel %vm4173_vm2, %v2028_v8, %v2029_v16 }
 0x14e   : > { %v1830_v35 = vsel %vm4223_vm5, %v1825_v42, %v1829_v4  ;;  %v2902_v27 = vsel %vm2882_vm9, %v2869_v37, %v5560_v62  ;;  %v2900_v28 = vsel %vm2882_vm9, %v2867_v29, %v5566_v56  ;;  %v3839_v21 = vcombine.low %v2027_v46, %v2030_v30  ;;  %v4067_v29 = vld [vmem:[%s4149_s19 + $0x88] sm:$0xf] }
 0x14f   : > { %v3822_v52 = vcombine.low %v1820_v25, %v1830_v35  ;;  %v2023_v47 = vsel %vm4173_vm2, %v2021_v24, %v2022_v34  ;;  %v2935_v0 = vsel %vm2915_vm10, %v2902_v27, %v5579_v50  ;;  %2685 = vrot.lane.b32.xlu1 %v3823_v36, %s4102_s7  ;;  %v2933_v61 = vsel %vm2915_vm10, %v2900_v28, %v5584_v45 }
 0x150   : > { %v2968_v23 = vsel %vm2948_vm11, %v2935_v0, %v5620_v43  ;;  %v3838_v62 = vcombine.low %v2020_v14, %v2023_v47  ;;  %v2966_v17 = vsel %vm2948_vm11, %v2933_v61, %v5622_v32  ;;  %v3710_v45 = vcombine.low %v5419_v11, %v5424_v33  ;;  %v4069_v61 = vld [vmem:[%s4149_s19 + $0x94] sm:$0xf] }
 0x151   : > { %2683 = vrot.lane.b32.xlu0 %v3822_v52, %s4102_s7  ;;  %v3001_v56 = vsel %vm2981_vm12, %v2968_v23, %v2674_v41  ;;  %v2754_v12 = vpop.permute.xlu0 %2753  ;;  %v2999_v50 = vsel %vm2981_vm12, %v2966_v17, %v2672_v58  ;;  %v3711_v43 = vcombine.low %v5450_v1, %v5457_v26  ;;  %v4064_v41 = vld [vmem:[%s4149_s19 + $0x78] sm:$0xf]  ;;  %v4065_v58 = vld [vmem:[%s4149_s19 + $0x7c] sm:$0xf]  ;;  %v3707_v5 = vcombine.low %v4066_v22, %v4067_v29 }
 0x152   : > { %v3034_v53 = vsel %vm3014_vm13, %v3001_v56, %v2754_v12  ;;  %v3032_v57 = vsel %vm3014_vm13, %v2999_v50, %v2752_v18  ;;  %v2166_v7 = vpop.permute.xlu1 %2165  ;;  %v3706_v6 = vcombine.low %v4064_v41, %v4065_v58  ;;  %v4070_v12 = vld [vmem:[%s4149_s19 + $0x9c] sm:$0xf]  ;;  %v4071_v50 = vld [vmem:[%s4149_s19 + $0xa0] sm:$0xf] }
 0x153   : > { %2765 = vrot.lane.b32.xlu1 %v3839_v21, %s4103_s16  ;;  %3922 = vmatprep.mubr.msk.bf16.mxu1 %vm3047_vm14, %v3032_v57  ;;  %v2803_v19 = vsel %vm2767_vm6, %v3707_v5, %v2166_v7  ;;  %v4068_v21 = vld [vmem:[%s4149_s19 + $0x90] sm:$0xf] }
 0x154   : > { %3923 = vmatmul.mubr.msk.bf16.vlgmr.msra.gmra.mrb[0].mxu1 %vm3047_vm14, %v3034_v53  ;;  %v2800_v49 = vsel %vm2767_vm6, %v3706_v6, %v2164_v31  ;;  %v3708_v23 = vcombine.low %v4068_v21, %v4069_v61  ;;  %v3709_v53 = vcombine.low %v4070_v12, %v4071_v50 }
 0x155   : > { %2763 = vrot.lane.b32.xlu0 %v3838_v62, %s4103_s16  ;;  %v2244_v32 = vpop.permute.xlu0 %2243 }
 0x156   : > { %v2246_v39 = vpop.permute.xlu1 %2245  ;;  %v2838_v48 = vsel %vm2816_vm7, %v2800_v49, %v2244_v32 }
 0x157   : > { %v2840_v18 = vsel %vm2816_vm7, %v2803_v19, %v2246_v39 }
 0x159   : > { %v2340_v9 = vpop.permute.xlu0 %2339 }
 0x15a   : > { %v2342_v54 = vpop.permute.xlu1 %2341  ;;  %v2871_v2 = vsel %vm2849_vm8, %v2838_v48, %v2340_v9 }
 0x15b   : > { %v2873_v25 = vsel %vm2849_vm8, %v2840_v18, %v2342_v54 }
 0x160   : > { %v2422_v59 = vpop.permute.xlu1 %2421 }
 0x161   : > { %v2420_v44 = vpop.permute.xlu0 %2419  ;;  %v2906_v42 = vsel %vm2882_vm9, %v2873_v25, %v2422_v59 }
 0x162   : > { %v2904_v51 = vsel %vm2882_vm9, %v2871_v2, %v2420_v44 }
 0x164   : > { %v2502_v20 = vpop.permute.xlu1 %2501 }
 0x165   : > { %v2500_v15 = vpop.permute.xlu0 %2499  ;;  %v2939_v8 = vsel %vm2915_vm10, %v2906_v42, %v2502_v20 }
 0x166   : > { %v2937_v4 = vsel %vm2915_vm10, %v2904_v51, %v2500_v15 }
 0x168   : > { %v2598_v3 = vpop.permute.xlu1 %2597 }
 0x169   : > { %v2596_v10 = vpop.permute.xlu0 %2595  ;;  %v2972_v34 = vsel %vm2948_vm11, %v2939_v8, %v2598_v3 }
 0x16a   : > { %v2970_v40 = vsel %vm2948_vm11, %v2937_v4, %v2596_v10 }
 0x16e   : > { %v2678_v37 = vpop.permute.xlu1 %2677 }
 0x16f   : > { %v3005_v60 = vsel %vm2981_vm12, %v2972_v34, %v2678_v37 }
 0x170   : > { %v2676_v55 = vpop.permute.xlu0 %2675 }
 0x171   : > { %v3003_v16 = vsel %vm2981_vm12, %v2970_v40, %v2676_v55 }
 0x174   : > { %v2756_v38 = vpop.permute.xlu0 %2755 }
 0x175   : > { %v2168_v13 = vpop.permute.xlu1 %2167  ;;  %v3036_v63 = vsel %vm3014_vm13, %v3003_v16, %v2756_v38 }
 0x176   : > { %3926 = vmatprep.mubr.msk.bf16.mxu1 %vm3047_vm14, %v3036_v63  ;;  %v2806_v17 = vsel %vm2767_vm6, %v3708_v23, %v2168_v13 }
 0x17b   : > { %v2758_v14 = vpop.permute.xlu0 %2757 }
 0x17c   : > { %v2170_v46 = vpop.permute.xlu1 %2169  ;;  %v3038_v24 = vsel %vm3014_vm13, %v3005_v60, %v2758_v14 }
 0x17d   : > { %3927 = vmatmul.mubr.msk.bf16.gmra.mrb[4].mxu1 %vm3047_vm14, %v3038_v24  ;;  %v2809_v41 = vsel %vm2767_vm6, %v3709_v53, %v2170_v46 }
 0x17f   : > { %v2248_v36 = vpop.permute.xlu0 %2247 }
 0x180   : > { %v2250_v31 = vpop.permute.xlu1 %2249  ;;  %v2842_v57 = vsel %vm2816_vm7, %v2806_v17, %v2248_v36 }
 0x181   : > { %v2844_v2 = vsel %vm2816_vm7, %v2809_v41, %v2250_v31 }
 0x183   : > { %v2344_v30 = vpop.permute.xlu0 %2343 }
 0x184   : > { %v2346_v35 = vpop.permute.xlu1 %2345  ;;  %v2875_v39 = vsel %vm2849_vm8, %v2842_v57, %v2344_v30 }
 0x185   : > { %v2877_v29 = vsel %vm2849_vm8, %v2844_v2, %v2346_v35 }
 0x18a   : > { %v2426_v27 = vpop.permute.xlu1 %2425 }
 0x18b   : > { %v2424_v52 = vpop.permute.xlu0 %2423  ;;  %v2910_v16 = vsel %vm2882_vm9, %v2877_v29, %v2426_v27 }
 0x18c   : > { %v2908_v59 = vsel %vm2882_vm9, %v2875_v39, %v2424_v52 }
 0x18e   : > { %v2506_v47 = vpop.permute.xlu1 %2505 }
 0x18f   : > { %v2504_v28 = vpop.permute.xlu0 %2503  ;;  %v2943_v38 = vsel %vm2915_vm10, %v2910_v16, %v2506_v47 }
 0x190   : > { %v2941_v20 = vsel %vm2915_vm10, %v2908_v59, %v2504_v28 }
 0x192   : > { %v2602_v0 = vpop.permute.xlu1 %2601 }
 0x193   : > { %v2600_v62 = vpop.permute.xlu0 %2599  ;;  %v2976_v13 = vsel %vm2948_vm11, %v2943_v38, %v2602_v0 }
 0x194   : > { %v2974_v58 = vsel %vm2948_vm11, %v2941_v20, %v2600_v62 }
 0x197   : > { %v3908_v56 = vpop.f32.mrb[0].mxu0 }
 0x198   : > { %v2682_v7 = vpop.permute.xlu1 %2681  ;;  %v3179_v32 = vpop.f32.mrb[1].mxu0  ;;  %v3355_v48 = vmul.f32 %v3908_v56, %v3908_v56 }
 0x199   : > { %v2680_v54 = vpop.permute.xlu0 %2679  ;;  %v3909_v9 = vpop.f32.mrb[2].mxu0  ;;  %v3353_v15 = vmul.f32 %v3179_v32, %v3179_v32  ;;  %v3009_v63 = vsel %vm2981_vm12, %v2976_v13, %v2682_v7 }
 0x19a   : > { %v3182_v44 = vpop.f32.mrb[3].mxu0  ;;  %v3007_v6 = vsel %vm2981_vm12, %v2974_v58, %v2680_v54  ;;  %v3356_v51 = vmul.f32 %v3909_v9, %v3909_v9 }
 0x19b   : > { %v3313_v3 = vadd.f32 %v3182_v44, %v3179_v32  ;;  %v3354_v10 = vmul.f32 %v3182_v44, %v3182_v44 }
 0x19d   : > { %v2760_v49 = vpop.permute.xlu0 %2759  ;;  %v3314_v37 = vadd.f32 %v3908_v56, %v3313_v3  ;;  %v3385_v55 = vadd.f32 %v3354_v10, %v3353_v15 }
 0x19e   : > { %v3040_v22 = vsel %vm3014_vm13, %v3007_v6, %v2760_v49  ;;  %v2172_v5 = vpop.permute.xlu1 %2171 }
 0x19f   : > { %3930 = vmatprep.mubr.msk.bf16.mxu1 %vm3047_vm14, %v3040_v22  ;;  %v3386_v4 = vadd.f32 %v3385_v55, %v3355_v48  ;;  %v3315_v40 = vadd.f32 %v3909_v9, %v3314_v37  ;;  %v2812_v27 = vsel %vm2767_vm6, %v3710_v45, %v2172_v5 }
 0x1a1   : > { %v3387_v19 = vadd.f32 %v3386_v4, %v3356_v51 }
 0x1a4   : > { %v2762_v18 = vpop.permute.xlu0 %2761 }
 0x1a5   : > { %v3042_v25 = vsel %vm3014_vm13, %v3009_v63, %v2762_v18  ;;  %v2174_v42 = vpop.permute.xlu1 %2173 }
 0x1a6   : > { %3931 = vmatmul.mubr.msk.bf16.gmra.mrb[8].mxu1 %vm3047_vm14, %v3042_v25  ;;  %v2815_v52 = vsel %vm2767_vm6, %v3711_v43, %v2174_v42 }
 0x1a8   : > { %v2252_v8 = vpop.permute.xlu0 %2251 }
 0x1a9   : > { %v2254_v34 = vpop.permute.xlu1 %2253  ;;  %v2846_v28 = vsel %vm2816_vm7, %v2812_v27, %v2252_v8 }
 0x1aa   : > { %v2848_v47 = vsel %vm2816_vm7, %v2815_v52, %v2254_v34 }
 0x1ac   : > { %v2348_v46 = vpop.permute.xlu0 %2347 }
 0x1ad   : > { %v2350_v60 = vpop.permute.xlu1 %2349  ;;  %v2879_v21 = vsel %vm2849_vm8, %v2846_v28, %v2348_v46 }
 0x1ae   : > { %v2881_v0 = vsel %vm2849_vm8, %v2848_v47, %v2350_v60 }
 0x1b3   : > { %v2430_v14 = vpop.permute.xlu1 %2429 }
 0x1b4   : > { %v2428_v24 = vpop.permute.xlu0 %2427  ;;  %v2914_v62 = vsel %vm2882_vm9, %v2881_v0, %v2430_v14  ;;  %v4104_v0 = vmov 0.0  }
 0x1b5   : > { %v2912_v11 = vsel %vm2882_vm9, %v2879_v21, %v2428_v24  ;;  %3310 = vst [vmem:[%s5768_s21] sm:$0x1] %v4104_v0  ;;  %3311 = vst [vmem:[%s5774_s26] sm:$0x1] %v4104_v0 }
 0x1b7   : > { %v2510_v31 = vpop.permute.xlu1 %2509 }
 0x1b8   : > { %v2508_v36 = vpop.permute.xlu0 %2507  ;;  %v2947_v1 = vsel %vm2915_vm10, %v2914_v62, %v2510_v31 }
 0x1b9   : > { %v2945_v26 = vsel %vm2915_vm10, %v2912_v11, %v2508_v36 }
 0x1bb   : > { %v2606_v35 = vpop.permute.xlu1 %2605 }
 0x1bc   : > { %v2604_v30 = vpop.permute.xlu0 %2603  ;;  %v2980_v12 = vsel %vm2948_vm11, %v2947_v1, %v2606_v35 }
 0x1bd   : > { %v2978_v50 = vsel %vm2948_vm11, %v2945_v26, %v2604_v30 }
 0x1c0   : > { %v3912_v23 = vpop.f32.mrb[4].mxu0 }
 0x1c1   : > { %v2686_v61 = vpop.permute.xlu1 %2685  ;;  %v3195_v45 = vpop.f32.mrb[5].mxu0  ;;  %v3359_v15 = vmul.f32 %v3912_v23, %v3912_v23 }
 0x1c2   : > { %v3316_v43 = vadd.f32 %v3315_v40, %v3195_v45  ;;  %v3357_v17 = vmul.f32 %v3195_v45, %v3195_v45  ;;  %v3913_v56 = vpop.f32.mrb[6].mxu0  ;;  %v3013_v57 = vsel %vm2981_vm12, %v2980_v12, %v2686_v61 }
 0x1c3   : > { %v2684_v33 = vpop.permute.xlu0 %2683  ;;  %v3198_v53 = vpop.f32.mrb[7].mxu0  ;;  %v3360_v41 = vmul.f32 %v3913_v56, %v3913_v56 }
 0x1c4   : > { %v3388_v32 = vadd.f32 %v3387_v19, %v3357_v17  ;;  %v3317_v39 = vadd.f32 %v3316_v43, %v3198_v53  ;;  %v3358_v54 = vmul.f32 %v3198_v53, %v3198_v53  ;;  %v3011_v9 = vsel %vm2981_vm12, %v2978_v50, %v2684_v33 }
 0x1c5   : > { %v2766_v7 = vpop.permute.xlu1 %2765 }
 0x1c6   : > { %v3046_v59 = vsel %vm3014_vm13, %v3013_v57, %v2766_v7  ;;  %v3318_v3 = vadd.f32 %v3912_v23, %v3317_v39  ;;  %v3389_v10 = vadd.f32 %v3388_v32, %v3358_v54 }
 0x1c7   : > { %v2764_v44 = vpop.permute.xlu0 %2763 }
 0x1c8   : > { %v3044_v20 = vsel %vm3014_vm13, %v3011_v9, %v2764_v44  ;;  %v3390_v58 = vadd.f32 %v3389_v10, %v3359_v15  ;;  %v3319_v6 = vadd.f32 %v3913_v56, %v3318_v3 }
 0x1c9   : > { %3934 = vmatprep.mubr.msk.bf16.mxu1 %vm3047_vm14, %v3044_v20 }
 0x1ca   : > { %3935 = vmatmul.mubr.msk.bf16.gmra.mrb[12].mxu1 %vm3047_vm14, %v3046_v59  ;;  %v3391_v49 = vadd.f32 %v3390_v58, %v3360_v41 }
 0x1e9   : > { %v3916_v48 = vpop.f32.mrb[8].mxu0 }
 0x1ea   : > { %v3211_v37 = vpop.f32.mrb[9].mxu0  ;;  %v3363_v40 = vmul.f32 %v3916_v48, %v3916_v48 }
 0x1eb   : > { %v3320_v55 = vadd.f32 %v3319_v6, %v3211_v37  ;;  %v3361_v2 = vmul.f32 %v3211_v37, %v3211_v37  ;;  %v3917_v22 = vpop.f32.mrb[10].mxu0 }
 0x1ec   : > { %v3214_v29 = vpop.f32.mrb[11].mxu0  ;;  %v3364_v19 = vmul.f32 %v3917_v22, %v3917_v22 }
 0x1ed   : > { %v3392_v5 = vadd.f32 %v3391_v49, %v3361_v2  ;;  %v3321_v51 = vadd.f32 %v3320_v55, %v3214_v29  ;;  %v3362_v4 = vmul.f32 %v3214_v29, %v3214_v29 }
 0x1ef   : > { %v3322_v16 = vadd.f32 %v3916_v48, %v3321_v51  ;;  %v3393_v38 = vadd.f32 %v3392_v5, %v3362_v4 }
 0x1f1   : > { %v3394_v13 = vadd.f32 %v3393_v38, %v3363_v40  ;;  %v3323_v63 = vadd.f32 %v3917_v22, %v3322_v16 }
 0x1f3   : > { %v3395_v18 = vadd.f32 %v3394_v13, %v3364_v19 }
 0x213   : > { %v3920_v25 = vpop.f32.mrb[12].mxu0 }
 0x214   : > { %v3227_v42 = vpop.f32.mrb[13].mxu0  ;;  %v3367_v36 = vmul.f32 %v3920_v25, %v3920_v25 }
 0x215   : > { %v3324_v8 = vadd.f32 %v3323_v63, %v3227_v42  ;;  %v3365_v34 = vmul.f32 %v3227_v42, %v3227_v42  ;;  %v3921_v60 = vpop.f32.mrb[14].mxu0 }
 0x216   : > { %v3230_v46 = vpop.f32.mrb[15].mxu0  ;;  %v3368_v27 = vmul.f32 %v3921_v60, %v3921_v60 }
 0x217   : > { %v3396_v14 = vadd.f32 %v3395_v18, %v3365_v34  ;;  %v3325_v24 = vadd.f32 %v3324_v8, %v3230_v46  ;;  %v3366_v31 = vmul.f32 %v3230_v46, %v3230_v46 }
 0x219   : > { %v3326_v35 = vadd.f32 %v3920_v25, %v3325_v24  ;;  %v3397_v30 = vadd.f32 %v3396_v14, %v3366_v31 }
 0x21b   : > { %v3398_v52 = vadd.f32 %v3397_v30, %v3367_v36  ;;  %v3327_v47 = vadd.f32 %v3921_v60, %v3326_v35 }
 0x21d   : > { %v3399_v28 = vadd.f32 %v3398_v52, %v3368_v27 }
 0x227   : > { %v3924_v21 = vpop.f32.mrb[0].mxu1 }
 0x228   : > { %v3243_v61 = vpop.f32.mrb[1].mxu1  ;;  %v3371_v43 = vmul.f32 %v3924_v21, %v3924_v21 }
 0x229   : > { %v3328_v23 = vadd.f32 %v3327_v47, %v3243_v61  ;;  %v3369_v62 = vmul.f32 %v3243_v61, %v3243_v61  ;;  %v3925_v11 = vpop.f32.mrb[2].mxu1 }
 0x22a   : > { %v3246_v33 = vpop.f32.mrb[3].mxu1  ;;  %v3372_v12 = vmul.f32 %v3925_v11, %v3925_v11 }
 0x22b   : > { %v3400_v45 = vadd.f32 %v3399_v28, %v3369_v62  ;;  %v3329_v1 = vadd.f32 %v3328_v23, %v3246_v33  ;;  %v3370_v26 = vmul.f32 %v3246_v33, %v3246_v33 }
 0x22d   : > { %v3330_v17 = vadd.f32 %v3924_v21, %v3329_v1  ;;  %v3401_v56 = vadd.f32 %v3400_v45, %v3370_v26 }
 0x22f   : > { %v3402_v50 = vadd.f32 %v3401_v56, %v3371_v43  ;;  %v3331_v53 = vadd.f32 %v3925_v11, %v3330_v17  ;;  %v3312_v43 = vld [vmem:[%s5768_s21] sm:$0x1] }
 0x231   : > { %v3403_v57 = vadd.f32 %v3402_v50, %v3372_v12  ;;  %v3352_v12 = vld [vmem:[%s5774_s26] sm:$0x1] }
 0x250   : > { %v3928_v7 = vpop.f32.mrb[4].mxu1 }
 0x251   : > { %v3259_v32 = vpop.f32.mrb[5].mxu1  ;;  %v3375_v3 = vmul.f32 %v3928_v7, %v3928_v7 }
 0x252   : > { %v3332_v39 = vadd.f32 %v3331_v53, %v3259_v32  ;;  %v3373_v54 = vmul.f32 %v3259_v32, %v3259_v32  ;;  %v3929_v9 = vpop.f32.mrb[6].mxu1 }
 0x253   : > { %v3262_v59 = vpop.f32.mrb[7].mxu1  ;;  %v3376_v58 = vmul.f32 %v3929_v9, %v3929_v9 }
 0x254   : > { %v3404_v44 = vadd.f32 %v3403_v57, %v3373_v54  ;;  %v3333_v20 = vadd.f32 %v3332_v39, %v3262_v59  ;;  %v3374_v15 = vmul.f32 %v3262_v59, %v3262_v59 }
 0x256   : > { %v3334_v10 = vadd.f32 %v3928_v7, %v3333_v20  ;;  %v3405_v41 = vadd.f32 %v3404_v44, %v3374_v15 }
 0x258   : > { %v3406_v6 = vadd.f32 %v3405_v41, %v3375_v3  ;;  %v3335_v49 = vadd.f32 %v3929_v9, %v3334_v10 }
 0x25a   : > { %v3407_v48 = vadd.f32 %v3406_v6, %v3376_v58 }
 0x279   : > { %v3932_v37 = vpop.f32.mrb[8].mxu1 }
 0x27a   : > { %v3275_v55 = vpop.f32.mrb[9].mxu1  ;;  %v3379_v16 = vmul.f32 %v3932_v37, %v3932_v37 }
 0x27b   : > { %v3336_v2 = vadd.f32 %v3335_v49, %v3275_v55  ;;  %v3377_v22 = vmul.f32 %v3275_v55, %v3275_v55  ;;  %v3933_v29 = vpop.f32.mrb[10].mxu1 }
 0x27c   : > { %v3278_v5 = vpop.f32.mrb[11].mxu1  ;;  %v3380_v13 = vmul.f32 %v3933_v29, %v3933_v29 }
 0x27d   : > { %v3408_v51 = vadd.f32 %v3407_v48, %v3377_v22  ;;  %v3337_v4 = vadd.f32 %v3336_v2, %v3278_v5  ;;  %v3378_v40 = vmul.f32 %v3278_v5, %v3278_v5 }
 0x27f   : > { %v3338_v38 = vadd.f32 %v3932_v37, %v3337_v4  ;;  %v3409_v19 = vadd.f32 %v3408_v51, %v3378_v40 }
 0x281   : > { %v3410_v63 = vadd.f32 %v3409_v19, %v3379_v16  ;;  %v3339_v18 = vadd.f32 %v3933_v29, %v3338_v38 }
 0x283   : > { %v3411_v25 = vadd.f32 %v3410_v63, %v3380_v13 }
 0x29d   : > { %v3936_v42 = vpop.f32.mrb[12].mxu1 }
 0x29e   : > { %v3291_v8 = vpop.f32.mrb[13].mxu1  ;;  %v3383_v35 = vmul.f32 %v3936_v42, %v3936_v42 }
 0x29f   : > { %v3340_v34 = vadd.f32 %v3339_v18, %v3291_v8  ;;  %v3381_v60 = vmul.f32 %v3291_v8, %v3291_v8  ;;  %v3937_v46 = vpop.f32.mrb[14].mxu1 }
 0x2a0   : > { %v3294_v14 = vpop.f32.mrb[15].mxu1  ;;  %v3384_v52 = vmul.f32 %v3937_v46, %v3937_v46 }
 0x2a1   : > { %v3412_v24 = vadd.f32 %v3411_v25, %v3381_v60  ;;  %v3341_v31 = vadd.f32 %v3340_v34, %v3294_v14  ;;  %v3382_v36 = vmul.f32 %v3294_v14, %v3294_v14 }
 0x2a3   : > { %v3342_v30 = vadd.f32 %v3936_v42, %v3341_v31  ;;  %v3413_v27 = vadd.f32 %v3412_v24, %v3382_v36 }
 0x2a5   : > { %v3343_v47 = vadd.f32 %v3937_v46, %v3342_v30  ;;  %v3414_v28 = vadd.f32 %v3413_v27, %v3383_v35 }
 0x2a7   : > { %v3344_v0 = vrot.slane %v3343_v47, 4  ;;  %v3415_v21 = vadd.f32 %v3414_v28, %v3384_v52 }
 0x2a9   : > { %v3345_v61 = vadd.f32 %v3344_v0, %v3343_v47  ;;  %v3416_v23 = vrot.slane %v3415_v21, 4 }
 0x2ab   : > { %v3346_v62 = vrot.slane %v3345_v61, 2  ;;  %v3417_v11 = vadd.f32 %v3416_v23, %v3415_v21 }
 0x2ad   : > { %v3347_v33 = vadd.f32 %v3346_v62, %v3345_v61  ;;  %v3418_v45 = vrot.slane %v3417_v11, 2 }
 0x2af   : > { %v3348_v1 = vrot.slane %v3347_v33, 1  ;;  %v3419_v26 = vadd.f32 %v3418_v45, %v3417_v11 }
 0x2b1   : > { %v3349_v17 = vadd.f32 %v3348_v1, %v3347_v33  ;;  %v3420_v56 = vrot.slane %v3419_v26, 1 }
 0x2b3   : > { %v3350_v50 = vadd.f32 %v3349_v17, %v3312_v43  ;;  %v3421_v53 = vadd.f32 %v3420_v56, %v3419_v26 }
 0x2b5   : > { %3351 = vst [vmem:[%s5768_s21] sm:$0x1] %v3350_v50  ;;  %v3422_v57 = vadd.f32 %v3421_v53, %v3352_v12 }
 0x2b7   : > { %3423 = vst [vmem:[%s5774_s26] sm:$0x1] %v3422_v57 }
 0x2b8 PF: > { %s14_s14 = sadd.s32 1, %s4094_s14   ;;  %s5799_s12 = smov %s4090_s13 }
 0x2b9   : > { %p11_p5 = scmp.ge.s32.totalorder %s14_s14, 4   ;;  %s5800_s13 = smov %s5802_s15 }
 0x2bb   :  { %13 = sbr.rel (!%p11_p5) target bundleno = 2 (0x2), region = 77 }

// kernel: conv_bn2d.3
= control target key start
LH: loop header
LB: loop body
LE: loop exit
PB: predicated region body
PF: predicated region fallthrough
CT: control target
= control target key end

     0   :  { %s4193_s15 = smov 0   ;;  %s4195_s16 = smov 0   ;;  %s6086_s0 = inlined_call_operand.vmem [shape: bf16[2,18,18,4], index: 0, kind: input, shape index: {}]   ;;  %s6087_s1 = inlined_call_operand.vmem [shape: bf16[128,128], index: 1, kind: input, shape index: {}]   ;;  %s6088_s2 = inlined_call_operand.vmem [shape: f32[1,128], index: 2, kind: input, shape index: {}]   ;;  %s6089_s3 = inlined_call_operand.vmem [shape: f32[1,128], index: 3, kind: input, shape index: {}]   ;;  %s6090_s4 = inlined_call_operand.vmem [shape: f32[2,8,256], index: 4, kind: output, shape index: {}]  }
   0x1   :  { %s4197_s17 = smov 0  }
   0x2 LB: > { %s26_s18 = sadd.s32 1, %s4154_s16  ;;  %p3578_p0 = scmp.ge.s32.totalorder %s4158_s17, 1  ;;  %s4158_s17 = sphi %s4197_s17, %s14_s17   ;;  %s4154_s16 = sphi %s4195_s16, %s6096_s16   ;;  %s4150_s15 = sphi %s4193_s15, %s6095_s15  }
   0x3   : > { %p28_p1 = scmp.ge.s32.totalorder %s26_s18, 2  ;;  %p176_p2 = scmp.lt.s32.totalorder %s4158_s17, 3 }
   0x5   : > { %s6098_s18 = smov (%p28_p1, %s26_s18), 0  ;;  %p177_p3 = pnand %p3578_p0, %p176_p2 }
   0x6   : > { %p206_p4 = scmp.lt.s32.totalorder (!%p177_p3), %s4150_s15, 1  ;;  %vm725_vm0 = vcmask (!%p177_p3), 1042432   ;;  %vm726_vm1 = vcmask (!%p177_p3), 1046532   ;;  %s4160_s23 = smov (!%p177_p3), 12   ;;  %vm274_vm3 = vsmask.f32 (!%p177_p3), 3328 }
   0x7   : > { %180 = sbr.rel (%p177_p3) target bundleno = 755 (0x2f3), region = 36  ;;  %vm4248_vm2 = vmor (!%p177_p3), %vm725_vm0, %vm726_vm1  ;;  %vm275_vm4 = vsmask.f32 (!%p177_p3), 7440  ;;  %s4161_s24 = smov (!%p177_p3), 8   ;;  %vm2800_vm6 = vcmask (!%p177_p3), 31744   ;;  %vm2849_vm7 = vcmask (!%p177_p3), 64512  }
   0x8   : > { %vm4306_vm5 = vmor (!%p177_p3), %vm274_vm3, %vm275_vm4  ;;  %s4162_s25 = smov (!%p177_p3), 4   ;;  %s4163_s26 = smov (!%p177_p3), 16   ;;  %vm2882_vm8 = vcmask (!%p177_p3), 97280   ;;  %vm2915_vm9 = vcmask (!%p177_p3), 130048   ;;  %vm2948_vm10 = vcmask (!%p177_p3), 162816   ;;  %vm2981_vm11 = vcmask (!%p177_p3), 195584  }
   0x9   : > { %s4164_s27 = smov (!%p177_p3), 20   ;;  %s4165_s28 = smov (!%p177_p3), 24   ;;  %vm3014_vm12 = vcmask (!%p177_p3), 228352   ;;  %vm3047_vm13 = vcmask (!%p177_p3), 261120   ;;  %vm3080_vm14 = vcmask (!%p177_p3), 293888  }
   0xa   : > { %s4166_s7 = smov (!%p177_p3), 28   ;;  %s4167_s10 = smov (!%p177_p3), 32  }
   0xe   : > { %s6100_s15 = smov (!%p206_p4, %s4150_s15), 1 }
   0xf   : > { %s4019_s19 = smul.u32 216, %s6100_s15 }
  0x11   : > { %s4217_s22 = scalar_lea.vmem %s6086_s0, %s4019_s19 }
  0x12   : > { %v3614_v0 = vld [vmem:[%s4217_s22 + $0x6c] sm:$0xf]  ;;  %v4221_v1 = vld [vmem:[%s4217_s22 + $0x70] sm:$0xf]  ;;  %v4234_v12 = vld [vmem:[%s4217_s22 + $0x64] sm:$0xf] }
  0x13   : > { %v3598_v2 = vld [vmem:[%s4217_s22 + $0xc] sm:$0xf]  ;;  %v1094_v3 = vshll.u32 %v4221_v1, 16  ;;  %v1098_v4 = vshrl.u32 %v4221_v1, 16  ;;  %v3814_v5 = vcombine.low %v3614_v0, %v4221_v1  ;;  %v1085_v6 = vshrl.u32 %v3614_v0, 16 }
  0x14   : > { %v4228_v7 = vld [vmem:[%s4217_s22 + $0x10] sm:$0xf]  ;;  %v1088_v8 = vshll.u32 %v3614_v0, 16  ;;  %v893_v15 = vshrl.u32 %v3598_v2, 16  ;;  %v896_v16 = vshll.u32 %v3598_v2, 16  ;;  %v786_v22 = vrot.slane %v4234_v12, 5 }
  0x15   : > { %v902_v9 = vshll.u32 %v4228_v7, 16  ;;  %v906_v10 = vshrl.u32 %v4228_v7, 16  ;;  %v3806_v11 = vcombine.low %v3598_v2, %v4228_v7  ;;  %v4236_v13 = vrot.slane %v1098_v4, 4  ;;  %2368 = vrot.lane.b32.xlu1 %v3814_v5, %s4160_s23  ;;  %v4240_v17 = vld [vmem:[%s4217_s22 + $0x68] sm:$0x1] }
  0x16   : > { %v1087_v14 = vrot.slane %v1085_v6, 4  ;;  %v1090_v18 = vrot.slane %v1088_v8, 5  ;;  %v669_v20 = vld [vmem:[%s4217_s22 + $0x60] sm:$0xe]  ;;  %v789_v23 = vrot.slane %v4240_v17, 5  ;;  %v895_v24 = vrot.slane %v893_v15, 4 }
  0x17   : > { %v4242_v19 = vrot.slane %v906_v10, 4  ;;  %2352 = vrot.lane.b32.xlu0 %v3806_v11, %s4160_s23  ;;  %v898_v25 = vrot.slane %v896_v16, 5  ;;  %v3590_v26 = vrot.slane %v669_v20, 9  ;;  %v4255_v27 = vld [vmem:[%s4217_s22 + $0x4] sm:$0xf]  ;;  %v479_v28 = vshll.u32 %v4234_v12, 16 }
  0x18   : > { %v1091_v29 = vor.u32 %v1090_v18, %v1087_v14  ;;  %v788_v30 = vrot.slane %v786_v22, 4  ;;  %v4259_v31 = vld [vmem:[%s4217_s22 + $0x8] sm:$0x1]  ;;  %v661_v32 = vld [vmem:[%s4217_s22] sm:$0xe]  ;;  %v730_v33 = vrot.slane %v4255_v27, 5 }
  0x19   : > { %v899_v34 = vor.u32 %v898_v25, %v895_v24  ;;  %v787_v35 = vsel %vm4248_vm2, %v3590_v26, %v786_v22  ;;  %v3582_v36 = vrot.slane %v661_v32, 9  ;;  %v733_v37 = vrot.slane %v4259_v31, 5  ;;  %v4267_v38 = vld [vmem:[%s4217_s22 + $0x70] sm:$0xf]  ;;  %v4270_v39 = vld [vmem:[%s4217_s22 + $0x74] sm:$0x1] }
  0x1a   : > { %v4272_v40 = vrot.slane %v1091_v29, 4  ;;  %v790_v41 = vsel %vm4248_vm2, %v788_v30, %v789_v23  ;;  %v732_v42 = vrot.slane %v730_v33, 4  ;;  %v670_v43 = vld [vmem:[%s4217_s22 + $0x6c] sm:$0xe]  ;;  %v793_v44 = vrot.slane %v4267_v38, 5 }
  0x1b   : > { %v4278_v45 = vrot.slane %v899_v34, 4  ;;  %v3798_v46 = vcombine.low %v787_v35, %v790_v41  ;;  %v731_v47 = vsel %vm4248_vm2, %v3582_v36, %v730_v33  ;;  %v3591_v48 = vrot.slane %v670_v43, 9  ;;  %v229_v49 = vld [vmem:[%s4217_s22 + $0x10] sm:$0xf]  ;;  %v259_v50 = vld [vmem:[%s4217_s22 + $0x14] sm:$0x1] }
  0x1c   : > { %v734_v51 = vsel %vm4248_vm2, %v732_v42, %v733_v37  ;;  %v795_v52 = vrot.slane %v793_v44, 4  ;;  %v796_v53 = vrot.slane %v4270_v39, 5  ;;  %v662_v54 = vld [vmem:[%s4217_s22 + $0xc] sm:$0xe]  ;;  %v737_v55 = vrot.slane %v229_v49, 5 }
  0x1d   : > { %2272 = vrot.lane.b32.xlu1 %v3798_v46, %s4161_s24  ;;  %v3790_v56 = vcombine.low %v731_v47, %v734_v51  ;;  %v794_v57 = vsel %vm4248_vm2, %v3591_v48, %v793_v44  ;;  %v3583_v58 = vrot.slane %v662_v54, 9  ;;  %v740_v59 = vrot.slane %v259_v50, 5  ;;  %v228_v60 = vld [vmem:[%s4217_s22 + $0xc] sm:$0xf]  ;;  %v226_v2 = vld [vmem:[%s4217_s22] sm:$0xf] }
  0x1e   : > { %v797_v61 = vsel %vm4248_vm2, %v795_v52, %v796_v53  ;;  %v739_v62 = vrot.slane %v737_v55, 4  ;;  %v302_v63 = vshrl.u32 %v228_v60, 16  ;;  %v305_v0 = vshll.u32 %v228_v60, 16  ;;  %v244_v23 = vld [vmem:[%s4217_s22 + $0x6c] sm:$0xf] }
  0x1f   : > { %2256 = vrot.lane.b32.xlu0 %v3790_v56, %s4161_s24  ;;  %v3799_v4 = vcombine.low %v794_v57, %v797_v61  ;;  %v738_v5 = vsel %vm4248_vm2, %v3583_v58, %v737_v55  ;;  %v311_v6 = vshll.u32 %v229_v49, 16  ;;  %v315_v8 = vshrl.u32 %v229_v49, 16  ;;  %v242_v52 = vld [vmem:[%s4217_s22 + $0x60] sm:$0xf] }
  0x20   : > { %v741_v10 = vsel %vm4248_vm2, %v739_v62, %v740_v59  ;;  %v304_v11 = vrot.slane %v302_v63, 4  ;;  %v307_v14 = vrot.slane %v305_v0, 5  ;;  %v321_v15 = vshll.u32 %v259_v50, 16 }
  0x21   : > { %2274 = vrot.lane.b32.xlu1 %v3799_v4, %s4161_s24  ;;  %v3791_v16 = vcombine.low %v738_v5, %v741_v10  ;;  %v313_v18 = vrot.slane %v311_v6, 5  ;;  %v317_v20 = vrot.slane %v315_v8, 4  ;;  %v278_v22 = vshrl.u32 %v226_v2, 16  ;;  %v3616_v4 = vld [vmem:[%s4217_s22 + $0x78] sm:$0xf] }
  0x22   : > { %v308_v24 = vor.u32 %v307_v14, %v304_v11  ;;  %v323_v25 = vrot.slane %v321_v15, 5  ;;  %v281_v26 = vshll.u32 %v226_v2, 16  ;;  %v287_v29 = vshll.u32 %v4255_v27, 16  ;;  %v4329_v10 = vld [vmem:[%s4217_s22 + $0x7c] sm:$0xf] }
  0x23   : > { %2258 = vrot.lane.b32.xlu0 %v3791_v16, %s4161_s24  ;;  %v318_v32 = vor.u32 %v317_v20, %v313_v18  ;;  %v280_v33 = vrot.slane %v278_v22, 4  ;;  %v291_v34 = vshrl.u32 %v4255_v27, 16  ;;  %v297_v35 = vshll.u32 %v4259_v31, 16 }
  0x24   : > { %v309_v36 = vrot.slane %v308_v24, 4  ;;  %v283_v37 = vrot.slane %v281_v26, 5  ;;  %v289_v41 = vrot.slane %v287_v29, 5  ;;  %v494_v42 = vshrl.u32 %v244_v23, 16 }
  0x25   : > { %v319_v43 = vrot.slane %v318_v32, 4  ;;  %v293_v44 = vrot.slane %v291_v34, 4  ;;  %v299_v46 = vrot.slane %v297_v35, 5  ;;  %v497_v47 = vshll.u32 %v244_v23, 16  ;;  %v4336_v23 = vld [vmem:[%s4217_s22 + $0x18] sm:$0xf] }
  0x26   : > { %v314_v48 = vsel %vm4306_vm5, %v309_v36, %v313_v18  ;;  %v284_v49 = vor.u32 %v283_v37, %v280_v33  ;;  %v496_v50 = vrot.slane %v494_v42, 4  ;;  %v503_v51 = vshll.u32 %v4267_v38, 16  ;;  %v4347_v35 = vld [vmem:[%s4217_s22 + $0x74] sm:$0x1] }
  0x27   : > { %v324_v27 = vsel %vm4306_vm5, %v319_v43, %v323_v25  ;;  %v294_v31 = vor.u32 %v293_v44, %v289_v41  ;;  %v499_v53 = vrot.slane %v497_v47, 5  ;;  %v507_v54 = vshrl.u32 %v4267_v38, 16 }
  0x28   : > { %v3775_v55 = vcombine.low %v314_v48, %v324_v27  ;;  %v285_v56 = vrot.slane %v284_v49, 4  ;;  %v505_v57 = vrot.slane %v503_v51, 5  ;;  %v513_v58 = vshll.u32 %v4270_v39, 16  ;;  %v4357_v48 = vld [vmem:[%s4217_s22 + $0x14] sm:$0x1] }
  0x29   : > { %v295_v59 = vrot.slane %v294_v31, 4  ;;  %v500_v60 = vor.u32 %v499_v53, %v496_v50  ;;  %v509_v61 = vrot.slane %v507_v54, 4  ;;  %v470_v62 = vshrl.u32 %v242_v52, 16 }
  0x2a   : > { %2178 = vrot.lane.b32.xlu1 %v3775_v55, %s4162_s25  ;;  %v290_v63 = vsel %vm4306_vm5, %v285_v56, %v289_v41  ;;  %v515_v0 = vrot.slane %v513_v58, 5  ;;  %v473_v2 = vshll.u32 %v242_v52, 16  ;;  %v481_v38 = vrot.slane %v479_v28, 5 }
  0x2b   : > { %v300_v39 = vsel %vm4306_vm5, %v295_v59, %v299_v46  ;;  %v501_v5 = vrot.slane %v500_v60, 4  ;;  %v510_v6 = vor.u32 %v509_v61, %v505_v57  ;;  %v472_v8 = vrot.slane %v470_v62, 4 }
  0x2c   : > { %v3774_v11 = vcombine.low %v290_v63, %v300_v39  ;;  %v475_v14 = vrot.slane %v473_v2, 5  ;;  %v483_v15 = vshrl.u32 %v4234_v12, 16  ;;  %v489_v16 = vshll.u32 %v4240_v17, 16  ;;  %v4341_v12 = vld [vmem:[%s4217_s22 + $0x1c] sm:$0xf] }
  0x2d   : > { %v506_v28 = vsel %vm4306_vm5, %v501_v5, %v505_v57  ;;  %v511_v18 = vrot.slane %v510_v6, 4  ;;  %v1109_v20 = vshrl.u32 %v3616_v4, 16  ;;  %v1112_v22 = vshll.u32 %v3616_v4, 16  ;;  %v4373_v57 = vld [vmem:[%s4217_s22 + $0x80] sm:$0x1] }
  0x2e   : > { %2176 = vrot.lane.b32.xlu0 %v3774_v11, %s4162_s25  ;;  %v476_v24 = vor.u32 %v475_v14, %v472_v8  ;;  %v485_v25 = vrot.slane %v483_v15, 4  ;;  %v491_v26 = vrot.slane %v489_v16, 5  ;;  %v1122_v29 = vshrl.u32 %v4329_v10, 16  ;;  %v3654_v8 = vld [vmem:[%s4217_s22 + $0x6c] sm:$0xe] }
  0x2f   : > { %v516_v17 = vsel %vm4306_vm5, %v511_v18, %v515_v0  ;;  %v1111_v32 = vrot.slane %v1109_v20, 4  ;;  %v1114_v33 = vrot.slane %v1112_v22, 5  ;;  %v3815_v34 = vcombine.low %v3616_v4, %v4329_v10  ;;  %v4382_v0 = vld [vmem:[%s4217_s22 + $0x20] sm:$0x1] }
  0x30   : > { %v3783_v36 = vcombine.low %v506_v28, %v516_v17  ;;  %v477_v37 = vrot.slane %v476_v24, 4  ;;  %v486_v41 = vor.u32 %v485_v25, %v481_v38  ;;  %v917_v42 = vshrl.u32 %v4336_v23, 16  ;;  %v3646_v28 = vld [vmem:[%s4217_s22 + $0xc] sm:$0xe]  ;;  %v3655_v17 = vld [vmem:[%s4217_s22 + $0x78] sm:$0xe] }
  0x31   : > { %v920_v43 = vshll.u32 %v4336_v23, 16  ;;  %v930_v44 = vshrl.u32 %v4341_v12, 16  ;;  %v3807_v46 = vcombine.low %v4336_v23, %v4341_v12  ;;  %v1096_v47 = vrot.slane %v1094_v3, 5 }
  0x32   : > { %2194 = vrot.lane.b32.xlu1 %v3783_v36, %s4162_s25  ;;  %v482_v49 = vsel %vm4306_vm5, %v477_v37, %v481_v38  ;;  %v487_v50 = vrot.slane %v486_v41, 4  ;;  %v919_v51 = vrot.slane %v917_v42, 4  ;;  %v1104_v52 = vshll.u32 %v4347_v35, 16 }
  0x33   : > { %v922_v27 = vrot.slane %v920_v43, 5  ;;  %v1097_v31 = vsel %vm4306_vm5, %v4272_v40, %v1096_v47  ;;  %v1101_v53 = vor.u32 %v4236_v13, %v1096_v47  ;;  %v904_v3 = vrot.slane %v902_v9, 5  ;;  %v3647_v47 = vld [vmem:[%s4217_s22 + $0x18] sm:$0xe] }
  0x34   : > { %v492_v54 = vsel %vm4306_vm5, %v487_v50, %v491_v26  ;;  %v1106_v55 = vrot.slane %v1104_v52, 5  ;;  %v912_v56 = vshll.u32 %v4357_v48, 16  ;;  %v1115_v58 = vor.u32 %v1114_v33, %v1111_v32 }
  0x35   : > { %v3782_v59 = vcombine.low %v482_v49, %v492_v54  ;;  %v1102_v60 = vrot.slane %v1101_v53, 4  ;;  %v905_v40 = vsel %vm4306_vm5, %v4278_v45, %v904_v3  ;;  %v909_v13 = vor.u32 %v4242_v19, %v904_v3  ;;  %v4424_v53 = vld [vmem:[%s4217_s22 + $0x7c] sm:$0xf] }
  0x36   : > { %2370 = vrot.lane.b32.xlu1 %v3815_v34, %s4160_s23  ;;  %v914_v9 = vrot.slane %v912_v56, 5  ;;  %v1116_v61 = vrot.slane %v1115_v58, 4  ;;  %v1118_v62 = vshll.u32 %v4329_v10, 16  ;;  %v1124_v63 = vrot.slane %v1122_v29, 4  ;;  %v4431_v58 = vld [vmem:[%s4217_s22 + $0x18] sm:$0xf] }
  0x37   : > { %2192 = vrot.lane.b32.xlu0 %v3782_v59, %s4162_s25  ;;  %v1107_v2 = vsel %vm4306_vm5, %v1102_v60, %v1106_v55  ;;  %v910_v38 = vrot.slane %v909_v13, 4  ;;  %v1128_v45 = vshll.u32 %v4373_v57, 16  ;;  %v923_v19 = vor.u32 %v922_v27, %v919_v51  ;;  %v4417_v51 = vld [vmem:[%s4217_s22 + $0x78] sm:$0xf] }
  0x38   : > { %v3830_v4 = vcombine.low %v1097_v31, %v1107_v2  ;;  %v1120_v39 = vrot.slane %v1118_v62, 5  ;;  %v926_v5 = vshll.u32 %v4341_v12, 16  ;;  %v932_v6 = vrot.slane %v930_v44, 4 }
  0x39   : > { %v915_v11 = vsel %vm4306_vm5, %v910_v38, %v914_v9  ;;  %v1130_v14 = vrot.slane %v1128_v45, 5  ;;  %v924_v15 = vrot.slane %v923_v19, 4  ;;  %v936_v16 = vshll.u32 %v4382_v0, 16  ;;  %v4437_v9 = vld [vmem:[%s4217_s22 + $0x1c] sm:$0xf] }
  0x3a   : > { %2448 = vrot.lane.b32.xlu1 %v3830_v4, %s4163_s26  ;;  %v3822_v18 = vcombine.low %v905_v40, %v915_v11  ;;  %v1121_v20 = vsel %vm4306_vm5, %v1116_v61, %v1120_v39  ;;  %v1125_v22 = vor.u32 %v1124_v63, %v1120_v39  ;;  %v928_v23 = vrot.slane %v926_v5, 5  ;;  %v4452_v19 = vld [vmem:[%s4217_s22 + $0x88] sm:$0xf] }
  0x3b   : > { %2354 = vrot.lane.b32.xlu0 %v3807_v46, %s4160_s23  ;;  %v938_v24 = vrot.slane %v936_v16, 5  ;;  %v3670_v25 = vrot.slane %v3654_v8, 9  ;;  %v1398_v26 = vrot.slane %v4221_v1, 5  ;;  %v1401_v29 = vrot.slane %v4347_v35, 5  ;;  %v4459_v8 = vld [vmem:[%s4217_s22 + $0x24] sm:$0xf] }
  0x3c   : > { %v1126_v32 = vrot.slane %v1125_v22, 4  ;;  %v929_v33 = vsel %vm4306_vm5, %v924_v15, %v928_v23  ;;  %v933_v34 = vor.u32 %v932_v6, %v928_v23  ;;  %v3662_v36 = vrot.slane %v3646_v28, 9  ;;  %v4468_v28 = vld [vmem:[%s4217_s22 + $0x28] sm:$0xf] }
  0x3d   : > { %v1399_v37 = vsel %vm4248_vm2, %v3670_v25, %v1398_v26  ;;  %v1400_v41 = vrot.slane %v1398_v26, 4  ;;  %v1342_v42 = vrot.slane %v4228_v7, 5  ;;  %v1345_v43 = vrot.slane %v4357_v48, 5 }
  0x3e   : > { %v1131_v1 = vsel %vm4306_vm5, %v1126_v32, %v1130_v14  ;;  %v934_v35 = vrot.slane %v933_v34, 4  ;;  %v3671_v44 = vrot.slane %v3655_v17, 9  ;;  %v1405_v46 = vrot.slane %v4329_v10, 5 }
  0x3f   : > { %2432 = vrot.lane.b32.xlu0 %v3822_v18, %s4163_s26  ;;  %v3831_v49 = vcombine.low %v1121_v20, %v1131_v1  ;;  %v1402_v50 = vsel %vm4248_vm2, %v1400_v41, %v1401_v29  ;;  %v1343_v7 = vsel %vm4248_vm2, %v3662_v36, %v1342_v42  ;;  %v1344_v48 = vrot.slane %v1342_v42, 4 }
  0x40   : > { %v939_v52 = vsel %vm4306_vm5, %v934_v35, %v938_v24  ;;  %v3846_v27 = vcombine.low %v1399_v37, %v1402_v50  ;;  %v1406_v10 = vsel %vm4248_vm2, %v3671_v44, %v1405_v46  ;;  %v1407_v31 = vrot.slane %v1405_v46, 4  ;;  %v4473_v24 = vld [vmem:[%s4217_s22 + $0x80] sm:$0x1] }
  0x41   : > { %2450 = vrot.lane.b32.xlu1 %v3831_v49, %s4163_s26  ;;  %v3823_v3 = vcombine.low %v929_v33, %v939_v52  ;;  %v1346_v54 = vsel %vm4248_vm2, %v1344_v48, %v1345_v43  ;;  %v1408_v55 = vrot.slane %v4373_v57, 5  ;;  %v3663_v56 = vrot.slane %v3647_v47, 9  ;;  %v4484_v37 = vld [vmem:[%s4217_s22 + $0x20] sm:$0x1] }
  0x42   : > { %v3838_v59 = vcombine.low %v1343_v7, %v1346_v54  ;;  %v1349_v60 = vrot.slane %v4341_v12, 5  ;;  %v1352_v40 = vrot.slane %v4382_v0, 5  ;;  %v1697_v13 = vshrl.u32 %v4417_v51, 16  ;;  %v4447_v12 = vld [vmem:[%s4217_s22 + $0x84] sm:$0xf] }
  0x43   : > { %2434 = vrot.lane.b32.xlu0 %v3823_v3, %s4163_s26  ;;  %v1409_v61 = vsel %vm4248_vm2, %v1407_v31, %v1408_v55  ;;  %v1700_v57 = vshll.u32 %v4417_v51, 16  ;;  %v1710_v62 = vshrl.u32 %v4424_v53, 16  ;;  %v3862_v63 = vcombine.low %v4417_v51, %v4424_v53  ;;  %v4074_v3 = vld [vmem:[%s6087_s1] sm:$0xff]  }
  0x44   : > { %v3847_v0 = vcombine.low %v1406_v10, %v1409_v61  ;;  %v1350_v2 = vsel %vm4248_vm2, %v3663_v56, %v1349_v60  ;;  %v1351_v38 = vrot.slane %v1349_v60, 4  ;;  %v1699_v45 = vrot.slane %v1697_v13, 4  ;;  %3955 = vmatprep.subr.bf16.mxu0 %v4074_v3  ;;  %4003 = vmatprep.subr.bf16.mxu1 %v4074_v3 }
  0x45   : > { %2528 = vrot.lane.b32.xlu1 %v3846_v27, %s4164_s27  ;;  %v1702_v4 = vrot.slane %v1700_v57, 5  ;;  %v1505_v39 = vshrl.u32 %v4431_v58, 16  ;;  %v1508_v5 = vshll.u32 %v4431_v58, 16  ;;  %v1518_v6 = vshrl.u32 %v4437_v9, 16  ;;  %v4493_v27 = vld [vmem:[%s4217_s22 + $0x8c] sm:$0x1]  ;;  %3956 = vmatpush3.bf16.msra.mxu0 %v4074_v3 }
  0x46   : > { %v1353_v11 = vsel %vm4248_vm2, %v1351_v38, %v1352_v40  ;;  %v3854_v14 = vcombine.low %v4431_v58, %v4437_v9  ;;  %v1721_v15 = vshrl.u32 %v4447_v12, 16  ;;  %v1724_v16 = vshll.u32 %v4447_v12, 16  ;;  %4011 = vmatpush3.bf16.msra.mxu1 %v4074_v3 }
  0x47   : > { %2512 = vrot.lane.b32.xlu0 %v3838_v59, %s4164_s27  ;;  %v3839_v18 = vcombine.low %v1350_v2, %v1353_v11  ;;  %v1507_v20 = vrot.slane %v1505_v39, 4  ;;  %v1510_v22 = vrot.slane %v1508_v5, 5  ;;  %v1734_v23 = vshrl.u32 %v4452_v19, 16  ;;  %v4077_v11 = vld [vmem:[%s6087_s1 + $0x8] sm:$0xff]  }
  0x48   : > { %v1723_v25 = vrot.slane %v1721_v15, 4  ;;  %v1726_v26 = vrot.slane %v1724_v16, 5  ;;  %v3863_v29 = vcombine.low %v4447_v12, %v4452_v19  ;;  %v1529_v17 = vshrl.u32 %v4459_v8, 16  ;;  %3957 = vmatprep.subr.bf16.mxu0 %v4077_v11  ;;  %4004 = vmatprep.subr.bf16.mxu1 %v4077_v11 }
  0x49   : > { %2530 = vrot.lane.b32.xlu1 %v3847_v0, %s4164_s27  ;;  %v1532_v32 = vshll.u32 %v4459_v8, 16  ;;  %v1542_v33 = vshrl.u32 %v4468_v28, 16  ;;  %v3855_v34 = vcombine.low %v4459_v8, %v4468_v28  ;;  %v1703_v36 = vor.u32 %v1702_v4, %v1699_v45  ;;  %v3734_v4 = vld [vmem:[%s4217_s22 + $0x78] sm:$0xe]  ;;  %3958 = vmatpush3.bf16.msra.mxu0 %v4077_v11 }
  0x4a   : > { %v1531_v41 = vrot.slane %v1529_v17, 4  ;;  %v1706_v42 = vshll.u32 %v4424_v53, 16  ;;  %v1712_v43 = vrot.slane %v1710_v62, 4  ;;  %v1716_v1 = vshll.u32 %v4473_v24, 16  ;;  %v4506_v62 = vld [vmem:[%s4217_s22 + $0x2c] sm:$0x1]  ;;  %4012 = vmatpush3.bf16.msra.mxu1 %v4077_v11 }
  0x4b   : > { %2514 = vrot.lane.b32.xlu0 %v3839_v18, %s4164_s27  ;;  %v1534_v35 = vrot.slane %v1532_v32, 5  ;;  %v1704_v44 = vrot.slane %v1703_v36, 4  ;;  %v1511_v46 = vor.u32 %v1510_v22, %v1507_v20  ;;  %v1514_v47 = vshll.u32 %v4437_v9, 16  ;;  %v3726_v20 = vld [vmem:[%s4217_s22 + $0x18] sm:$0xe] }
  0x4c   : > { %v1708_v49 = vrot.slane %v1706_v42, 5  ;;  %v1718_v50 = vrot.slane %v1716_v1, 5  ;;  %v1520_v7 = vrot.slane %v1518_v6, 4  ;;  %v1524_v48 = vshll.u32 %v4484_v37, 16  ;;  %v4533_v1 = vld [vmem:[%s4217_s22 + $0x7c] sm:$0xf] }
  0x4d   : > { %2624 = vrot.lane.b32.xlu1 %v3862_v63, %s4165_s28  ;;  %v1512_v51 = vrot.slane %v1511_v46, 4  ;;  %v1516_v52 = vrot.slane %v1514_v47, 5  ;;  %v1727_v10 = vor.u32 %v1726_v26, %v1723_v25  ;;  %v1730_v31 = vshll.u32 %v4452_v19, 16  ;;  %v3727_v11 = vld [vmem:[%s4217_s22 + $0x24] sm:$0xe] }
  0x4e   : > { %v1709_v54 = vsel %vm4306_vm5, %v1704_v44, %v1708_v49  ;;  %v1713_v55 = vor.u32 %v1712_v43, %v1708_v49  ;;  %v1526_v56 = vrot.slane %v1524_v48, 5  ;;  %v1736_v58 = vrot.slane %v1734_v23, 4  ;;  %v4544_v49 = vld [vmem:[%s4217_s22 + $0x80] sm:$0x1] }
  0x4f   : > { %2608 = vrot.lane.b32.xlu0 %v3854_v14, %s4165_s28  ;;  %v1517_v59 = vsel %vm4306_vm5, %v1512_v51, %v1516_v52  ;;  %v1521_v60 = vor.u32 %v1520_v7, %v1516_v52  ;;  %v1728_v40 = vrot.slane %v1727_v10, 4  ;;  %v1732_v13 = vrot.slane %v1730_v31, 5  ;;  %v230_v7 = vld [vmem:[%s4217_s22 + $0x18] sm:$0xf]  ;;  %v4552_v10 = vld [vmem:[%s4217_s22 + $0x1c] sm:$0xf] }
  0x50   : > { %v1714_v61 = vrot.slane %v1713_v55, 4  ;;  %v1740_v57 = vshll.u32 %v4493_v27, 16  ;;  %v1535_v63 = vor.u32 %v1534_v35, %v1531_v41  ;;  %v1538_v12 = vshll.u32 %v4468_v28, 16 }
  0x51   : > { %2626 = vrot.lane.b32.xlu1 %v3863_v29, %s4165_s28  ;;  %v1522_v0 = vrot.slane %v1521_v60, 4  ;;  %v1733_v2 = vsel %vm4306_vm5, %v1728_v40, %v1732_v13  ;;  %v1737_v38 = vor.u32 %v1736_v58, %v1732_v13  ;;  %v1544_v45 = vrot.slane %v1542_v33, 4  ;;  %v246_v29 = vld [vmem:[%s4217_s22 + $0x78] sm:$0xf]  ;;  %v4078_v13 = vld [vmem:[%s6087_s1 + $0x10] sm:$0xff]  }
  0x52   : > { %v1719_v39 = vsel %vm4306_vm5, %v1714_v61, %v1718_v50  ;;  %v1742_v5 = vrot.slane %v1740_v57, 5  ;;  %v1536_v6 = vrot.slane %v1535_v63, 4  ;;  %v1540_v8 = vrot.slane %v1538_v12, 5  ;;  %3959 = vmatprep.subr.bf16.mxu0 %v4078_v13  ;;  %4005 = vmatprep.subr.bf16.mxu1 %v4078_v13 }
  0x53   : > { %2610 = vrot.lane.b32.xlu0 %v3855_v34, %s4165_s28  ;;  %v3878_v14 = vcombine.low %v1709_v54, %v1719_v39  ;;  %v1527_v15 = vsel %vm4306_vm5, %v1522_v0, %v1526_v56  ;;  %v1738_v16 = vrot.slane %v1737_v38, 4  ;;  %v1548_v18 = vshll.u32 %v4506_v62, 16  ;;  %v4558_v56 = vld [vmem:[%s4217_s22 + $0x20] sm:$0x1]  ;;  %v3735_v0 = vld [vmem:[%s4217_s22 + $0x84] sm:$0xe]  ;;  %3960 = vmatpush3.bf16.msra.mxu0 %v4078_v13 }
  0x54   : > { %v3870_v22 = vcombine.low %v1517_v59, %v1527_v15  ;;  %v1541_v23 = vsel %vm4306_vm5, %v1536_v6, %v1540_v8  ;;  %v1545_v25 = vor.u32 %v1544_v45, %v1540_v8  ;;  %v3750_v26 = vrot.slane %v3734_v4, 9  ;;  %4013 = vmatpush3.bf16.msra.mxu1 %v4078_v13 }
  0x55   : > { %2704 = vrot.lane.b32.xlu1 %v3878_v14, %s4166_s7  ;;  %v1743_v17 = vsel %vm4306_vm5, %v1738_v16, %v1742_v5  ;;  %v1550_v32 = vrot.slane %v1548_v18, 5  ;;  %v2010_v33 = vrot.slane %v4424_v53, 5  ;;  %v2013_v34 = vrot.slane %v4473_v24, 5  ;;  %v4079_v14 = vld [vmem:[%s6087_s1 + $0x18] sm:$0xff]  }
  0x56   : > { %v3879_v36 = vcombine.low %v1733_v2, %v1743_v17  ;;  %v1546_v41 = vrot.slane %v1545_v25, 4  ;;  %v3742_v42 = vrot.slane %v3726_v20, 9  ;;  %v1954_v43 = vrot.slane %v4437_v9, 5  ;;  %3961 = vmatprep.subr.bf16.mxu0 %v4079_v14  ;;  %4006 = vmatprep.subr.bf16.mxu1 %v4079_v14 }
  0x57   : > { %2688 = vrot.lane.b32.xlu0 %v3870_v22, %s4166_s7  ;;  %v2011_v35 = vsel %vm4248_vm2, %v3750_v26, %v2010_v33  ;;  %v2012_v53 = vrot.slane %v2010_v33, 4  ;;  %v1957_v24 = vrot.slane %v4484_v37, 5  ;;  %v518_v44 = vshrl.u32 %v246_v29, 16  ;;  %3962 = vmatpush3.bf16.msra.mxu0 %v4079_v14 }
  0x58   : > { %v1551_v46 = vsel %vm4306_vm5, %v1546_v41, %v1550_v32  ;;  %v1955_v9 = vsel %vm4248_vm2, %v3742_v42, %v1954_v43  ;;  %v1956_v47 = vrot.slane %v1954_v43, 4  ;;  %v521_v50 = vshll.u32 %v246_v29, 16  ;;  %v248_v29 = vld [vmem:[%s4217_s22 + $0x84] sm:$0xf]  ;;  %4014 = vmatpush3.bf16.msra.mxu1 %v4079_v14 }
  0x59   : > { %2706 = vrot.lane.b32.xlu1 %v3879_v36, %s4166_s7  ;;  %v3871_v48 = vcombine.low %v1541_v23, %v1551_v46  ;;  %v2014_v51 = vsel %vm4248_vm2, %v2012_v53, %v2013_v34  ;;  %v520_v37 = vrot.slane %v518_v44, 4  ;;  %v527_v52 = vshll.u32 %v4533_v1, 16  ;;  %v4080_v43 = vld [vmem:[%s6087_s1 + $0x20] sm:$0xff]   ;;  %v4595_v44 = vld [vmem:[%s4217_s22 + $0x8c] sm:$0x1] }
  0x5a   : > { %v3894_v31 = vcombine.low %v2011_v35, %v2014_v51  ;;  %v1958_v3 = vsel %vm4248_vm2, %v1956_v47, %v1957_v24  ;;  %v523_v54 = vrot.slane %v521_v50, 5  ;;  %v531_v55 = vshrl.u32 %v4533_v1, 16  ;;  %v232_v50 = vld [vmem:[%s4217_s22 + $0x24] sm:$0xf]  ;;  %3963 = vmatprep.subr.bf16.mxu0 %v4080_v43  ;;  %4007 = vmatprep.subr.bf16.mxu1 %v4080_v43 }
  0x5b   : > { %2690 = vrot.lane.b32.xlu0 %v3871_v48, %s4166_s7  ;;  %v3886_v58 = vcombine.low %v1955_v9, %v1958_v3  ;;  %v529_v59 = vrot.slane %v527_v52, 5  ;;  %v537_v60 = vshll.u32 %v4544_v49, 16  ;;  %v326_v40 = vshrl.u32 %v230_v7, 16  ;;  %v4607_v52 = vld [vmem:[%s4217_s22 + $0x28] sm:$0xf]  ;;  %3964 = vmatpush3.bf16.msra.mxu0 %v4080_v43 }
  0x5c   : > { %v524_v61 = vor.u32 %v523_v54, %v520_v37  ;;  %v533_v57 = vrot.slane %v531_v55, 4  ;;  %v329_v63 = vshll.u32 %v230_v7, 16  ;;  %v335_v12 = vshll.u32 %v4552_v10, 16  ;;  %4015 = vmatpush3.bf16.msra.mxu1 %v4080_v43  ;;  %v4089_v43 = vld [vmem:[%s6087_s1 + $0x38] sm:$0xff]  }
  0x5d   : > { %2784 = vrot.lane.b32.xlu1 %v3894_v31, %s4167_s10  ;;  %v539_v2 = vrot.slane %v537_v60, 5  ;;  %v328_v38 = vrot.slane %v326_v40, 4  ;;  %v339_v45 = vshrl.u32 %v4552_v10, 16  ;;  %v345_v4 = vshll.u32 %v4558_v56, 16 }
  0x5e   : > { %v525_v39 = vrot.slane %v524_v61, 4  ;;  %v534_v5 = vor.u32 %v533_v57, %v529_v59  ;;  %v331_v6 = vrot.slane %v329_v63, 5  ;;  %v337_v8 = vrot.slane %v335_v12, 5  ;;  %v671_v61 = vld [vmem:[%s4217_s22 + $0x78] sm:$0xe]  ;;  %v4081_v57 = vld [vmem:[%s6087_s1 + $0x28] sm:$0xff]  }
  0x5f   : > { %2768 = vrot.lane.b32.xlu0 %v3886_v58, %s4167_s10  ;;  %v341_v15 = vrot.slane %v339_v45, 4  ;;  %v347_v16 = vrot.slane %v345_v4, 5  ;;  %v3751_v18 = vrot.slane %v3735_v0, 9  ;;  %v2017_v20 = vrot.slane %v4452_v19, 5  ;;  %v4614_v58 = vld [vmem:[%s4217_s22 + $0x2c] sm:$0x1]  ;;  %3965 = vmatprep.subr.bf16.mxu0 %v4081_v57 }
  0x60   : > { %v530_v22 = vsel %vm4306_vm5, %v525_v39, %v529_v59  ;;  %v535_v23 = vrot.slane %v534_v5, 4  ;;  %v332_v25 = vor.u32 %v331_v6, %v328_v38  ;;  %v2020_v26 = vrot.slane %v4493_v27, 5  ;;  %v4587_v27 = vld [vmem:[%s4217_s22 + $0x88] sm:$0xf]  ;;  %v663_v5 = vld [vmem:[%s4217_s22 + $0x18] sm:$0xe]  ;;  %4008 = vmatprep.subr.bf16.mxu1 %v4081_v57  ;;  %3966 = vmatpush3.bf16.msra.mxu0 %v4081_v57 }
  0x61   : > { %v342_v17 = vor.u32 %v341_v15, %v337_v8  ;;  %v2018_v32 = vsel %vm4248_vm2, %v3751_v18, %v2017_v20  ;;  %v2019_v33 = vrot.slane %v2017_v20, 4  ;;  %v3743_v34 = vrot.slane %v3727_v11, 9  ;;  %v4084_v15 = vld [vmem:[%s6087_s1 + $0x30] sm:$0xff]   ;;  %4016 = vmatpush3.bf16.msra.mxu1 %v4081_v57 }
  0x62   : > { %v540_v19 = vsel %vm4306_vm5, %v535_v23, %v539_v2  ;;  %v333_v36 = vrot.slane %v332_v25, 4  ;;  %v1961_v41 = vrot.slane %v4468_v28, 5  ;;  %v1964_v42 = vrot.slane %v4506_v62, 5  ;;  %3967 = vmatprep.subr.bf16.mxu0 %v4084_v15  ;;  %4009 = vmatprep.subr.bf16.mxu1 %v4084_v15 }
  0x63   : > { %v3784_v35 = vcombine.low %v530_v22, %v540_v19  ;;  %v343_v53 = vrot.slane %v342_v17, 4  ;;  %v2021_v24 = vsel %vm4248_vm2, %v2019_v33, %v2020_v26  ;;  %v542_v46 = vshrl.u32 %v248_v29, 16  ;;  %v672_v17 = vld [vmem:[%s4217_s22 + $0x84] sm:$0xe] }
  0x64   : > { %v338_v28 = vsel %vm4306_vm5, %v333_v36, %v337_v8  ;;  %v3895_v62 = vcombine.low %v2018_v32, %v2021_v24  ;;  %v1962_v9 = vsel %vm4248_vm2, %v3743_v34, %v1961_v41  ;;  %v1963_v47 = vrot.slane %v1961_v41, 4  ;;  %3968 = vmatpush3.bf16.msra.mxu0 %v4084_v15 }
  0x65   : > { %2196 = vrot.lane.b32.xlu1 %v3784_v35, %s4162_s25  ;;  %v348_v7 = vsel %vm4306_vm5, %v343_v53, %v347_v16  ;;  %v544_v48 = vrot.slane %v542_v46, 4  ;;  %v545_v51 = vshll.u32 %v248_v29, 16  ;;  %v551_v37 = vshll.u32 %v4587_v27, 16  ;;  %4017 = vmatpush3.bf16.msra.mxu1 %v4084_v15 }
  0x66   : > { %v3776_v31 = vcombine.low %v338_v28, %v348_v7  ;;  %v1965_v3 = vsel %vm4248_vm2, %v1963_v47, %v1964_v42  ;;  %v555_v54 = vshrl.u32 %v4587_v27, 16  ;;  %v561_v55 = vshll.u32 %v4595_v44, 16  ;;  %v664_v42 = vld [vmem:[%s4217_s22 + $0x24] sm:$0xe]  ;;  %3969 = vmatprep.subr.bf16.mxu0 %v4089_v43  ;;  %4010 = vmatprep.subr.bf16.mxu1 %v4089_v43 }
  0x67   : > { %v3887_v59 = vcombine.low %v1962_v9, %v1965_v3  ;;  %v547_v60 = vrot.slane %v545_v51, 5  ;;  %v553_v40 = vrot.slane %v551_v37, 5  ;;  %v350_v13 = vshrl.u32 %v232_v50, 16  ;;  %v4652_v9 = vld [vmem:[%s4217_s22 + $0x84] sm:$0xf] }
  0x68   : > { %2180 = vrot.lane.b32.xlu0 %v3776_v31, %s4162_s25  ;;  %v557_v63 = vrot.slane %v555_v54, 4  ;;  %v563_v12 = vrot.slane %v561_v55, 5  ;;  %v353_v0 = vshll.u32 %v232_v50, 16  ;;  %v359_v2 = vshll.u32 %v4607_v52, 16  ;;  %v4660_v51 = vld [vmem:[%s4217_s22 + $0x88] sm:$0xf]  ;;  %3970 = vmatpush3.bf16.msra.mxu0 %v4089_v43 }
  0x69   : > { %2786 = vrot.lane.b32.xlu1 %v3895_v62, %s4167_s10  ;;  %v548_v38 = vor.u32 %v547_v60, %v544_v48  ;;  %v352_v45 = vrot.slane %v350_v13, 4  ;;  %v363_v4 = vshrl.u32 %v4607_v52, 16  ;;  %v369_v39 = vshll.u32 %v4614_v58, 16  ;;  %v4667_v55 = vld [vmem:[%s4217_s22 + $0x24] sm:$0xf]  ;;  %4018 = vmatpush3.bf16.msra.mxu1 %v4089_v43 }
  0x6a   : > { %v558_v6 = vor.u32 %v557_v63, %v553_v40  ;;  %v355_v8 = vrot.slane %v353_v0, 5  ;;  %v361_v11 = vrot.slane %v359_v2, 5  ;;  %v3592_v14 = vrot.slane %v671_v61, 9  ;;  %v4678_v61 = vld [vmem:[%s4217_s22 + $0x28] sm:$0xf] }
  0x6b   : > { %v549_v16 = vrot.slane %v548_v38, 4  ;;  %v365_v18 = vrot.slane %v363_v4, 4  ;;  %v371_v20 = vrot.slane %v369_v39, 5  ;;  %v800_v22 = vrot.slane %v4533_v1, 5  ;;  %v3620_v2 = vld [vmem:[%s4217_s22 + $0x90] sm:$0xf] }
  0x6c   : > { %2770 = vrot.lane.b32.xlu0 %v3887_v59, %s4167_s10  ;;  %v559_v23 = vrot.slane %v558_v6, 4  ;;  %v356_v25 = vor.u32 %v355_v8, %v352_v45  ;;  %v803_v26 = vrot.slane %v4544_v49, 5  ;;  %v3584_v29 = vrot.slane %v663_v5, 9  ;;  %v4688_v38 = vld [vmem:[%s4217_s22 + $0x94] sm:$0xf] }
  0x6d   : > { %v554_v32 = vsel %vm4306_vm5, %v549_v16, %v553_v40  ;;  %v366_v33 = vor.u32 %v365_v18, %v361_v11  ;;  %v801_v34 = vsel %vm4248_vm2, %v3592_v14, %v800_v22  ;;  %v802_v19 = vrot.slane %v800_v22, 4  ;;  %v4694_v6 = vld [vmem:[%s4217_s22 + $0x30] sm:$0xf]  ;;  %v4697_v8 = vld [vmem:[%s4217_s22 + $0x34] sm:$0xf] }
  0x6e   : > { %v564_v1 = vsel %vm4306_vm5, %v559_v23, %v563_v12  ;;  %v357_v36 = vrot.slane %v356_v25, 4  ;;  %v744_v41 = vrot.slane %v4552_v10, 5  ;;  %v747_v49 = vrot.slane %v4558_v56, 5 }
  0x6f   : > { %v3785_v35 = vcombine.low %v554_v32, %v564_v1  ;;  %v367_v53 = vrot.slane %v366_v33, 4  ;;  %v804_v24 = vsel %vm4248_vm2, %v802_v19, %v803_v26  ;;  %v3593_v46 = vrot.slane %v672_v17, 9  ;;  %v4710_v32 = vld [vmem:[%s4217_s22 + $0x8c] sm:$0x1] }
  0x70   : > { %v362_v28 = vsel %vm4306_vm5, %v357_v36, %v361_v11  ;;  %v3800_v10 = vcombine.low %v801_v34, %v804_v24  ;;  %v745_v56 = vsel %vm4248_vm2, %v3584_v29, %v744_v41  ;;  %v746_v62 = vrot.slane %v744_v41, 4  ;;  %v4715_v36 = vld [vmem:[%s4217_s22 + $0x2c] sm:$0x1] }
  0x71   : > { %2198 = vrot.lane.b32.xlu1 %v3785_v35, %s4162_s25  ;;  %v372_v47 = vsel %vm4306_vm5, %v367_v53, %v371_v20  ;;  %v807_v50 = vrot.slane %v4587_v27, 5  ;;  %v810_v7 = vrot.slane %v4595_v44, 5  ;;  %v3585_v48 = vrot.slane %v664_v42, 9 }
  0x72   : > { %v3777_v37 = vcombine.low %v362_v28, %v372_v47  ;;  %v748_v31 = vsel %vm4248_vm2, %v746_v62, %v747_v49  ;;  %v751_v3 = vrot.slane %v4607_v52, 5  ;;  %v754_v54 = vrot.slane %v4614_v58, 5 }
  0x73   : > { %v3792_v59 = vcombine.low %v745_v56, %v748_v31  ;;  %v808_v27 = vsel %vm4248_vm2, %v3593_v46, %v807_v50  ;;  %v809_v44 = vrot.slane %v807_v50, 4  ;;  %v1133_v60 = vshrl.u32 %v4652_v9, 16 }
  0x74   : > { %2182 = vrot.lane.b32.xlu0 %v3777_v37, %s4162_s25  ;;  %v752_v52 = vsel %vm4248_vm2, %v3585_v48, %v751_v3  ;;  %v753_v58 = vrot.slane %v751_v3, 4  ;;  %v1136_v40 = vshll.u32 %v4652_v9, 16  ;;  %v1146_v13 = vshrl.u32 %v4660_v51, 16 }
  0x75   : > { %2276 = vrot.lane.b32.xlu1 %v3800_v10, %s4161_s24  ;;  %v811_v57 = vsel %vm4248_vm2, %v809_v44, %v810_v7  ;;  %v1135_v63 = vrot.slane %v1133_v60, 4  ;;  %v3816_v12 = vcombine.low %v4652_v9, %v4660_v51  ;;  %v941_v0 = vshrl.u32 %v4667_v55, 16  ;;  %v4724_v7 = vld [vmem:[%s4217_s22 + $0x98] sm:$0x1] }
  0x76   : > { %v3801_v45 = vcombine.low %v808_v27, %v811_v57  ;;  %v755_v4 = vsel %vm4248_vm2, %v753_v58, %v754_v54  ;;  %v1138_v39 = vrot.slane %v1136_v40, 5  ;;  %v944_v5 = vshll.u32 %v4667_v55, 16  ;;  %v4735_v58 = vld [vmem:[%s4217_s22 + $0x38] sm:$0x1] }
  0x77   : > { %v3793_v11 = vcombine.low %v752_v52, %v755_v4  ;;  %v943_v14 = vrot.slane %v941_v0, 4  ;;  %v954_v15 = vshrl.u32 %v4678_v61, 16  ;;  %v3808_v16 = vcombine.low %v4667_v55, %v4678_v61 }
  0x78   : > { %2260 = vrot.lane.b32.xlu0 %v3792_v59, %s4161_s24  ;;  %v946_v18 = vrot.slane %v944_v5, 5  ;;  %v1157_v20 = vshrl.u32 %v3620_v2, 16  ;;  %v1160_v22 = vshll.u32 %v3620_v2, 16  ;;  %v1170_v23 = vshrl.u32 %v4688_v38, 16 }
  0x79   : > { %2278 = vrot.lane.b32.xlu1 %v3801_v45, %s4161_s24  ;;  %v3817_v25 = vcombine.low %v3620_v2, %v4688_v38  ;;  %v965_v26 = vshrl.u32 %v4694_v6, 16  ;;  %v968_v29 = vshll.u32 %v4694_v6, 16  ;;  %v978_v17 = vshrl.u32 %v4697_v8, 16  ;;  %v3656_v2 = vld [vmem:[%s4217_s22 + $0x84] sm:$0xe] }
  0x7a   : > { %v1159_v33 = vrot.slane %v1157_v20, 4  ;;  %v1162_v34 = vrot.slane %v1160_v22, 5  ;;  %v3809_v19 = vcombine.low %v4694_v6, %v4697_v8  ;;  %v1139_v1 = vor.u32 %v1138_v39, %v1135_v63 }
  0x7b   : > { %v967_v41 = vrot.slane %v965_v26, 4  ;;  %v970_v49 = vrot.slane %v968_v29, 5  ;;  %v1142_v42 = vshll.u32 %v4660_v51, 16  ;;  %v1148_v43 = vrot.slane %v1146_v13, 4 }
  0x7c   : > { %2262 = vrot.lane.b32.xlu0 %v3793_v11, %s4161_s24  ;;  %v1140_v35 = vrot.slane %v1139_v1, 4  ;;  %v1152_v53 = vshll.u32 %v4710_v32, 16  ;;  %v947_v24 = vor.u32 %v946_v18, %v943_v14  ;;  %v950_v46 = vshll.u32 %v4678_v61, 16 }
  0x7d   : > { %2372 = vrot.lane.b32.xlu1 %v3816_v12, %s4160_s23  ;;  %v1144_v28 = vrot.slane %v1142_v42, 5  ;;  %v956_v10 = vrot.slane %v954_v15, 4  ;;  %v960_v56 = vshll.u32 %v4715_v36, 16  ;;  %v1163_v62 = vor.u32 %v1162_v34, %v1159_v33 }
  0x7e   : > { %v1154_v9 = vrot.slane %v1152_v53, 5  ;;  %v948_v47 = vrot.slane %v947_v24, 4  ;;  %v952_v50 = vrot.slane %v950_v46, 5  ;;  %v1166_v48 = vshll.u32 %v4688_v38, 16  ;;  %v4768_v46 = vld [vmem:[%s4217_s22 + $0x90] sm:$0xf] }
  0x7f   : > { %v1145_v37 = vsel %vm4306_vm5, %v1140_v35, %v1144_v28  ;;  %v1149_v31 = vor.u32 %v1148_v43, %v1144_v28  ;;  %v962_v3 = vrot.slane %v960_v56, 5  ;;  %v1164_v54 = vrot.slane %v1163_v62, 4  ;;  %v4775_v62 = vld [vmem:[%s4217_s22 + $0x94] sm:$0xf] }
  0x80   : > { %2356 = vrot.lane.b32.xlu0 %v3808_v16, %s4160_s23  ;;  %v953_v55 = vsel %vm4306_vm5, %v948_v47, %v952_v50  ;;  %v957_v59 = vor.u32 %v956_v10, %v952_v50  ;;  %v1168_v27 = vrot.slane %v1166_v48, 5  ;;  %v1172_v44 = vrot.slane %v1170_v23, 4  ;;  %v3648_v16 = vld [vmem:[%s4217_s22 + $0x24] sm:$0xe]  ;;  %v4782_v48 = vld [vmem:[%s4217_s22 + $0x30] sm:$0xf] }
  0x81   : > { %2374 = vrot.lane.b32.xlu1 %v3817_v25, %s4160_s23  ;;  %v1150_v60 = vrot.slane %v1149_v31, 4  ;;  %v1176_v52 = vshll.u32 %v4724_v7, 16  ;;  %v971_v40 = vor.u32 %v970_v49, %v967_v41  ;;  %v974_v13 = vshll.u32 %v4697_v8, 16  ;;  %v3657_v25 = vld [vmem:[%s4217_s22 + $0x90] sm:$0xe] }
  0x82   : > { %v958_v57 = vrot.slane %v957_v59, 4  ;;  %v1169_v63 = vsel %vm4306_vm5, %v1164_v54, %v1168_v27  ;;  %v1173_v12 = vor.u32 %v1172_v44, %v1168_v27  ;;  %v980_v0 = vrot.slane %v978_v17, 4  ;;  %v3649_v49 = vld [vmem:[%s4217_s22 + $0x30] sm:$0xe]  ;;  %v4789_v54 = vld [vmem:[%s4217_s22 + $0x34] sm:$0xf] }
  0x83   : > { %v1155_v45 = vsel %vm4306_vm5, %v1150_v60, %v1154_v9  ;;  %v1178_v4 = vrot.slane %v1176_v52, 5  ;;  %v972_v39 = vrot.slane %v971_v40, 4  ;;  %v976_v5 = vrot.slane %v974_v13, 5 }
  0x84   : > { %2358 = vrot.lane.b32.xlu0 %v3809_v19, %s4160_s23  ;;  %v3832_v6 = vcombine.low %v1145_v37, %v1155_v45  ;;  %v963_v11 = vsel %vm4306_vm5, %v958_v57, %v962_v3  ;;  %v1174_v14 = vrot.slane %v1173_v12, 4  ;;  %v984_v15 = vshll.u32 %v4735_v58, 16  ;;  %v4806_v57 = vld [vmem:[%s4217_s22 + $0xa0] sm:$0xf]  ;;  %v4812_v45 = vld [vmem:[%s4217_s22 + $0x3c] sm:$0xf] }
  0x85   : > { %v3824_v18 = vcombine.low %v953_v55, %v963_v11  ;;  %v977_v20 = vsel %vm4306_vm5, %v972_v39, %v976_v5  ;;  %v981_v22 = vor.u32 %v980_v0, %v976_v5  ;;  %v3672_v23 = vrot.slane %v3656_v2, 9  ;;  %v4822_v11 = vld [vmem:[%s4217_s22 + $0x40] sm:$0xf] }
  0x86   : > { %2452 = vrot.lane.b32.xlu1 %v3832_v6, %s4163_s26  ;;  %v1179_v26 = vsel %vm4306_vm5, %v1174_v14, %v1178_v4  ;;  %v986_v29 = vrot.slane %v984_v15, 5  ;;  %v1412_v17 = vrot.slane %v4660_v51, 5  ;;  %v1415_v33 = vrot.slane %v4710_v32, 5 }
  0x87   : > { %v3833_v34 = vcombine.low %v1169_v63, %v1179_v26  ;;  %v982_v19 = vrot.slane %v981_v22, 4  ;;  %v3664_v1 = vrot.slane %v3648_v16, 9  ;;  %v1356_v41 = vrot.slane %v4678_v61, 5  ;;  %v4791_v55 = vpop.permute.xlu1 %2368 }
  0x88   : > { %2436 = vrot.lane.b32.xlu0 %v3824_v18, %s4163_s26  ;;  %v1413_v42 = vsel %vm4248_vm2, %v3672_v23, %v1412_v17  ;;  %v1414_v43 = vrot.slane %v1412_v17, 4  ;;  %v1359_v35 = vrot.slane %v4715_v36, 5  ;;  %v3673_v53 = vrot.slane %v3657_v25, 9 }
  0x89   : > { %v987_v51 = vsel %vm4306_vm5, %v982_v19, %v986_v29  ;;  %v1357_v32 = vsel %vm4248_vm2, %v3664_v1, %v1356_v41  ;;  %v1358_v24 = vrot.slane %v1356_v41, 4  ;;  %v1419_v61 = vrot.slane %v4688_v38, 5  ;;  %v4828_v22 = vpop.permute.xlu0 %2352  ;;  %v4841_v41 = vld [vmem:[%s4217_s22 + $0x38] sm:$0x1] }
  0x8a   : > { %2454 = vrot.lane.b32.xlu1 %v3833_v34, %s4163_s26  ;;  %v3825_v28 = vcombine.low %v977_v20, %v987_v51  ;;  %v1416_v36 = vsel %vm4248_vm2, %v1414_v43, %v1415_v33  ;;  %v1422_v10 = vrot.slane %v4724_v7, 5  ;;  %v3665_v56 = vrot.slane %v3649_v49, 9  ;;  %v4826_v20 = vld [vmem:[%s4217_s22 + $0x98] sm:$0x1] }
  0x8b   : > { %v3848_v9 = vcombine.low %v1413_v42, %v1416_v36  ;;  %v1360_v47 = vsel %vm4248_vm2, %v1358_v24, %v1359_v35  ;;  %v1420_v38 = vsel %vm4248_vm2, %v3673_v53, %v1419_v61  ;;  %v1421_v50 = vrot.slane %v1419_v61, 4 }
  0x8c   : > { %2438 = vrot.lane.b32.xlu0 %v3825_v28, %s4163_s26  ;;  %v3840_v37 = vcombine.low %v1357_v32, %v1360_v47  ;;  %v1363_v7 = vrot.slane %v4697_v8, 5  ;;  %v1366_v31 = vrot.slane %v4735_v58, 5  ;;  %v1745_v3 = vshrl.u32 %v4768_v46, 16  ;;  %v4800_v8 = vld [vmem:[%s4217_s22 + $0x9c] sm:$0xf] }
  0x8d   : > { %v1423_v59 = vsel %vm4248_vm2, %v1421_v50, %v1422_v10  ;;  %v1748_v27 = vshll.u32 %v4768_v46, 16  ;;  %v1758_v44 = vshrl.u32 %v4775_v62, 16  ;;  %v3864_v60 = vcombine.low %v4768_v46, %v4775_v62 }
  0x8e   : > { %2532 = vrot.lane.b32.xlu1 %v3848_v9, %s4164_s27  ;;  %v3849_v52 = vcombine.low %v1420_v38, %v1423_v59  ;;  %v1364_v58 = vsel %vm4248_vm2, %v3665_v56, %v1363_v7  ;;  %v1365_v40 = vrot.slane %v1363_v7, 4  ;;  %v1747_v13 = vrot.slane %v1745_v3, 4  ;;  %v4850_v9 = vld [vmem:[%s4217_s22 + $0xa4] sm:$0x1] }
  0x8f   : > { %v1750_v63 = vrot.slane %v1748_v27, 5  ;;  %v1553_v12 = vshrl.u32 %v4782_v48, 16  ;;  %v1556_v0 = vshll.u32 %v4782_v48, 16  ;;  %v1566_v2 = vshrl.u32 %v4789_v54, 16  ;;  %v4834_v17 = vpop.permute.xlu1 %2272 }
  0x90   : > { %2516 = vrot.lane.b32.xlu0 %v3840_v37, %s4164_s27  ;;  %v1367_v4 = vsel %vm4248_vm2, %v1365_v40, %v1366_v31  ;;  %v3856_v39 = vcombine.low %v4782_v48, %v4789_v54  ;;  %v1769_v5 = vshrl.u32 %v4800_v8, 16  ;;  %v1772_v6 = vshll.u32 %v4800_v8, 16 }
  0x91   : > { %v3841_v14 = vcombine.low %v1364_v58, %v1367_v4  ;;  %v1555_v15 = vrot.slane %v1553_v12, 4  ;;  %v1558_v16 = vrot.slane %v1556_v0, 5  ;;  %v1782_v18 = vshrl.u32 %v4806_v57, 16  ;;  %v4853_v50 = vpop.permute.xlu0 %2256  ;;  %v4865_v58 = vld [vmem:[%s4217_s22 + $0x44] sm:$0x1] }
  0x92   : > { %2534 = vrot.lane.b32.xlu1 %v3849_v52, %s4164_s27  ;;  %v1771_v23 = vrot.slane %v1769_v5, 4  ;;  %v1774_v25 = vrot.slane %v1772_v6, 5  ;;  %v3865_v26 = vcombine.low %v4800_v8, %v4806_v57  ;;  %v1577_v29 = vshrl.u32 %v4812_v45, 16 }
  0x93   : > { %v1580_v33 = vshll.u32 %v4812_v45, 16  ;;  %v1590_v34 = vshrl.u32 %v4822_v11, 16  ;;  %v3857_v19 = vcombine.low %v4812_v45, %v4822_v11  ;;  %v1751_v1 = vor.u32 %v1750_v63, %v1747_v13  ;;  %v4858_v3 = vpop.permute.xlu1 %2274  ;;  %v3736_v45 = vld [vmem:[%s4217_s22 + $0x90] sm:$0xe] }
  0x94   : > { %2518 = vrot.lane.b32.xlu0 %v3841_v14, %s4164_s27  ;;  %v1579_v49 = vrot.slane %v1577_v29, 4  ;;  %v1754_v42 = vshll.u32 %v4775_v62, 16  ;;  %v1760_v43 = vrot.slane %v1758_v44, 4  ;;  %v1764_v35 = vshll.u32 %v4826_v20, 16 }
  0x95   : > { %v1582_v53 = vrot.slane %v1580_v33, 5  ;;  %v1752_v51 = vrot.slane %v1751_v1, 4  ;;  %v1559_v32 = vor.u32 %v1558_v16, %v1555_v15  ;;  %v1562_v24 = vshll.u32 %v4789_v54, 16 }
  0x96   : > { %2628 = vrot.lane.b32.xlu1 %v3864_v60, %s4165_s28  ;;  %v1756_v61 = vrot.slane %v1754_v42, 5  ;;  %v1766_v46 = vrot.slane %v1764_v35, 5  ;;  %v1568_v28 = vrot.slane %v1566_v2, 4  ;;  %v1572_v36 = vshll.u32 %v4841_v41, 16 }
  0x97   : > { %v1560_v10 = vrot.slane %v1559_v32, 4  ;;  %v1564_v56 = vrot.slane %v1562_v24, 5  ;;  %v1775_v47 = vor.u32 %v1774_v25, %v1771_v23  ;;  %v1778_v38 = vshll.u32 %v4806_v57, 16  ;;  %v3728_v23 = vld [vmem:[%s4217_s22 + $0x30] sm:$0xe]  ;;  %v4878_v25 = vpop.permute.xlu0 %2258 }
  0x98   : > { %2612 = vrot.lane.b32.xlu0 %v3856_v39, %s4165_s28  ;;  %v1757_v48 = vsel %vm4306_vm5, %v1752_v51, %v1756_v61  ;;  %v1761_v37 = vor.u32 %v1760_v43, %v1756_v61  ;;  %v1574_v7 = vrot.slane %v1572_v36, 5  ;;  %v1784_v31 = vrot.slane %v1782_v18, 4  ;;  %v4893_v61 = vld [vmem:[%s4217_s22 + $0x94] sm:$0xf] }
  0x99   : > { %v1565_v59 = vsel %vm4306_vm5, %v1560_v10, %v1564_v56  ;;  %v1569_v27 = vor.u32 %v1568_v28, %v1564_v56  ;;  %v1776_v44 = vrot.slane %v1775_v47, 4  ;;  %v1780_v60 = vrot.slane %v1778_v38, 5  ;;  %v4903_v47 = vld [vmem:[%s4217_s22 + $0x98] sm:$0x1]  ;;  %v234_v38 = vld [vmem:[%s4217_s22 + $0x30] sm:$0xf] }
  0x9a   : > { %2630 = vrot.lane.b32.xlu1 %v3865_v26, %s4165_s28  ;;  %v1762_v8 = vrot.slane %v1761_v37, 4  ;;  %v1788_v52 = vshll.u32 %v4850_v9, 16  ;;  %v1583_v40 = vor.u32 %v1582_v53, %v1579_v49  ;;  %v1586_v13 = vshll.u32 %v4822_v11, 16 }
  0x9b   : > { %v1570_v63 = vrot.slane %v1569_v27, 4  ;;  %v1781_v12 = vsel %vm4306_vm5, %v1776_v44, %v1780_v60  ;;  %v1785_v0 = vor.u32 %v1784_v31, %v1780_v60  ;;  %v1592_v2 = vrot.slane %v1590_v34, 4  ;;  %v4911_v31 = vld [vmem:[%s4217_s22 + $0x34] sm:$0xf] }
  0x9c   : > { %2614 = vrot.lane.b32.xlu0 %v3857_v19, %s4165_s28  ;;  %v1767_v4 = vsel %vm4306_vm5, %v1762_v8, %v1766_v46  ;;  %v1790_v39 = vrot.slane %v1788_v52, 5  ;;  %v1584_v5 = vrot.slane %v1583_v40, 4  ;;  %v1588_v6 = vrot.slane %v1586_v13, 5  ;;  %v250_v19 = vld [vmem:[%s4217_s22 + $0x90] sm:$0xf]  ;;  %v4883_v1 = vpop.permute.xlu1 %2178 }
  0x9d   : > { %v3880_v14 = vcombine.low %v1757_v48, %v1767_v4  ;;  %v1575_v15 = vsel %vm4306_vm5, %v1570_v63, %v1574_v7  ;;  %v1786_v16 = vrot.slane %v1785_v0, 4  ;;  %v1596_v18 = vshll.u32 %v4865_v58, 16  ;;  %v4919_v52 = vld [vmem:[%s4217_s22 + $0x38] sm:$0x1] }
  0x9e   : > { %v3872_v26 = vcombine.low %v1565_v59, %v1575_v15  ;;  %v1589_v29 = vsel %vm4306_vm5, %v1584_v5, %v1588_v6  ;;  %v1593_v33 = vor.u32 %v1592_v2, %v1588_v6  ;;  %v3752_v34 = vrot.slane %v3736_v45, 9 }
  0x9f   : > { %2708 = vrot.lane.b32.xlu1 %v3880_v14, %s4166_s7  ;;  %v1791_v49 = vsel %vm4306_vm5, %v1786_v16, %v1790_v39  ;;  %v1598_v42 = vrot.slane %v1596_v18, 5  ;;  %v2024_v43 = vrot.slane %v4775_v62, 5  ;;  %v2027_v35 = vrot.slane %v4826_v20, 5 }
  0xa0   : > { %2692 = vrot.lane.b32.xlu0 %v3872_v26, %s4166_s7  ;;  %v3881_v53 = vcombine.low %v1781_v12, %v1791_v49  ;;  %v1594_v51 = vrot.slane %v1593_v33, 4  ;;  %v3744_v32 = vrot.slane %v3728_v23, 9  ;;  %v1968_v24 = vrot.slane %v4789_v54, 5  ;;  %v4913_v59 = vpop.permute.xlu0 %2176  ;;  %v4109_v49 = vld [vmem:[%s4217_s22 + $0xc] sm:$0xf] }
  0xa1   : > { %v2025_v46 = vsel %vm4248_vm2, %v3752_v34, %v2024_v43  ;;  %v2026_v28 = vrot.slane %v2024_v43, 4  ;;  %v1971_v36 = vrot.slane %v4841_v41, 5  ;;  %v566_v62 = vshrl.u32 %v250_v19, 16 }
  0xa2   : > { %v1599_v20 = vsel %vm4306_vm5, %v1594_v51, %v1598_v42  ;;  %v1969_v10 = vsel %vm4248_vm2, %v3744_v32, %v1968_v24  ;;  %v1970_v56 = vrot.slane %v1968_v24, 4  ;;  %v569_v54 = vshll.u32 %v250_v19, 16  ;;  %v4108_v19 = vld [vmem:[%s4217_s22 + $0x10] sm:$0xf] }
  0xa3   : > { %2710 = vrot.lane.b32.xlu1 %v3881_v53, %s4166_s7  ;;  %v3873_v48 = vcombine.low %v1589_v29, %v1599_v20  ;;  %v2028_v37 = vsel %vm4248_vm2, %v2026_v28, %v2027_v35  ;;  %v568_v41 = vrot.slane %v566_v62, 4  ;;  %v575_v7 = vshll.u32 %v4893_v61, 16  ;;  %v3737_v29 = vld [vmem:[%s4217_s22 + $0x9c] sm:$0xe]  ;;  %v4110_v20 = vld [vmem:[%s4217_s22 + $0x4] sm:$0xf] }
  0xa4   : > { %v3896_v27 = vcombine.low %v2025_v46, %v2028_v37  ;;  %v1972_v44 = vsel %vm4248_vm2, %v1970_v56, %v1971_v36  ;;  %v571_v60 = vrot.slane %v569_v54, 5  ;;  %v579_v8 = vshrl.u32 %v4893_v61, 16  ;;  %v4921_v40 = vpop.permute.xlu1 %2194  ;;  %v3729_v28 = vld [vmem:[%s4217_s22 + $0x3c] sm:$0xe] }
  0xa5   : > { %2694 = vrot.lane.b32.xlu0 %v3873_v48, %s4166_s7  ;;  %v3888_v13 = vcombine.low %v1969_v10, %v1972_v44  ;;  %v577_v63 = vrot.slane %v575_v7, 5  ;;  %v585_v12 = vshll.u32 %v4903_v47, 16  ;;  %v374_v0 = vshrl.u32 %v234_v38, 16  ;;  %v4111_v10 = vld [vmem:[%s4217_s22] sm:$0xf] }
  0xa6   : > { %v572_v2 = vor.u32 %v571_v60, %v568_v41  ;;  %v581_v45 = vrot.slane %v579_v8, 4  ;;  %v377_v4 = vshll.u32 %v234_v38, 16  ;;  %v383_v39 = vshll.u32 %v4911_v31, 16  ;;  %v252_v7 = vld [vmem:[%s4217_s22 + $0x9c] sm:$0xf] }
  0xa7   : > { %2788 = vrot.lane.b32.xlu1 %v3896_v27, %s4167_s10  ;;  %v587_v5 = vrot.slane %v585_v12, 5  ;;  %v376_v6 = vrot.slane %v374_v0, 4  ;;  %v387_v14 = vshrl.u32 %v4911_v31, 16  ;;  %v393_v15 = vshll.u32 %v4919_v52, 16  ;;  %v4112_v12 = vld [vmem:[%s4217_s22 + $0x70] sm:$0xf] }
  0xa8   : > { %v573_v16 = vrot.slane %v572_v2, 4  ;;  %v582_v18 = vor.u32 %v581_v45, %v577_v63  ;;  %v379_v23 = vrot.slane %v377_v4, 5  ;;  %v385_v26 = vrot.slane %v383_v39, 5  ;;  %v4930_v33 = vpop.permute.xlu1 %2370  ;;  %v4113_v0 = vld [vmem:[%s4217_s22 + $0x6c] sm:$0xf] }
  0xa9   : > { %2772 = vrot.lane.b32.xlu0 %v3888_v13, %s4167_s10  ;;  %v389_v34 = vrot.slane %v387_v14, 4  ;;  %v3759_v42 = vcombine.low %v4109_v49, %v4108_v19  ;;  %v4935_v43 = vpop.permute.xlu0 %2192  ;;  %v395_v24 = vrot.slane %v393_v15, 5  ;;  %v3753_v46 = vrot.slane %v3737_v29, 9  ;;  %v4967_v45 = vld [vmem:[%s4217_s22 + $0xa0] sm:$0xf] }
  0xaa   : > { %v578_v35 = vsel %vm4306_vm5, %v573_v16, %v577_v63  ;;  %v583_v53 = vrot.slane %v582_v18, 4  ;;  %v380_v51 = vor.u32 %v379_v23, %v376_v6  ;;  %v3758_v56 = vcombine.low %v4111_v10, %v4110_v20  ;;  %v4114_v15 = vld [vmem:[%s4217_s22 + $0x64] sm:$0xf]  ;;  %v4115_v16 = vld [vmem:[%s4217_s22 + $0x60] sm:$0xf] }
  0xab   : > { %v390_v32 = vor.u32 %v389_v34, %v385_v26  ;;  %v2031_v54 = vrot.slane %v4806_v57, 5  ;;  %v4947_v37 = vsel %vm2800_vm6, %v3759_v42, %v4883_v1  ;;  %v2034_v41 = vrot.slane %v4850_v9, 5  ;;  %v236_v23 = vld [vmem:[%s4217_s22 + $0x3c] sm:$0xf]  ;;  %v4986_v42 = vld [vmem:[%s4217_s22 + $0x40] sm:$0xf] }
  0xac   : > { %v588_v36 = vsel %vm4306_vm5, %v583_v53, %v587_v5  ;;  %v381_v62 = vrot.slane %v380_v51, 4  ;;  %v4953_v44 = vpop.permute.xlu1 %2448  ;;  %v3745_v13 = vrot.slane %v3729_v28, 9  ;;  %v1975_v1 = vrot.slane %v4822_v11, 5  ;;  %v4972_v5 = vld [vmem:[%s4217_s22 + $0xa4] sm:$0x1] }
  0xad   : > { %v3786_v38 = vcombine.low %v578_v35, %v588_v36  ;;  %v391_v48 = vrot.slane %v390_v32, 4  ;;  %v4951_v27 = vpop.permute.xlu0 %2354  ;;  %v2032_v60 = vsel %vm4248_vm2, %v3753_v46, %v2031_v54  ;;  %v2033_v8 = vrot.slane %v2031_v54, 4 }
  0xae   : > { %v386_v57 = vsel %vm4306_vm5, %v381_v62, %v385_v26  ;;  %v1978_v63 = vrot.slane %v4865_v58, 5  ;;  %v3767_v2 = vcombine.low %v4113_v0, %v4112_v12  ;;  %v590_v6 = vshrl.u32 %v252_v7, 16 }
  0xaf   : > { %2200 = vrot.lane.b32.xlu1 %v3786_v38, %s4162_s25  ;;  %v396_v9 = vsel %vm4306_vm5, %v391_v48, %v395_v24  ;;  %v2035_v39 = vsel %vm4248_vm2, %v2033_v8, %v2034_v41  ;;  %v1976_v11 = vsel %vm4248_vm2, %v3745_v13, %v1975_v1  ;;  %v1977_v58 = vrot.slane %v1975_v1, 4  ;;  %v4996_v24 = vld [vmem:[%s4217_s22 + $0x44] sm:$0x1] }
  0xb0   : > { %v3778_v4 = vcombine.low %v386_v57, %v396_v9  ;;  %v3897_v14 = vcombine.low %v2032_v60, %v2035_v39  ;;  %v3766_v18 = vcombine.low %v4115_v16, %v4114_v15  ;;  %v2803_v29 = vsel %vm2800_vm6, %v3758_v56, %v4913_v59 }
  0xb1   : > { %v4979_v26 = vpop.permute.xlu0 %2432  ;;  %v592_v34 = vrot.slane %v590_v6, 4  ;;  %v593_v19 = vshll.u32 %v252_v7, 16  ;;  %v599_v49 = vshll.u32 %v4967_v45, 16  ;;  %v1979_v35 = vsel %vm4248_vm2, %v1977_v58, %v1978_v63 }
  0xb2   : > { %2184 = vrot.lane.b32.xlu0 %v3778_v4, %s4162_s25  ;;  %v2830_v53 = vsel %vm2800_vm6, %v3767_v2, %v4921_v40  ;;  %v603_v51 = vshrl.u32 %v4967_v45, 16  ;;  %v609_v32 = vshll.u32 %v4972_v5, 16  ;;  %v3889_v46 = vcombine.low %v1976_v11, %v1979_v35 }
  0xb3   : > { %2790 = vrot.lane.b32.xlu1 %v3897_v14, %s4167_s10  ;;  %v4998_v59 = vpop.permute.xlu1 %2450  ;;  %v595_v28 = vrot.slane %v593_v19, 5  ;;  %v601_v36 = vrot.slane %v599_v49, 5  ;;  %v398_v62 = vshrl.u32 %v236_v23, 16  ;;  %v2827_v20 = vsel %vm2800_vm6, %v3766_v18, %v4935_v43  ;;  %v673_v43 = vld [vmem:[%s4217_s22 + $0x90] sm:$0xe] }
  0xb4   : > { %v605_v10 = vrot.slane %v603_v51, 4  ;;  %v401_v56 = vshll.u32 %v236_v23, 16  ;;  %v407_v40 = vshll.u32 %v4986_v42, 16  ;;  %v411_v41 = vshrl.u32 %v4986_v42, 16  ;;  %v665_v14 = vld [vmem:[%s4217_s22 + $0x30] sm:$0xe] }
  0xb5   : > { %v5003_v54 = vpop.permute.xlu0 %2434  ;;  %v596_v38 = vor.u32 %v595_v28, %v592_v34  ;;  %v400_v48 = vrot.slane %v398_v62, 4  ;;  %v417_v7 = vshll.u32 %v4996_v24, 16  ;;  %v611_v60 = vrot.slane %v609_v32, 5 }
  0xb6   : > { %2774 = vrot.lane.b32.xlu0 %v3889_v46, %s4167_s10  ;;  %v606_v57 = vor.u32 %v605_v10, %v601_v36  ;;  %v403_v8 = vrot.slane %v401_v56, 5  ;;  %v409_v13 = vrot.slane %v407_v40, 5  ;;  %v2851_v1 = vsel %vm2849_vm7, %v2803_v29, %v4853_v50  ;;  %v666_v56 = vld [vmem:[%s4217_s22 + $0x3c] sm:$0xe] }
  0xb7   : > { %v5009_v9 = vpop.permute.xlu1 %2528  ;;  %v2867_v63 = vsel %vm2849_vm7, %v2827_v20, %v4834_v17  ;;  %v597_v12 = vrot.slane %v596_v38, 4  ;;  %v413_v0 = vrot.slane %v411_v41, 4  ;;  %v419_v39 = vrot.slane %v417_v7, 5 }
  0xb8   : > { %v607_v2 = vrot.slane %v606_v57, 4  ;;  %v404_v4 = vor.u32 %v403_v8, %v400_v48  ;;  %v2869_v6 = vsel %vm2849_vm7, %v2830_v53, %v4858_v3  ;;  %v3594_v50 = vrot.slane %v673_v43, 9  ;;  %v5059_v48 = vld [vmem:[%s4217_s22 + $0x9c] sm:$0xf] }
  0xb9   : > { %v5018_v11 = vpop.permute.xlu0 %2512  ;;  %v602_v58 = vsel %vm4306_vm5, %v597_v12, %v601_v36  ;;  %v414_v15 = vor.u32 %v413_v0, %v409_v13  ;;  %v814_v18 = vrot.slane %v4893_v61, 5  ;;  %v817_v23 = vrot.slane %v4903_v47, 5  ;;  %v674_v36 = vld [vmem:[%s4217_s22 + $0x9c] sm:$0xe]  ;;  %v5077_v12 = vld [vmem:[%s4217_s22 + $0xa0] sm:$0xf] }
  0xba   : > { %v612_v17 = vsel %vm4306_vm5, %v607_v2, %v611_v60  ;;  %v405_v16 = vrot.slane %v404_v4, 4  ;;  %v3586_v19 = vrot.slane %v665_v14, 9  ;;  %v758_v49 = vrot.slane %v4911_v31, 5  ;;  %v3606_v43 = vld [vmem:[%s4217_s22 + $0x3c] sm:$0xf] }
  0xbb   : > { %v5026_v29 = vpop.permute.xlu1 %2530  ;;  %v3787_v3 = vcombine.low %v602_v58, %v612_v17  ;;  %v415_v34 = vrot.slane %v414_v15, 4  ;;  %v815_v53 = vsel %vm4248_vm2, %v3594_v50, %v814_v18  ;;  %v816_v51 = vrot.slane %v814_v18, 4  ;;  %v5101_v17 = vld [vmem:[%s4217_s22 + $0x40] sm:$0xf] }
  0xbc   : > { %v410_v35 = vsel %vm4306_vm5, %v405_v16, %v409_v13  ;;  %v761_v61 = vrot.slane %v4919_v52, 5  ;;  %v2853_v31 = vsel %vm2849_vm7, %v4947_v37, %v4878_v25  ;;  %v759_v46 = vsel %vm4248_vm2, %v3586_v19, %v758_v49 }
  0xbd   : > { %v5034_v32 = vpop.permute.xlu0 %2514  ;;  %2202 = vrot.lane.b32.xlu1 %v3787_v3, %s4162_s25  ;;  %v420_v47 = vsel %vm4306_vm5, %v415_v34, %v419_v39  ;;  %v760_v28 = vrot.slane %v758_v49, 4  ;;  %v2902_v52 = vsel %vm2882_vm8, %v2869_v6, %v4930_v33  ;;  %v2886_v20 = vsel %vm2882_vm8, %v2853_v31, %v4951_v27  ;;  %v3624_v6 = vld [vmem:[%s4217_s22 + $0xa8] sm:$0xf]  ;;  %v5106_v3 = vld [vmem:[%s4217_s22 + $0xac] sm:$0xf] }
  0xbe   : > { %v3779_v62 = vcombine.low %v410_v35, %v420_v47  ;;  %v818_v10 = vsel %vm4248_vm2, %v816_v51, %v817_v23  ;;  %v2900_v37 = vsel %vm2882_vm8, %v2867_v63, %v4791_v55  ;;  %v3595_v27 = vrot.slane %v674_v36, 9  ;;  %v3608_v34 = vld [vmem:[%s4217_s22 + $0x48] sm:$0xf]  ;;  %v5113_v51 = vld [vmem:[%s4217_s22 + $0x4c] sm:$0xf] }
  0xbf   : > { %v5052_v40 = vpop.permute.xlu1 %2624  ;;  %v3802_v38 = vcombine.low %v815_v53, %v818_v10  ;;  %v762_v25 = vsel %vm4248_vm2, %v760_v28, %v761_v61  ;;  %v821_v41 = vrot.slane %v4967_v45, 5  ;;  %v824_v7 = vrot.slane %v4972_v5, 5  ;;  %v5131_v10 = vld [vmem:[%s4217_s22 + $0xa4] sm:$0x1] }
  0xc0   : > { %2186 = vrot.lane.b32.xlu0 %v3779_v62, %s4162_s25  ;;  %v3794_v33 = vcombine.low %v759_v46, %v762_v25  ;;  %v2884_v60 = vsel %vm2882_vm8, %v2851_v1, %v4828_v22  ;;  %v3587_v8 = vrot.slane %v666_v56, 9  ;;  %v765_v55 = vrot.slane %v4986_v42, 5 }
  0xc1   : > { %v5064_v57 = vpop.permute.xlu0 %2608  ;;  %2280 = vrot.lane.b32.xlu1 %v3802_v38, %s4161_s24  ;;  %v768_v13 = vrot.slane %v4996_v24, 5  ;;  %v2933_v63 = vsel %vm2915_vm9, %v2900_v37, %v4953_v44  ;;  %v822_v45 = vsel %vm4248_vm2, %v3595_v27, %v821_v41  ;;  %v823_v5 = vrot.slane %v821_v41, 4 }
  0xc2   : > { %v1181_v0 = vshrl.u32 %v5059_v48, 16  ;;  %v2917_v42 = vsel %vm2915_vm9, %v2884_v60, %v4979_v26  ;;  %v766_v24 = vsel %vm4248_vm2, %v3587_v8, %v765_v55  ;;  %v767_v1 = vrot.slane %v765_v55, 4 }
  0xc3   : > { %v5080_v22 = vpop.permute.xlu1 %2626  ;;  %v1184_v44 = vshll.u32 %v5059_v48, 16  ;;  %v825_v2 = vsel %vm4248_vm2, %v823_v5, %v824_v7  ;;  %v2935_v4 = vsel %vm2915_vm9, %v2902_v52, %v4998_v59  ;;  %v2919_v39 = vsel %vm2915_vm9, %v2886_v20, %v5003_v54 }
  0xc4   : > { %2264 = vrot.lane.b32.xlu0 %v3794_v33, %s4161_s24  ;;  %v989_v26 = vshrl.u32 %v3606_v43, 16  ;;  %v3803_v58 = vcombine.low %v822_v45, %v825_v2  ;;  %v769_v15 = vsel %vm4248_vm2, %v767_v1, %v768_v13  ;;  %v1194_v50 = vshrl.u32 %v5077_v12, 16  ;;  %v5153_v1 = vld [vmem:[%s4217_s22 + $0xb0] sm:$0x1] }
  0xc5   : > { %v5095_v14 = vpop.permute.xlu0 %2610  ;;  %v992_v16 = vshll.u32 %v3606_v43, 16  ;;  %v3795_v18 = vcombine.low %v766_v24, %v769_v15  ;;  %v1183_v23 = vrot.slane %v1181_v0, 4  ;;  %v1186_v59 = vrot.slane %v1184_v44, 5 }
  0xc6   : > { %v3818_v54 = vcombine.low %v5059_v48, %v5077_v12  ;;  %2282 = vrot.lane.b32.xlu1 %v3803_v58, %s4161_s24  ;;  %v991_v49 = vrot.slane %v989_v26, 4  ;;  %v1205_v35 = vshrl.u32 %v3624_v6, 16  ;;  %v1208_v53 = vshll.u32 %v3624_v6, 16 }
  0xc7   : > { %v5109_v19 = vpop.permute.xlu1 %2704  ;;  %v994_v61 = vrot.slane %v992_v16, 5  ;;  %v1002_v47 = vshrl.u32 %v5101_v17, 16  ;;  %v3810_v31 = vcombine.low %v3606_v43, %v5101_v17  ;;  %v5120_v46 = vsel %vm2948_vm10, %v2933_v63, %v5009_v9  ;;  %v5135_v9 = vld [vmem:[%s4217_s22 + $0x44] sm:$0x1] }
  0xc8   : > { %2266 = vrot.lane.b32.xlu0 %v3795_v18, %s4161_s24  ;;  %v5126_v36 = vsel %vm2948_vm10, %v2917_v42, %v5018_v11  ;;  %v1207_v62 = vrot.slane %v1205_v35, 4  ;;  %v1218_v52 = vshrl.u32 %v5106_v3, 16  ;;  %v3819_v20 = vcombine.low %v3624_v6, %v5106_v3 }
  0xc9   : > { %v5122_v28 = vpop.permute.xlu0 %2688  ;;  %v1210_v56 = vrot.slane %v1208_v53, 5  ;;  %v1013_v38 = vshrl.u32 %v3608_v34, 16  ;;  %v1016_v25 = vshll.u32 %v3608_v34, 16  ;;  %v1026_v37 = vshrl.u32 %v5113_v51, 16 }
  0xca   : > { %2376 = vrot.lane.b32.xlu1 %v3818_v54, %s4160_s23  ;;  %v3811_v11 = vcombine.low %v3608_v34, %v5113_v51  ;;  %v5143_v33 = vsel %vm2948_vm10, %v2935_v4, %v5026_v29  ;;  %v1187_v27 = vor.u32 %v1186_v59, %v1183_v23  ;;  %v1190_v41 = vshll.u32 %v5077_v12, 16  ;;  %v5170_v34 = vld [vmem:[%s4217_s22 + $0x50] sm:$0x1] }
  0xcb   : > { %v5137_v48 = vpop.permute.xlu1 %2706  ;;  %v1196_v7 = vrot.slane %v1194_v50, 4  ;;  %v1200_v60 = vshll.u32 %v5131_v10, 16  ;;  %v995_v8 = vor.u32 %v994_v61, %v991_v49  ;;  %v998_v55 = vshll.u32 %v5101_v17, 16 }
  0xcc   : > { %2360 = vrot.lane.b32.xlu0 %v3810_v31, %s4160_s23  ;;  %v1188_v13 = vrot.slane %v1187_v27, 4  ;;  %v1192_v43 = vrot.slane %v1190_v41, 5  ;;  %v1004_v63 = vrot.slane %v1002_v47, 4  ;;  %v1008_v45 = vshll.u32 %v5135_v9, 16 }
  0xcd   : > { %v5150_v5 = vpop.permute.xlu0 %2690  ;;  %v1015_v29 = vrot.slane %v1013_v38, 4  ;;  %v1018_v0 = vrot.slane %v1016_v25, 5  ;;  %v996_v42 = vrot.slane %v995_v8, 4  ;;  %v1000_v24 = vrot.slane %v998_v55, 5  ;;  %v3658_v38 = vld [vmem:[%s4217_s22 + $0x9c] sm:$0xe] }
  0xce   : > { %2378 = vrot.lane.b32.xlu1 %v3819_v20, %s4160_s23  ;;  %v5158_v44 = vsel %vm2948_vm10, %v2919_v39, %v5034_v32  ;;  %v1193_v2 = vsel %vm4306_vm5, %v1188_v13, %v1192_v43  ;;  %v1197_v4 = vor.u32 %v1196_v7, %v1192_v43  ;;  %v1202_v26 = vrot.slane %v1200_v60, 5  ;;  %v3650_v7 = vld [vmem:[%s4217_s22 + $0x3c] sm:$0xe] }
  0xcf   : > { %v1001_v6 = vsel %vm4306_vm5, %v996_v42, %v1000_v24  ;;  %v1005_v58 = vor.u32 %v1004_v63, %v1000_v24  ;;  %v1010_v15 = vrot.slane %v1008_v45, 5  ;;  %v1211_v50 = vor.u32 %v1210_v56, %v1207_v62  ;;  %v5165_v16 = vpop.permute.xlu1 %2784  ;;  %v3659_v24 = vld [vmem:[%s4217_s22 + $0xa8] sm:$0xe] }
  0xd0   : > { %2362 = vrot.lane.b32.xlu0 %v3811_v11, %s4160_s23  ;;  %v1198_v18 = vrot.slane %v1197_v4, 4  ;;  %v1214_v32 = vshll.u32 %v5106_v3, 16  ;;  %v1220_v39 = vrot.slane %v1218_v52, 4  ;;  %v1224_v23 = vshll.u32 %v5153_v1, 16 }
  0xd1   : > { %v1006_v59 = vrot.slane %v1005_v58, 4  ;;  %v1212_v54 = vrot.slane %v1211_v50, 4  ;;  %v1019_v49 = vor.u32 %v1018_v0, %v1015_v29  ;;  %v1022_v35 = vshll.u32 %v5113_v51, 16  ;;  %v5175_v31 = vpop.permute.xlu0 %2768  ;;  %v3651_v50 = vld [vmem:[%s4217_s22 + $0x48] sm:$0xe] }
  0xd2   : > { %v1203_v53 = vsel %vm4306_vm5, %v1198_v18, %v1202_v26  ;;  %v1216_v61 = vrot.slane %v1214_v32, 5  ;;  %v1028_v47 = vrot.slane %v1026_v37, 4  ;;  %v1226_v27 = vrot.slane %v1224_v23, 5 }
  0xd3   : > { %v3834_v62 = vcombine.low %v1193_v2, %v1203_v53  ;;  %v1011_v52 = vsel %vm4306_vm5, %v1006_v59, %v1010_v15  ;;  %v1020_v20 = vrot.slane %v1019_v49, 4  ;;  %v1024_v56 = vrot.slane %v1022_v35, 5  ;;  %v5221_v49 = vld [vmem:[%s4217_s22 + $0xa8] sm:$0xf] }
  0xd4   : > { %v3826_v25 = vcombine.low %v1001_v6, %v1011_v52  ;;  %v1221_v11 = vor.u32 %v1220_v39, %v1216_v61  ;;  %v1032_v41 = vshll.u32 %v5170_v34, 16  ;;  %v2999_v37 = vsel %vm2981_vm11, %v5120_v46, %v5052_v40  ;;  %v5236_v52 = vld [vmem:[%s4217_s22 + $0xac] sm:$0xf] }
  0xd5   : > { %2456 = vrot.lane.b32.xlu1 %v3834_v62, %s4163_s26  ;;  %v1217_v60 = vsel %vm4306_vm5, %v1212_v54, %v1216_v61  ;;  %v1025_v8 = vsel %vm4306_vm5, %v1020_v20, %v1024_v56  ;;  %v1029_v55 = vor.u32 %v1028_v47, %v1024_v56  ;;  %v3674_v45 = vrot.slane %v3658_v38, 9  ;;  %v3686_v20 = vld [vmem:[%s4217_s22 + $0x48] sm:$0xf] }
  0xd6   : > { %2440 = vrot.lane.b32.xlu0 %v3826_v25, %s4163_s26  ;;  %v1222_v43 = vrot.slane %v1221_v11, 4  ;;  %v1034_v63 = vrot.slane %v1032_v41, 5  ;;  %v1426_v29 = vrot.slane %v5077_v12, 5  ;;  %v1429_v40 = vrot.slane %v5131_v10, 5  ;;  %v5255_v25 = vld [vmem:[%s4217_s22 + $0xb4] sm:$0xf] }
  0xd7   : > { %v5190_v13 = vpop.permute.xlu1 %2196  ;;  %v1030_v0 = vrot.slane %v1029_v55, 4  ;;  %v3666_v46 = vrot.slane %v3650_v7, 9  ;;  %v1370_v42 = vrot.slane %v5101_v17, 5  ;;  %v1373_v6 = vrot.slane %v5135_v9, 5  ;;  %v5266_v41 = vld [vmem:[%s4217_s22 + $0x4c] sm:$0xf] }
  0xd8   : > { %v1227_v2 = vsel %vm4306_vm5, %v1222_v43, %v1226_v27  ;;  %v1427_v4 = vsel %vm4248_vm2, %v3674_v45, %v1426_v29  ;;  %v1428_v26 = vrot.slane %v1426_v29, 4  ;;  %v3675_v39 = vrot.slane %v3659_v24, 9  ;;  %v5273_v55 = vld [vmem:[%s4217_s22 + $0xb8] sm:$0xf]  ;;  %v3688_v43 = vld [vmem:[%s4217_s22 + $0x54] sm:$0xf] }
  0xd9   : > { %v3835_v12 = vcombine.low %v1217_v60, %v1227_v2  ;;  %v1035_v10 = vsel %vm4306_vm5, %v1030_v0, %v1034_v63  ;;  %v1371_v17 = vsel %vm4248_vm2, %v3666_v46, %v1370_v42  ;;  %v1372_v15 = vrot.slane %v1370_v42, 4  ;;  %v5284_v2 = vld [vmem:[%s4217_s22 + $0x58] sm:$0xf] }
  0xda   : > { %v5202_v58 = vpop.permute.xlu0 %2180  ;;  %v3827_v18 = vcombine.low %v1025_v8, %v1035_v10  ;;  %v1430_v32 = vsel %vm4248_vm2, %v1428_v26, %v1429_v40  ;;  %v2983_v9 = vsel %vm2981_vm11, %v5126_v36, %v5064_v57  ;;  %v3001_v23 = vsel %vm2981_vm11, %v5143_v33, %v5080_v22 }
  0xdb   : > { %2458 = vrot.lane.b32.xlu1 %v3835_v12, %s4163_s26  ;;  %v3850_v59 = vcombine.low %v1427_v4, %v1430_v32  ;;  %v1374_v54 = vsel %vm4248_vm2, %v1372_v15, %v1373_v6  ;;  %v5223_v35 = vpop.permute.xlu1 %2786  ;;  %v1433_v57 = vrot.slane %v5106_v3, 5  ;;  %v1436_v36 = vrot.slane %v5153_v1, 5 }
  0xdc   : > { %2442 = vrot.lane.b32.xlu0 %v3827_v18, %s4163_s26  ;;  %v3842_v53 = vcombine.low %v1371_v17, %v1374_v54  ;;  %v3667_v61 = vrot.slane %v3651_v50, 9  ;;  %v2985_v22 = vsel %vm2981_vm11, %v5158_v44, %v5095_v14  ;;  %v3032_v33 = vsel %vm3014_vm12, %v2999_v37, %v5109_v19  ;;  %v5293_v50 = vld [vmem:[%s4217_s22 + $0xb0] sm:$0x1] }
  0xdd   : > { %v1377_v47 = vrot.slane %v5113_v51, 5  ;;  %v1380_v62 = vrot.slane %v5170_v34, 5  ;;  %v1434_v3 = vsel %vm4248_vm2, %v3675_v39, %v1433_v57  ;;  %v1435_v1 = vrot.slane %v1433_v57, 4 }
  0xde   : > { %v1793_v56 = vshrl.u32 %v5221_v49, 16  ;;  %v1796_v14 = vshll.u32 %v5221_v49, 16  ;;  %v5243_v44 = vpop.permute.xlu0 %2770  ;;  %v3016_v19 = vsel %vm3014_vm12, %v2983_v9, %v5122_v28  ;;  %v5252_v38 = vsel %vm3014_vm12, %v3001_v23, %v5137_v48 }
  0xdf   : > { %2536 = vrot.lane.b32.xlu1 %v3850_v59, %s4164_s27  ;;  %v1378_v51 = vsel %vm4248_vm2, %v3667_v61, %v1377_v47  ;;  %v1379_v34 = vrot.slane %v1377_v47, 4  ;;  %v1437_v11 = vsel %vm4248_vm2, %v1435_v1, %v1436_v36  ;;  %v5262_v27 = vsel %vm3014_vm12, %v2985_v22, %v5150_v5  ;;  %v4116_v47 = vld [vmem:[%s4217_s22 + $0x78] sm:$0xf] }
  0xe0   : > { %2520 = vrot.lane.b32.xlu0 %v3842_v53, %s4164_s27  ;;  %v1806_v28 = vshrl.u32 %v5236_v52, 16  ;;  %v1601_v7 = vshrl.u32 %v3686_v20, 16  ;;  %v3851_v37 = vcombine.low %v1434_v3, %v1437_v11  ;;  %v3866_v60 = vcombine.low %v5221_v49, %v5236_v52 }
  0xe1   : > { %v1381_v48 = vsel %vm4248_vm2, %v1379_v34, %v1380_v62  ;;  %v1604_v8 = vshll.u32 %v3686_v20, 16  ;;  %v1795_v45 = vrot.slane %v1793_v56, 4  ;;  %v1798_v29 = vrot.slane %v1796_v14, 5  ;;  %v4117_v62 = vld [vmem:[%s4217_s22 + $0x7c] sm:$0xf] }
  0xe2   : > { %v3843_v5 = vcombine.low %v1378_v51, %v1381_v48  ;;  %v1817_v0 = vshrl.u32 %v5255_v25, 16  ;;  %v1603_v40 = vrot.slane %v1601_v7, 4  ;;  %v1614_v46 = vshrl.u32 %v5266_v41, 16 }
  0xe3   : > { %v5276_v63 = vpop.permute.xlu1 %2198  ;;  %2538 = vrot.lane.b32.xlu1 %v3851_v37, %s4164_s27  ;;  %v3858_v42 = vcombine.low %v3686_v20, %v5266_v41  ;;  %v1820_v24 = vshll.u32 %v5255_v25, 16  ;;  %v1606_v4 = vrot.slane %v1604_v8, 5  ;;  %v1830_v26 = vshrl.u32 %v5273_v55, 16  ;;  %v5327_v37 = vld [vmem:[%s4217_s22 + $0xbc] sm:$0x1] }
  0xe4   : > { %2522 = vrot.lane.b32.xlu0 %v3843_v5, %s4164_s27  ;;  %v3867_v6 = vcombine.low %v5255_v25, %v5273_v55  ;;  %v1625_v12 = vshrl.u32 %v3688_v43, 16  ;;  %v1819_v17 = vrot.slane %v1817_v0, 4  ;;  %v1628_v15 = vshll.u32 %v3688_v43, 16 }
  0xe5   : > { %v1822_v32 = vrot.slane %v1820_v24, 5  ;;  %v1638_v39 = vshrl.u32 %v5284_v2, 16  ;;  %v3049_v9 = vsel %vm3047_vm13, %v3016_v19, %v5175_v31  ;;  %v3065_v23 = vsel %vm3047_vm13, %v3032_v33, %v5165_v16  ;;  %v5310_v16 = vld [vmem:[%s4217_s22 + $0x50] sm:$0x1] }
  0xe6   : > { %v5290_v10 = vpop.permute.xlu0 %2182  ;;  %v1627_v59 = vrot.slane %v1625_v12, 4  ;;  %v3859_v54 = vcombine.low %v3688_v43, %v5284_v2  ;;  %3971 = vmatprep.mubr.msk.bf16.mxu0 %vm3080_vm14, %v3049_v9  ;;  %v1799_v49 = vor.u32 %v1798_v29, %v1795_v45  ;;  %v1802_v53 = vshll.u32 %v5236_v52, 16  ;;  %3987 = vmatprep.mubr.msk.bf16.mxu1 %vm3080_vm14, %v3065_v23  ;;  %v3738_v12 = vld [vmem:[%s4217_s22 + $0xa8] sm:$0xe] }
  0xe7   : > { %v5295_v18 = vpop.permute.xlu1 %2276  ;;  %2632 = vrot.lane.b32.xlu1 %v3866_v60, %s4165_s28  ;;  %v1808_v31 = vrot.slane %v1806_v28, 4  ;;  %v1812_v57 = vshll.u32 %v5293_v50, 16  ;;  %v1607_v36 = vor.u32 %v1606_v4, %v1603_v40  ;;  %v1610_v61 = vshll.u32 %v5266_v41, 16 }
  0xe8   : > { %2616 = vrot.lane.b32.xlu0 %v3858_v42, %s4165_s28  ;;  %v1630_v33 = vrot.slane %v1628_v15, 5  ;;  %v3768_v20 = vcombine.low %v4116_v47, %v4117_v62  ;;  %v1800_v3 = vrot.slane %v1799_v49, 4  ;;  %v1804_v1 = vrot.slane %v1802_v53, 5 }
  0xe9   : > { %v1814_v14 = vrot.slane %v1812_v57, 5  ;;  %v1608_v19 = vrot.slane %v1607_v36, 4  ;;  %v1612_v51 = vrot.slane %v1610_v61, 5  ;;  %v1616_v34 = vrot.slane %v1614_v46, 4  ;;  %v4119_v57 = vld [vmem:[%s4217_s22 + $0x1c] sm:$0xf] }
  0xea   : > { %v5313_v22 = vpop.permute.xlu0 %2260  ;;  %v1805_v25 = vsel %vm4306_vm5, %v1800_v3, %v1804_v1  ;;  %v1809_v11 = vor.u32 %v1808_v31, %v1804_v1  ;;  %v1620_v28 = vshll.u32 %v5310_v16, 16  ;;  %v3067_v7 = vsel %vm3047_vm13, %v5252_v38, %v5223_v35 }
  0xeb   : > { %v5317_v56 = vpop.permute.xlu1 %2278  ;;  %2634 = vrot.lane.b32.xlu1 %v3867_v6, %s4165_s28  ;;  %v1613_v48 = vsel %vm4306_vm5, %v1608_v19, %v1612_v51  ;;  %v1617_v60 = vor.u32 %v1616_v34, %v1612_v51  ;;  %v3051_v8 = vsel %vm3047_vm13, %v5262_v27, %v5243_v44  ;;  %v1823_v43 = vor.u32 %v1822_v32, %v1819_v17  ;;  %v5344_v44 = vld [vmem:[%s4217_s22 + $0x5c] sm:$0x1]  ;;  %v4120_v19 = vld [vmem:[%s4217_s22 + $0x84] sm:$0xf]  ;;  %v4121_v51 = vld [vmem:[%s4217_s22 + $0x88] sm:$0xf] }
  0xec   : > { %2618 = vrot.lane.b32.xlu0 %v3859_v54, %s4165_s28  ;;  %v1810_v45 = vrot.slane %v1809_v11, 4  ;;  %v1622_v29 = vrot.slane %v1620_v28, 5  ;;  %v1826_v35 = vshll.u32 %v5273_v55, 16  ;;  %v1832_v38 = vrot.slane %v1830_v26, 4  ;;  %3972 = vmatmul.mubr.msk.bf16.vlgmr.msra.gmra.mrb[0].mxu0 %vm3080_vm14, %v3051_v8 }
  0xed   : > { %3988 = vmatmul.mubr.msk.bf16.vlgmr.msra.gmra.mrb[0].mxu1 %vm3080_vm14, %v3067_v7  ;;  %v1618_v40 = vrot.slane %v1617_v60, 4  ;;  %v1824_v46 = vrot.slane %v1823_v43, 4  ;;  %v1836_v42 = vshll.u32 %v5327_v37, 16  ;;  %v1631_v27 = vor.u32 %v1630_v33, %v1627_v59  ;;  %v254_v60 = vld [vmem:[%s4217_s22 + $0xa8] sm:$0xf] }
  0xee   : > { %v5335_v5 = vpop.permute.xlu0 %2262  ;;  %v1815_v24 = vsel %vm4306_vm5, %v1810_v45, %v1814_v14  ;;  %v1828_v4 = vrot.slane %v1826_v35, 5  ;;  %v1634_v26 = vshll.u32 %v5284_v2, 16  ;;  %v1640_v6 = vrot.slane %v1638_v39, 4  ;;  %v4118_v39 = vld [vmem:[%s4217_s22 + $0x18] sm:$0xf] }
  0xef   : > { %v5340_v0 = vpop.permute.xlu1 %2372  ;;  %v3882_v17 = vcombine.low %v1805_v25, %v1815_v24  ;;  %v1623_v15 = vsel %vm4306_vm5, %v1618_v40, %v1622_v29  ;;  %v1632_v32 = vrot.slane %v1631_v27, 4  ;;  %v1838_v59 = vrot.slane %v1836_v42, 5  ;;  %v5384_v29 = vld [vmem:[%s4217_s22 + $0xac] sm:$0xf]  ;;  %v4123_v42 = vld [vmem:[%s4217_s22 + $0x28] sm:$0xf] }
  0xf0   : > { %v3874_v23 = vcombine.low %v1613_v48, %v1623_v15  ;;  %v1833_v54 = vor.u32 %v1832_v38, %v1828_v4  ;;  %v1636_v49 = vrot.slane %v1634_v26, 5  ;;  %v5358_v31 = vsel %vm2800_vm6, %v3768_v20, %v5190_v13  ;;  %v3730_v20 = vld [vmem:[%s4217_s22 + $0x48] sm:$0xe] }
  0xf1   : > { %v3760_v36 = vcombine.low %v4118_v39, %v4119_v57  ;;  %2712 = vrot.lane.b32.xlu1 %v3882_v17, %s4166_s7  ;;  %v1644_v61 = vshll.u32 %v5344_v44, 16  ;;  %v3754_v33 = vrot.slane %v3738_v12, 9  ;;  %v1829_v47 = vsel %vm4306_vm5, %v1824_v46, %v1828_v4  ;;  %v4122_v46 = vld [vmem:[%s4217_s22 + $0x24] sm:$0xf]  ;;  %v5397_v4 = vld [vmem:[%s4217_s22 + $0xb0] sm:$0x1] }
  0xf2   : > { %v5352_v9 = vpop.permute.xlu0 %2356  ;;  %2696 = vrot.lane.b32.xlu0 %v3874_v23, %s4166_s7  ;;  %v1834_v62 = vrot.slane %v1833_v54, 4  ;;  %v1641_v3 = vor.u32 %v1640_v6, %v1636_v49  ;;  %v2038_v13 = vrot.slane %v5236_v52, 5  ;;  %v1637_v1 = vsel %vm4306_vm5, %v1632_v32, %v1636_v49  ;;  %v5416_v39 = vld [vmem:[%s4217_s22 + $0x4c] sm:$0xf]  ;;  %v5419_v57 = vld [vmem:[%s4217_s22 + $0x50] sm:$0x1] }
  0xf3   : > { %v5354_v53 = vpop.permute.xlu1 %2374  ;;  %v1646_v14 = vrot.slane %v1644_v61, 5  ;;  %v3769_v34 = vcombine.low %v4120_v19, %v4121_v51  ;;  %v2041_v25 = vrot.slane %v5293_v50, 5  ;;  %v3746_v43 = vrot.slane %v3730_v20, 9 }
  0xf4   : > { %v1839_v28 = vsel %vm4306_vm5, %v1834_v62, %v1838_v59  ;;  %v1642_v7 = vrot.slane %v1641_v3, 4  ;;  %v2039_v52 = vsel %vm4248_vm2, %v3754_v33, %v2038_v13  ;;  %v2040_v48 = vrot.slane %v2038_v13, 4 }
  0xf5   : > { %v3883_v8 = vcombine.low %v1829_v47, %v1839_v28  ;;  %v1982_v45 = vrot.slane %v5266_v41, 5  ;;  %v1985_v50 = vrot.slane %v5310_v16, 5  ;;  %v2809_v38 = vsel %vm2800_vm6, %v3760_v36, %v5202_v58  ;;  %v238_v41 = vld [vmem:[%s4217_s22 + $0x48] sm:$0xf]  ;;  %v3739_v28 = vld [vmem:[%s4217_s22 + $0xb4] sm:$0xe] }
  0xf6   : > { %v5374_v11 = vpop.permute.xlu0 %2358  ;;  %v1647_v40 = vsel %vm4306_vm5, %v1642_v7, %v1646_v14  ;;  %v3761_v27 = vcombine.low %v4122_v46, %v4123_v42  ;;  %v2042_v24 = vsel %vm4248_vm2, %v2040_v48, %v2041_v25  ;;  %v614_v17 = vshrl.u32 %v254_v60, 16 }
  0xf7   : > { %2714 = vrot.lane.b32.xlu1 %v3883_v8, %s4166_s7  ;;  %v3875_v16 = vcombine.low %v1637_v1, %v1647_v40  ;;  %v3898_v26 = vcombine.low %v2039_v52, %v2042_v24  ;;  %v1983_v58 = vsel %vm4248_vm2, %v3746_v43, %v1982_v45  ;;  %v1984_v6 = vrot.slane %v1982_v45, 4  ;;  %v3731_v40 = vld [vmem:[%s4217_s22 + $0x54] sm:$0xe] }
  0xf8   : > { %v5386_v35 = vpop.permute.xlu1 %2452  ;;  %v617_v15 = vshll.u32 %v254_v60, 16  ;;  %v623_v32 = vshll.u32 %v5384_v29, 16  ;;  %v627_v23 = vshrl.u32 %v5384_v29, 16  ;;  %v5410_v54 = vsel %vm2800_vm6, %v3769_v34, %v5276_v63 }
  0xf9   : > { %2698 = vrot.lane.b32.xlu0 %v3875_v16, %s4166_s7  ;;  %v1986_v59 = vsel %vm4248_vm2, %v1984_v6, %v1985_v50  ;;  %v633_v49 = vshll.u32 %v5397_v4, 16  ;;  %v422_v36 = vshrl.u32 %v238_v41, 16  ;;  %v616_v47 = vrot.slane %v614_v17, 4 }
  0xfa   : > { %v5403_v12 = vpop.permute.xlu0 %2436  ;;  %v3890_v33 = vcombine.low %v1983_v58, %v1986_v59  ;;  %v619_v62 = vrot.slane %v617_v15, 5  ;;  %v625_v3 = vrot.slane %v623_v32, 5  ;;  %v5425_v63 = vsel %vm2800_vm6, %v3761_v27, %v5290_v10  ;;  %v5461_v59 = vld [vmem:[%s4217_s22 + $0xb4] sm:$0xf] }
  0xfb   : > { %2792 = vrot.lane.b32.xlu1 %v3898_v26, %s4167_s10  ;;  %v629_v13 = vrot.slane %v627_v23, 4  ;;  %v424_v20 = vrot.slane %v422_v36, 4  ;;  %v425_v1 = vshll.u32 %v238_v41, 16  ;;  %v431_v51 = vshll.u32 %v5416_v39, 16 }
  0xfc   : > { %v5421_v61 = vpop.permute.xlu1 %2454  ;;  %v620_v19 = vor.u32 %v619_v62, %v616_v47  ;;  %v435_v34 = vshrl.u32 %v5416_v39, 16  ;;  %v441_v25 = vshll.u32 %v5419_v57, 16  ;;  %v5438_v10 = vsel %vm2849_vm7, %v5358_v31, %v5295_v18 }
  0xfd   : > { %2776 = vrot.lane.b32.xlu0 %v3890_v33, %s4167_s10  ;;  %v630_v7 = vor.u32 %v629_v13, %v625_v3  ;;  %v635_v52 = vrot.slane %v633_v49, 5  ;;  %v427_v48 = vrot.slane %v425_v1, 5  ;;  %v5444_v8 = vsel %vm2849_vm7, %v2809_v38, %v5313_v22  ;;  %v5469_v33 = vld [vmem:[%s4217_s22 + $0xb8] sm:$0xf]  ;;  %v5481_v1 = vld [vmem:[%s4217_s22 + $0xbc] sm:$0x1] }
  0xfe   : > { %v5428_v14 = vpop.permute.xlu0 %2438  ;;  %v621_v43 = vrot.slane %v620_v19, 4  ;;  %v433_v45 = vrot.slane %v431_v51, 5  ;;  %v437_v50 = vrot.slane %v435_v34, 4  ;;  %v443_v27 = vrot.slane %v441_v25, 5 }
  0xff   : > { %v631_v46 = vrot.slane %v630_v7, 4  ;;  %v428_v42 = vor.u32 %v427_v48, %v424_v20  ;;  %v3755_v24 = vrot.slane %v3739_v28, 9  ;;  %v2045_v16 = vrot.slane %v5273_v55, 5  ;;  %v5490_v28 = vld [vmem:[%s4217_s22 + $0x58] sm:$0xf] }
 0x100   : > { %v5440_v60 = vpop.permute.xlu1 %2532  ;;  %v626_v31 = vsel %vm4306_vm5, %v621_v43, %v625_v3  ;;  %v438_v41 = vor.u32 %v437_v50, %v433_v45  ;;  %v2048_v22 = vrot.slane %v5327_v37, 5  ;;  %v3747_v58 = vrot.slane %v3731_v40, 9 }
 0x101   : > { %v636_v38 = vsel %vm4306_vm5, %v631_v46, %v635_v52  ;;  %v429_v26 = vrot.slane %v428_v42, 4  ;;  %v1989_v6 = vrot.slane %v5284_v2, 5  ;;  %v2046_v23 = vsel %vm4248_vm2, %v3755_v24, %v2045_v16  ;;  %v5500_v46 = vld [vmem:[%s4217_s22 + $0x5c] sm:$0x1] }
 0x102   : > { %v5447_v18 = vpop.permute.xlu0 %2516  ;;  %v3788_v15 = vcombine.low %v626_v31, %v636_v38  ;;  %v439_v32 = vrot.slane %v438_v41, 4  ;;  %v2047_v55 = vrot.slane %v2045_v16, 4  ;;  %v1992_v36 = vrot.slane %v5344_v44, 5  ;;  %v5484_v44 = vld [vmem:[%s4217_s22 + $0x54] sm:$0xf] }
 0x103   : > { %v434_v37 = vsel %vm4306_vm5, %v429_v26, %v433_v45  ;;  %v1990_v49 = vsel %vm4248_vm2, %v3747_v58, %v1989_v6  ;;  %v1991_v2 = vrot.slane %v1989_v6, 4  ;;  %v831_v62 = vrot.slane %v5397_v4, 5 }
 0x104   : > { %v5456_v17 = vpop.permute.xlu1 %2534  ;;  %2204 = vrot.lane.b32.xlu1 %v3788_v15, %s4162_s25  ;;  %v444_v3 = vsel %vm4306_vm5, %v439_v32, %v443_v27  ;;  %v775_v13 = vrot.slane %v5419_v57, 5  ;;  %v2049_v20 = vsel %vm4248_vm2, %v2047_v55, %v2048_v22  ;;  %v638_v25 = vshrl.u32 %v5461_v59, 16  ;;  %v675_v15 = vld [vmem:[%s4217_s22 + $0xa8] sm:$0xe] }
 0x105   : > { %v3780_v19 = vcombine.low %v434_v37, %v444_v3  ;;  %v3899_v51 = vcombine.low %v2046_v23, %v2049_v20  ;;  %v1993_v34 = vsel %vm4248_vm2, %v1991_v2, %v1992_v36  ;;  %v641_v48 = vshll.u32 %v5461_v59, 16  ;;  %v667_v2 = vld [vmem:[%s4217_s22 + $0x48] sm:$0xe] }
 0x106   : > { %v5471_v47 = vpop.permute.xlu0 %2518  ;;  %v3891_v52 = vcombine.low %v1990_v49, %v1993_v34  ;;  %v647_v43 = vshll.u32 %v5469_v33, 16  ;;  %v651_v45 = vshrl.u32 %v5469_v33, 16  ;;  %v640_v50 = vrot.slane %v638_v25, 4 }
 0x107   : > { %2188 = vrot.lane.b32.xlu0 %v3780_v19, %s4162_s25  ;;  %v657_v40 = vshll.u32 %v5481_v1, 16  ;;  %v446_v42 = vshrl.u32 %v5484_v44, 16  ;;  %v449_v27 = vshll.u32 %v5484_v44, 16  ;;  %v643_v31 = vrot.slane %v641_v48, 5 }
 0x108   : > { %v5492_v7 = vpop.permute.xlu1 %2628  ;;  %2794 = vrot.lane.b32.xlu1 %v3899_v51, %s4167_s10  ;;  %v649_v41 = vrot.slane %v647_v43, 5  ;;  %v653_v16 = vrot.slane %v651_v45, 4  ;;  %v455_v22 = vshll.u32 %v5490_v28, 16  ;;  %v459_v6 = vshrl.u32 %v5490_v28, 16 }
 0x109   : > { %v659_v38 = vrot.slane %v657_v40, 5  ;;  %v448_v26 = vrot.slane %v446_v42, 4  ;;  %v451_v58 = vrot.slane %v449_v27, 5  ;;  %v644_v23 = vor.u32 %v643_v31, %v640_v50  ;;  %v676_v42 = vld [vmem:[%s4217_s22 + $0xb4] sm:$0xe] }
 0x10a   : > { %v5504_v24 = vpop.permute.xlu0 %2612  ;;  %v654_v55 = vor.u32 %v653_v16, %v649_v41  ;;  %v457_v37 = vrot.slane %v455_v22, 5  ;;  %v465_v49 = vshll.u32 %v5500_v46, 16  ;;  %v2873_v36 = vsel %vm2849_vm7, %v5410_v54, %v5317_v56 }
 0x10b   : > { %v2857_v3 = vsel %vm2849_vm7, %v5425_v63, %v5335_v5  ;;  %2778 = vrot.lane.b32.xlu0 %v3891_v52, %s4167_s10  ;;  %v452_v20 = vor.u32 %v451_v58, %v448_v26  ;;  %v461_v19 = vrot.slane %v459_v6, 4  ;;  %v645_v51 = vrot.slane %v644_v23, 4 }
 0x10c   : > { %v5510_v32 = vpop.permute.xlu1 %2630  ;;  %v655_v34 = vrot.slane %v654_v55, 4  ;;  %v467_v25 = vrot.slane %v465_v49, 5  ;;  %v3596_v48 = vrot.slane %v675_v15, 9  ;;  %v828_v56 = vrot.slane %v5384_v29, 5 }
 0x10d   : > { %v453_v45 = vrot.slane %v452_v20, 4  ;;  %v462_v50 = vor.u32 %v461_v19, %v457_v37  ;;  %v3588_v54 = vrot.slane %v667_v2, 9  ;;  %v2904_v5 = vsel %vm2882_vm8, %v5438_v10, %v5340_v0  ;;  %v668_v0 = vld [vmem:[%s4217_s22 + $0x54] sm:$0xe] }
 0x10e   : > { %v5521_v43 = vpop.permute.xlu0 %2614  ;;  %v650_v63 = vsel %vm4306_vm5, %v645_v51, %v649_v41  ;;  %v660_v52 = vsel %vm4306_vm5, %v655_v34, %v659_v38  ;;  %v772_v40 = vrot.slane %v5416_v39, 5  ;;  %v2888_v27 = vsel %vm2882_vm8, %v5444_v8, %v5352_v9  ;;  %v3610_v51 = vld [vmem:[%s4217_s22 + $0x54] sm:$0xf]  ;;  %v5577_v34 = vld [vmem:[%s4217_s22 + $0xb8] sm:$0xf] }
 0x10f   : > { %v3789_v31 = vcombine.low %v650_v63, %v660_v52  ;;  %v458_v29 = vsel %vm4306_vm5, %v453_v45, %v457_v37  ;;  %v463_v16 = vrot.slane %v462_v50, 4  ;;  %v829_v41 = vsel %vm4248_vm2, %v3596_v48, %v828_v56  ;;  %v3626_v37 = vld [vmem:[%s4217_s22 + $0xb4] sm:$0xf]  ;;  %v3628_v52 = vld [vmem:[%s4217_s22 + $0xc0] sm:$0xf] }
 0x110   : > { %v830_v22 = vrot.slane %v828_v56, 4  ;;  %v773_v39 = vsel %vm4248_vm2, %v3588_v54, %v772_v40  ;;  %v774_v38 = vrot.slane %v772_v40, 4  ;;  %v3597_v8 = vrot.slane %v676_v42, 9  ;;  %v5586_v56 = vld [vmem:[%s4217_s22 + $0x58] sm:$0xf] }
 0x111   : > { %v5539_v10 = vpop.permute.xlu1 %2708  ;;  %2206 = vrot.lane.b32.xlu1 %v3789_v31, %s4162_s25  ;;  %v468_v9 = vsel %vm4306_vm5, %v463_v16, %v467_v25  ;;  %v835_v26 = vrot.slane %v5469_v33, 5  ;;  %v838_v58 = vrot.slane %v5481_v1, 5  ;;  %v3589_v55 = vrot.slane %v668_v0, 9 }
 0x112   : > { %v3781_v6 = vcombine.low %v458_v29, %v468_v9  ;;  %v832_v15 = vsel %vm4248_vm2, %v830_v22, %v831_v62  ;;  %v776_v23 = vsel %vm4248_vm2, %v774_v38, %v775_v13  ;;  %v5559_v49 = vpop.permute.xlu0 %2692  ;;  %v2906_v1 = vsel %vm2882_vm8, %v2873_v36, %v5354_v53 }
 0x113   : > { %v3804_v2 = vcombine.low %v829_v41, %v832_v15  ;;  %v836_v4 = vsel %vm4248_vm2, %v3597_v8, %v835_v26  ;;  %v837_v20 = vrot.slane %v835_v26, 4  ;;  %v2890_v57 = vsel %vm2882_vm8, %v2857_v3, %v5374_v11  ;;  %v5609_v41 = vld [vmem:[%s4217_s22 + $0xc4] sm:$0xf]  ;;  %v5620_v15 = vld [vmem:[%s4217_s22 + $0xbc] sm:$0x1] }
 0x114   : > { %2190 = vrot.lane.b32.xlu0 %v3781_v6, %s4162_s25  ;;  %v3796_v62 = vcombine.low %v773_v39, %v776_v23  ;;  %v779_v13 = vrot.slane %v5490_v28, 5  ;;  %v782_v19 = vrot.slane %v5500_v46, 5  ;;  %v2937_v53 = vsel %vm2915_vm9, %v2904_v5, %v5386_v35 }
 0x115   : > { %2284 = vrot.lane.b32.xlu1 %v3804_v2, %s4161_s24  ;;  %v839_v36 = vsel %vm4248_vm2, %v837_v20, %v838_v58  ;;  %v1229_v25 = vshrl.u32 %v3626_v37, 16  ;;  %v1232_v11 = vshll.u32 %v3626_v37, 16  ;;  %v5579_v3 = vpop.permute.xlu1 %2710  ;;  %v2921_v46 = vsel %vm2915_vm9, %v2888_v27, %v5403_v12 }
 0x116   : > { %v3805_v48 = vcombine.low %v836_v4, %v839_v36  ;;  %v780_v45 = vsel %vm4248_vm2, %v3589_v55, %v779_v13  ;;  %v781_v50 = vrot.slane %v779_v13, 4  ;;  %v5590_v35 = vsel %vm2915_vm9, %v2906_v1, %v5421_v61  ;;  %v3612_v61 = vld [vmem:[%s4217_s22 + $0x60] sm:$0xf] }
 0x117   : > { %v5594_v54 = vsel %vm2915_vm9, %v2890_v57, %v5428_v14  ;;  %v1037_v5 = vshrl.u32 %v3610_v51, 16  ;;  %v1040_v63 = vshll.u32 %v3610_v51, 16  ;;  %v1231_v40 = vrot.slane %v1229_v25, 4  ;;  %v5603_v31 = vpop.permute.xlu0 %2694 }
 0x118   : > { %2268 = vrot.lane.b32.xlu0 %v3796_v62, %s4161_s24  ;;  %v783_v12 = vsel %vm4248_vm2, %v781_v50, %v782_v19  ;;  %v1242_v42 = vshrl.u32 %v5577_v34, 16  ;;  %v3820_v27 = vcombine.low %v3626_v37, %v5577_v34  ;;  %v1234_v29 = vrot.slane %v1232_v11, 5 }
 0x119   : > { %2286 = vrot.lane.b32.xlu1 %v3805_v48, %s4161_s24  ;;  %v3797_v14 = vcombine.low %v780_v45, %v783_v12  ;;  %v1050_v16 = vshrl.u32 %v5586_v56, 16  ;;  %v3812_v0 = vcombine.low %v3610_v51, %v5586_v56  ;;  %v1039_v22 = vrot.slane %v1037_v5, 4  ;;  %v5622_v23 = vpop.permute.xlu1 %2788 }
 0x11a   : > { %v1042_v39 = vrot.slane %v1040_v63, 5  ;;  %v1253_v38 = vshrl.u32 %v3628_v52, 16  ;;  %v1256_v9 = vshll.u32 %v3628_v52, 16  ;;  %v5613_v8 = vsel %vm2948_vm10, %v2937_v53, %v5440_v60  ;;  %v5628_v60 = vld [vmem:[%s4217_s22 + $0x5c] sm:$0x1] }
 0x11b   : > { %v5617_v26 = vsel %vm2948_vm10, %v2921_v46, %v5447_v18  ;;  %v1061_v58 = vshrl.u32 %v3612_v61, 16  ;;  %v1064_v6 = vshll.u32 %v3612_v61, 16  ;;  %v1266_v1 = vshrl.u32 %v5609_v41, 16  ;;  %v5632_v18 = vld [vmem:[%s4217_s22 + $0x64] sm:$0xf]  ;;  %v5637_v36 = vpop.permute.xlu0 %2772 }
 0x11c   : > { %2270 = vrot.lane.b32.xlu0 %v3797_v14, %s4161_s24  ;;  %v1255_v55 = vrot.slane %v1253_v38, 4  ;;  %v1258_v37 = vrot.slane %v1256_v9, 5  ;;  %v3821_v2 = vcombine.low %v3628_v52, %v5609_v41  ;;  %v1235_v57 = vor.u32 %v1234_v29, %v1231_v40  ;;  %v5644_v52 = vld [vmem:[%s4217_s22 + $0xc8] sm:$0x1] }
 0x11d   : > { %2380 = vrot.lane.b32.xlu1 %v3820_v27, %s4160_s23  ;;  %v1063_v4 = vrot.slane %v1061_v58, 4  ;;  %v1066_v20 = vrot.slane %v1064_v6, 5  ;;  %v1238_v62 = vshll.u32 %v5577_v34, 16  ;;  %v1244_v13 = vrot.slane %v1242_v42, 4 }
 0x11e   : > { %v1248_v19 = vshll.u32 %v5620_v15, 16  ;;  %v1043_v51 = vor.u32 %v1042_v39, %v1039_v22  ;;  %v1046_v53 = vshll.u32 %v5586_v56, 16  ;;  %v1236_v25 = vrot.slane %v1235_v57, 4  ;;  %v5657_v57 = vld [vmem:[%s4217_s22 + $0x68] sm:$0x1] }
 0x11f   : > { %v1240_v11 = vrot.slane %v1238_v62, 5  ;;  %v1052_v46 = vrot.slane %v1050_v16, 4  ;;  %v1056_v48 = vshll.u32 %v5628_v60, 16  ;;  %v1074_v45 = vshrl.u32 %v5632_v18, 16 }
 0x120   : > { %2364 = vrot.lane.b32.xlu0 %v3812_v0, %s4160_s23  ;;  %v3813_v50 = vcombine.low %v3612_v61, %v5632_v18  ;;  %v1044_v5 = vrot.slane %v1043_v51, 4  ;;  %v1048_v63 = vrot.slane %v1046_v53, 5  ;;  %v1250_v42 = vrot.slane %v1248_v19, 5 }
 0x121   : > { %2382 = vrot.lane.b32.xlu1 %v3821_v2, %s4160_s23  ;;  %v1241_v12 = vsel %vm4306_vm5, %v1236_v25, %v1240_v11  ;;  %v1245_v40 = vor.u32 %v1244_v13, %v1240_v11  ;;  %v1058_v27 = vrot.slane %v1056_v48, 5  ;;  %v5649_v14 = vpop.permute.xlu1 %2200  ;;  %v1259_v61 = vor.u32 %v1258_v37, %v1255_v55 }
 0x122   : > { %v1049_v29 = vsel %vm4306_vm5, %v1044_v5, %v1048_v63  ;;  %v1053_v16 = vor.u32 %v1052_v46, %v1048_v63  ;;  %v1262_v0 = vshll.u32 %v5609_v41, 16  ;;  %v1268_v39 = vrot.slane %v1266_v1, 4 }
 0x123   : > { %v1246_v22 = vrot.slane %v1245_v40, 4  ;;  %v1272_v38 = vshll.u32 %v5644_v52, 16  ;;  %v1067_v9 = vor.u32 %v1066_v20, %v1063_v4  ;;  %v1260_v6 = vrot.slane %v1259_v61, 4  ;;  %v3660_v20 = vld [vmem:[%s4217_s22 + $0xb4] sm:$0xe] }
 0x124   : > { %2366 = vrot.lane.b32.xlu0 %v3813_v50, %s4160_s23  ;;  %v1054_v58 = vrot.slane %v1053_v16, 4  ;;  %v1264_v2 = vrot.slane %v1262_v0, 5  ;;  %v1070_v62 = vshll.u32 %v5632_v18, 16  ;;  %v5660_v13 = vpop.permute.xlu0 %2184  ;;  %v2972_v55 = vsel %vm2948_vm10, %v5590_v35, %v5456_v17  ;;  %v3652_v35 = vld [vmem:[%s4217_s22 + $0x54] sm:$0xe] }
 0x125   : > { %v1251_v37 = vsel %vm4306_vm5, %v1246_v22, %v1250_v42  ;;  %v1068_v1 = vrot.slane %v1067_v9, 4  ;;  %v1076_v4 = vrot.slane %v1074_v45, 4  ;;  %v1274_v25 = vrot.slane %v1272_v38, 5  ;;  %v5675_v50 = vpop.permute.xlu1 %2790 }
 0x126   : > { %v3836_v19 = vcombine.low %v1241_v12, %v1251_v37  ;;  %v1059_v51 = vsel %vm4306_vm5, %v1054_v58, %v1058_v27  ;;  %v1269_v53 = vor.u32 %v1268_v39, %v1264_v2  ;;  %v2956_v11 = vsel %vm2948_vm10, %v5594_v54, %v5471_v47  ;;  %v3661_v27 = vld [vmem:[%s4217_s22 + $0xc0] sm:$0xe] }
 0x127   : > { %v3828_v46 = vcombine.low %v1049_v29, %v1059_v51  ;;  %v1072_v48 = vrot.slane %v1070_v62, 5  ;;  %v1080_v17 = vshll.u32 %v5657_v57, 16  ;;  %v1265_v45 = vsel %vm4306_vm5, %v1260_v6, %v1264_v2  ;;  %v3653_v58 = vld [vmem:[%s4217_s22 + $0x60] sm:$0xe] }
 0x128   : > { %2460 = vrot.lane.b32.xlu1 %v3836_v19, %s4163_s26  ;;  %v1270_v5 = vrot.slane %v1269_v53, 4  ;;  %v3676_v63 = vrot.slane %v3660_v20, 9  ;;  %v1440_v12 = vrot.slane %v5577_v34, 5  ;;  %v1443_v42 = vrot.slane %v5620_v15, 5  ;;  %v5690_v34 = vpop.permute.xlu0 %2774  ;;  %v3706_v20 = vld [vmem:[%s4217_s22 + $0xc0] sm:$0xf] }
 0x129   : > { %2444 = vrot.lane.b32.xlu0 %v3828_v46, %s4163_s26  ;;  %v1073_v47 = vsel %vm4306_vm5, %v1068_v1, %v1072_v48  ;;  %v1077_v54 = vor.u32 %v1076_v4, %v1072_v48  ;;  %v1082_v40 = vrot.slane %v1080_v17, 5  ;;  %v3668_v0 = vrot.slane %v3652_v35, 9  ;;  %v5720_v46 = vld [vmem:[%s4217_s22 + $0x60] sm:$0xf]  ;;  %v5733_v17 = vld [vmem:[%s4217_s22 + $0xc4] sm:$0xf] }
 0x12a   : > { %v1275_v29 = vsel %vm4306_vm5, %v1270_v5, %v1274_v25  ;;  %v1441_v16 = vsel %vm4248_vm2, %v3676_v63, %v1440_v12  ;;  %v1442_v61 = vrot.slane %v1440_v12, 4  ;;  %v1384_v38 = vrot.slane %v5586_v56, 5 }
 0x12b   : > { %v3837_v22 = vcombine.low %v1265_v45, %v1275_v29  ;;  %v1078_v39 = vrot.slane %v1077_v54, 4  ;;  %v1387_v9 = vrot.slane %v5628_v60, 5  ;;  %v3003_v15 = vsel %vm2981_vm11, %v5613_v8, %v5492_v7 }
 0x12c   : > { %v2987_v6 = vsel %vm2981_vm11, %v5617_v26, %v5504_v24  ;;  %v1444_v2 = vsel %vm4248_vm2, %v1442_v61, %v1443_v42  ;;  %v3677_v62 = vrot.slane %v3661_v27, 9  ;;  %v1385_v37 = vsel %vm4248_vm2, %v3668_v0, %v1384_v38  ;;  %v5760_v0 = vld [vmem:[%s4217_s22 + $0x6c] sm:$0xf] }
 0x12d   : > { %2462 = vrot.lane.b32.xlu1 %v3837_v22, %s4163_s26  ;;  %v1083_v56 = vsel %vm4306_vm5, %v1078_v39, %v1082_v40  ;;  %v3852_v60 = vcombine.low %v1441_v16, %v1444_v2  ;;  %v1386_v1 = vrot.slane %v1384_v38, 4  ;;  %v1447_v24 = vrot.slane %v5609_v41, 5  ;;  %v5770_v38 = vld [vmem:[%s4217_s22 + $0xd0] sm:$0xf] }
 0x12e   : > { %v3829_v8 = vcombine.low %v1073_v47, %v1083_v56  ;;  %v1450_v26 = vrot.slane %v5644_v52, 5  ;;  %v3669_v4 = vrot.slane %v3653_v58, 9  ;;  %v3005_v19 = vsel %vm2981_vm11, %v2972_v55, %v5510_v32  ;;  %v3708_v47 = vld [vmem:[%s4217_s22 + $0xcc] sm:$0xf]  ;;  %v5773_v58 = vld [vmem:[%s4217_s22 + $0x70] sm:$0xf] }
 0x12f   : > { %v5708_v7 = vpop.permute.xlu1 %2202  ;;  %v1388_v51 = vsel %vm4248_vm2, %v1386_v1, %v1387_v9  ;;  %v1391_v53 = vrot.slane %v5632_v18, 5  ;;  %v1394_v25 = vrot.slane %v5657_v57, 5  ;;  %v2989_v41 = vsel %vm2981_vm11, %v2956_v11, %v5521_v43 }
 0x130   : > { %2446 = vrot.lane.b32.xlu0 %v3829_v8, %s4163_s26  ;;  %v3844_v52 = vcombine.low %v1385_v37, %v1388_v51  ;;  %v1448_v48 = vsel %vm4248_vm2, %v3677_v62, %v1447_v24  ;;  %v1449_v32 = vrot.slane %v1447_v24, 4  ;;  %v1841_v35 = vshrl.u32 %v3706_v20, 16  ;;  %v5784_v37 = vld [vmem:[%s4217_s22 + $0xc8] sm:$0x1]  ;;  %s3930_s26 = sshll.u32 %s6100_s15, 4 }
 0x131   : > { %2540 = vrot.lane.b32.xlu1 %v3852_v60, %s4164_s27  ;;  %v1392_v18 = vsel %vm4248_vm2, %v3669_v4, %v1391_v53  ;;  %v1393_v57 = vrot.slane %v1391_v53, 4  ;;  %v1844_v45 = vshll.u32 %v3706_v20, 16  ;;  %v3036_v11 = vsel %vm3014_vm12, %v3003_v15, %v5539_v10  ;;  %s219_s6 = scalar_lea.vmem %s6090_s4, %s3930_s26 }
 0x132   : > { %v5727_v55 = vpop.permute.xlu0 %2186  ;;  %v3020_v5 = vsel %vm3014_vm12, %v2987_v6, %v5559_v49  ;;  %v1451_v63 = vsel %vm4248_vm2, %v1449_v32, %v1450_v26  ;;  %v1649_v12 = vshrl.u32 %v5720_v46, 16  ;;  %v3038_v42 = vsel %vm3014_vm12, %v3005_v19, %v5579_v3  ;;  %v5754_v49 = vld [vmem:[%s4217_s22 + $0x64] sm:$0xf] }
 0x133   : > { %v5735_v43 = vpop.permute.xlu1 %2280  ;;  %v3853_v54 = vcombine.low %v1448_v48, %v1451_v63  ;;  %v1395_v40 = vsel %vm4248_vm2, %v1393_v57, %v1394_v25  ;;  %v5751_v10 = vsel %vm3014_vm12, %v2989_v41, %v5603_v31  ;;  %v1843_v29 = vrot.slane %v1841_v35, 4 }
 0x134   : > { %2524 = vrot.lane.b32.xlu0 %v3844_v52, %s4164_s27  ;;  %v3845_v27 = vcombine.low %v1392_v18, %v1395_v40  ;;  %v3868_v16 = vcombine.low %v3706_v20, %v5733_v17  ;;  %v1652_v61 = vshll.u32 %v5720_v46, 16  ;;  %v1846_v3 = vrot.slane %v1844_v45, 5 }
 0x135   : > { %2542 = vrot.lane.b32.xlu1 %v3853_v54, %s4164_s27  ;;  %v3069_v31 = vsel %vm3047_vm13, %v3036_v11, %v5622_v23  ;;  %v3053_v39 = vsel %vm3047_vm13, %v3020_v5, %v5637_v36  ;;  %v1865_v9 = vshrl.u32 %v3708_v47, 16  ;;  %v1854_v15 = vshrl.u32 %v5733_v17, 16 }
 0x136   : > { %v5762_v22 = vpop.permute.xlu0 %2264  ;;  %v1651_v6 = vrot.slane %v1649_v12, 4  ;;  %v1662_v2 = vshrl.u32 %v5754_v49, 16  ;;  %v1868_v62 = vshll.u32 %v3708_v47, 16  ;;  %3991 = vmatprep.mubr.msk.bf16.mxu1 %vm3080_vm14, %v3069_v31  ;;  %3975 = vmatprep.mubr.msk.bf16.mxu0 %vm3080_vm14, %v3053_v39  ;;  %v1654_v56 = vrot.slane %v1652_v61, 5  ;;  %v5815_v61 = vld [vmem:[%s4217_s22 + $0xd4] sm:$0x1] }
 0x137   : > { %v3860_v23 = vcombine.low %v5720_v46, %v5754_v49  ;;  %v1673_v36 = vshrl.u32 %v5760_v0, 16  ;;  %v1676_v60 = vshll.u32 %v5760_v0, 16  ;;  %v1867_v8 = vrot.slane %v1865_v9, 4  ;;  %v5799_v46 = vld [vmem:[%s4217_s22 + $0x68] sm:$0x1] }
 0x138   : > { %v5786_v1 = vpop.permute.xlu1 %2282  ;;  %2526 = vrot.lane.b32.xlu0 %v3845_v27, %s4164_s27  ;;  %v1878_v24 = vshrl.u32 %v5770_v38, 16  ;;  %v3869_v26 = vcombine.low %v3708_v47, %v5770_v38  ;;  %v1686_v4 = vshrl.u32 %v5773_v58, 16  ;;  %v1870_v19 = vrot.slane %v1868_v62, 5 }
 0x139   : > { %2636 = vrot.lane.b32.xlu1 %v3868_v16, %s4165_s28  ;;  %v3861_v51 = vcombine.low %v5760_v0, %v5773_v58  ;;  %v1847_v53 = vor.u32 %v1846_v3, %v1843_v29  ;;  %v1850_v25 = vshll.u32 %v5733_v17, 16  ;;  %v1675_v41 = vrot.slane %v1673_v36, 4 }
 0x13a   : > { %v5792_v20 = vpop.permute.xlu0 %2266  ;;  %v1678_v52 = vrot.slane %v1676_v60, 5  ;;  %v1856_v48 = vrot.slane %v1854_v15, 4  ;;  %v1860_v32 = vshll.u32 %v5784_v37, 16  ;;  %v1655_v35 = vor.u32 %v1654_v56, %v1651_v6  ;;  %v5828_v56 = vld [vmem:[%s4217_s22 + $0x74] sm:$0x1] }
 0x13b   : > { %v1848_v18 = vrot.slane %v1847_v53, 4  ;;  %v1852_v57 = vrot.slane %v1850_v25, 5  ;;  %v1658_v45 = vshll.u32 %v5754_v49, 16  ;;  %v1664_v63 = vrot.slane %v1662_v2, 4  ;;  %v3740_v53 = vld [vmem:[%s4217_s22 + $0xc0] sm:$0xe] }
 0x13c   : > { %v5803_v11 = vpop.permute.xlu1 %2376  ;;  %2620 = vrot.lane.b32.xlu0 %v3860_v23, %s4165_s28  ;;  %v1862_v5 = vrot.slane %v1860_v32, 5  ;;  %v1668_v12 = vshll.u32 %v5799_v46, 16  ;;  %v3071_v47 = vsel %vm3047_vm13, %v3038_v42, %v5675_v50  ;;  %v1656_v29 = vrot.slane %v1655_v35, 4 }
 0x13d   : > { %2638 = vrot.lane.b32.xlu1 %v3869_v26, %s4165_s28  ;;  %v1853_v40 = vsel %vm4306_vm5, %v1848_v18, %v1852_v57  ;;  %v1857_v27 = vor.u32 %v1856_v48, %v1852_v57  ;;  %v1660_v16 = vrot.slane %v1658_v45, 5  ;;  %3992 = vmatmul.mubr.msk.bf16.gmra.mrb[4].mxu1 %vm3080_vm14, %v3071_v47  ;;  %v3055_v50 = vsel %vm3047_vm13, %v5751_v10, %v5690_v34  ;;  %v3732_v57 = vld [vmem:[%s4217_s22 + $0x60] sm:$0xe] }
 0x13e   : > { %v5809_v54 = vpop.permute.xlu0 %2360  ;;  %v1670_v0 = vrot.slane %v1668_v12, 5  ;;  %v1871_v42 = vor.u32 %v1870_v19, %v1867_v8  ;;  %v1874_v3 = vshll.u32 %v5770_v38, 16  ;;  %v1880_v15 = vrot.slane %v1878_v24, 4  ;;  %3976 = vmatmul.mubr.msk.bf16.gmra.mrb[4].mxu0 %vm3080_vm14, %v3055_v50 }
 0x13f   : > { %v1858_v31 = vrot.slane %v1857_v27, 4  ;;  %v1661_v39 = vsel %vm4306_vm5, %v1656_v29, %v1660_v16  ;;  %v1665_v9 = vor.u32 %v1664_v63, %v1660_v16  ;;  %v1884_v62 = vshll.u32 %v5815_v61, 16 }
 0x140   : > { %2622 = vrot.lane.b32.xlu0 %v3861_v51, %s4165_s28  ;;  %v1872_v6 = vrot.slane %v1871_v42, 4  ;;  %v1876_v2 = vrot.slane %v1874_v3, 5  ;;  %v1679_v34 = vor.u32 %v1678_v52, %v1675_v41  ;;  %v5830_v10 = vpop.permute.xlu1 %2378  ;;  %v1682_v60 = vshll.u32 %v5773_v58, 16 }
 0x141   : > { %v1863_v23 = vsel %vm4306_vm5, %v1858_v31, %v1862_v5  ;;  %v1666_v36 = vrot.slane %v1665_v9, 4  ;;  %v1688_v8 = vrot.slane %v1686_v4, 4  ;;  %v1886_v51 = vrot.slane %v1884_v62, 5 }
 0x142   : > { %v5835_v24 = vpop.permute.xlu0 %2362  ;;  %v3884_v26 = vcombine.low %v1853_v40, %v1863_v23  ;;  %v1881_v19 = vor.u32 %v1880_v15, %v1876_v2  ;;  %v1680_v41 = vrot.slane %v1679_v34, 4  ;;  %v1684_v52 = vrot.slane %v1682_v60, 5  ;;  %v3741_v40 = vld [vmem:[%s4217_s22 + $0xcc] sm:$0xe] }
 0x143   : > { %v1671_v25 = vsel %vm4306_vm5, %v1666_v36, %v1670_v0  ;;  %v1692_v48 = vshll.u32 %v5828_v56, 16  ;;  %v1877_v4 = vsel %vm4306_vm5, %v1872_v6, %v1876_v2  ;;  %v3756_v5 = vrot.slane %v3740_v53, 9  ;;  %v3733_v15 = vld [vmem:[%s4217_s22 + $0x6c] sm:$0xe] }
 0x144   : > { %2716 = vrot.lane.b32.xlu1 %v3884_v26, %s4166_s7  ;;  %v3876_v32 = vcombine.low %v1661_v39, %v1671_v25  ;;  %v1882_v18 = vrot.slane %v1881_v19, 4  ;;  %v1689_v35 = vor.u32 %v1688_v8, %v1684_v52  ;;  %v1685_v12 = vsel %vm4306_vm5, %v1680_v41, %v1684_v52 }
 0x145   : > { %v1694_v45 = vrot.slane %v1692_v48, 5  ;;  %v2052_v47 = vrot.slane %v5733_v17, 5  ;;  %v2055_v0 = vrot.slane %v5784_v37, 5  ;;  %v3748_v50 = vrot.slane %v3732_v57, 9 }
 0x146   : > { %2700 = vrot.lane.b32.xlu0 %v3876_v32, %s4166_s7  ;;  %v1887_v63 = vsel %vm4306_vm5, %v1882_v18, %v1886_v51  ;;  %v1690_v16 = vrot.slane %v1689_v35, 4  ;;  %v1996_v39 = vrot.slane %v5754_v49, 5  ;;  %v1999_v9 = vrot.slane %v5799_v46, 5 }
 0x147   : > { %v5852_v27 = vpop.permute.xlu1 %2456  ;;  %v3885_v29 = vcombine.low %v1877_v4, %v1887_v63  ;;  %v2053_v3 = vsel %vm4248_vm2, %v3756_v5, %v2052_v47  ;;  %v2054_v31 = vrot.slane %v2052_v47, 4  ;;  %v3757_v6 = vrot.slane %v3741_v40, 9  ;;  %v4124_v63 = vld [vmem:[%s4217_s22 + $0x90] sm:$0xf] }
 0x148   : > { %v5855_v42 = vpop.permute.xlu0 %2440  ;;  %v1695_v17 = vsel %vm4306_vm5, %v1690_v16, %v1694_v45  ;;  %v1997_v62 = vsel %vm4248_vm2, %v3748_v50, %v1996_v39  ;;  %v1998_v34 = vrot.slane %v1996_v39, 4  ;;  %v2059_v49 = vrot.slane %v5770_v38, 5  ;;  %v4126_v40 = vld [vmem:[%s4217_s22 + $0x30] sm:$0xf] }
 0x149   : > { %2718 = vrot.lane.b32.xlu1 %v3885_v29, %s4166_s7  ;;  %v3877_v2 = vcombine.low %v1685_v12, %v1695_v17  ;;  %v2056_v37 = vsel %vm4248_vm2, %v2054_v31, %v2055_v0  ;;  %v2062_v46 = vrot.slane %v5815_v61, 5  ;;  %v3749_v36 = vrot.slane %v3733_v15, 9  ;;  %v4125_v12 = vld [vmem:[%s4217_s22 + $0x94] sm:$0xf] }
 0x14a   : > { %v3900_v23 = vcombine.low %v2053_v3, %v2056_v37  ;;  %v2000_v30 = vsel %vm4248_vm2, %v1998_v34, %v1999_v9  ;;  %v2003_v60 = vrot.slane %v5773_v58, 5  ;;  %v2006_v8 = vrot.slane %v5828_v56, 5  ;;  %v4127_v29 = vld [vmem:[%s4217_s22 + $0x34] sm:$0xf] }
 0x14b   : > { %2702 = vrot.lane.b32.xlu0 %v3877_v2, %s4166_s7  ;;  %v3892_v19 = vcombine.low %v1997_v62, %v2000_v30  ;;  %v2060_v38 = vsel %vm4248_vm2, %v3757_v6, %v2059_v49  ;;  %v2061_v51 = vrot.slane %v2059_v49, 4  ;;  %v3770_v47 = vcombine.low %v4124_v63, %v4125_v12  ;;  %v4129_v49 = vld [vmem:[%s4217_s22 + $0xa0] sm:$0xf] }
 0x14c   : > { %v2004_v53 = vsel %vm4248_vm2, %v3749_v36, %v2003_v60  ;;  %v2005_v25 = vrot.slane %v2003_v60, 4  ;;  %v3762_v16 = vcombine.low %v4126_v40, %v4127_v29  ;;  %v4130_v36 = vld [vmem:[%s4217_s22 + $0x3c] sm:$0xf]  ;;  %v4131_v30 = vld [vmem:[%s4217_s22 + $0x40] sm:$0xf] }
 0x14d   : > { %v5876_v26 = vpop.permute.xlu1 %2458  ;;  %2796 = vrot.lane.b32.xlu1 %v3900_v23, %s4167_s10  ;;  %v2063_v58 = vsel %vm4248_vm2, %v2061_v51, %v2062_v46  ;;  %v2839_v50 = vsel %vm2800_vm6, %v3770_v47, %v5649_v14  ;;  %v4128_v23 = vld [vmem:[%s4217_s22 + $0x9c] sm:$0xf]  ;;  %v3763_v60 = vcombine.low %v4130_v36, %v4131_v30 }
 0x14e   : > { %v5881_v61 = vpop.permute.xlu0 %2442  ;;  %v3901_v56 = vcombine.low %v2060_v38, %v2063_v58  ;;  %v2007_v41 = vsel %vm4248_vm2, %v2005_v25, %v2006_v8  ;;  %v2875_v3 = vsel %vm2849_vm7, %v2839_v50, %v5735_v43  ;;  %v2815_v31 = vsel %vm2800_vm6, %v3762_v16, %v5660_v13 }
 0x14f   : > { %2780 = vrot.lane.b32.xlu0 %v3892_v19, %s4167_s10  ;;  %v3893_v48 = vcombine.low %v2004_v53, %v2007_v41  ;;  %v2908_v39 = vsel %vm2882_vm8, %v2875_v3, %v5803_v11  ;;  %v2859_v15 = vsel %vm2849_vm7, %v2815_v31, %v5762_v22  ;;  %v2818_v53 = vsel %vm2800_vm6, %v3763_v60, %v5727_v55 }
 0x150   : > { %v2941_v17 = vsel %vm2915_vm9, %v2908_v39, %v5852_v27  ;;  %v2892_v14 = vsel %vm2882_vm8, %v2859_v15, %v5809_v54  ;;  %v2861_v58 = vsel %vm2849_vm7, %v2818_v53, %v5792_v20 }
 0x151   : > { %v2537_v52 = vpop.permute.xlu1 %2536  ;;  %2798 = vrot.lane.b32.xlu1 %v3901_v56, %s4167_s10  ;;  %v2925_v13 = vsel %vm2915_vm9, %v2892_v14, %v5855_v42  ;;  %v3771_v42 = vcombine.low %v4128_v23, %v4129_v49  ;;  %v3765_v23 = vcombine.low %v5484_v44, %v5490_v28  ;;  %v5975_v44 = vld [vmem:[%s6088_s2] ss:$0 sm:$0xff] }
 0x152   : > { %v2521_v32 = vpop.permute.xlu0 %2520  ;;  %v2974_v43 = vsel %vm2948_vm10, %v2941_v17, %v2537_v52 }
 0x153   : > { %2782 = vrot.lane.b32.xlu0 %v3893_v48, %s4167_s10  ;;  %v2958_v2 = vsel %vm2948_vm10, %v2925_v13, %v2521_v32  ;;  %v2842_v8 = vsel %vm2800_vm6, %v3771_v42, %v5708_v7  ;;  %v2894_v7 = vsel %vm2882_vm8, %v2861_v58, %v5835_v24 }
 0x154   : > { %v2877_v19 = vsel %vm2849_vm7, %v2842_v8, %v5786_v1 }
 0x155   : > { %v2539_v4 = vpop.permute.xlu1 %2538  ;;  %v2910_v38 = vsel %vm2882_vm8, %v2877_v19, %v5830_v10  ;;  %v2927_v10 = vsel %vm2915_vm9, %v2894_v7, %v5881_v61 }
 0x156   : > { %v2523_v18 = vpop.permute.xlu0 %2522  ;;  %v2943_v25 = vsel %vm2915_vm9, %v2910_v38, %v5876_v26 }
 0x157   : > { %v2976_v56 = vsel %vm2948_vm10, %v2943_v25, %v2539_v4  ;;  %v2960_v48 = vsel %vm2948_vm10, %v2927_v10, %v2523_v18  ;;  %v5988_v10 = vld [vmem:[%s6089_s3] ss:$0 sm:$0xff] }
 0x159   : > { %v2633_v57 = vpop.permute.xlu1 %2632 }
 0x15a   : > { %v2617_v35 = vpop.permute.xlu0 %2616  ;;  %v3007_v11 = vsel %vm2981_vm11, %v2974_v43, %v2633_v57  ;;  %v4132_v43 = vld [vmem:[%s4217_s22 + $0xa8] sm:$0xf] }
 0x15b   : > { %v2991_v27 = vsel %vm2981_vm11, %v2958_v2, %v2617_v35  ;;  %v4134_v2 = vld [vmem:[%s4217_s22 + $0x48] sm:$0xf] }
 0x15d   : > { %v2635_v45 = vpop.permute.xlu1 %2634 }
 0x15e   : > { %v2619_v5 = vpop.permute.xlu0 %2618  ;;  %v3009_v1 = vsel %vm2981_vm11, %v2976_v56, %v2635_v45 }
 0x15f   : > { %v2993_v20 = vsel %vm2981_vm11, %v2960_v48, %v2619_v5 }
 0x163   : > { %v2713_v21 = vpop.permute.xlu1 %2712 }
 0x164   : > { %v2697_v0 = vpop.permute.xlu0 %2696  ;;  %v3040_v22 = vsel %vm3014_vm12, %v3007_v11, %v2713_v21 }
 0x165   : > { %v3024_v54 = vsel %vm3014_vm12, %v2991_v27, %v2697_v0 }
 0x169   : > { %v2715_v9 = vpop.permute.xlu1 %2714 }
 0x16a   : > { %v3042_v52 = vsel %vm3014_vm12, %v3009_v1, %v2715_v9 }
 0x16b   : > { %v2699_v6 = vpop.permute.xlu0 %2698 }
 0x16c   : > { %v3026_v32 = vsel %vm3014_vm12, %v2993_v20, %v2699_v6  ;;  %v4133_v6 = vld [vmem:[%s4217_s22 + $0xac] sm:$0xf] }
 0x16d   : > { %v2793_v37 = vpop.permute.xlu1 %2792  ;;  %v3772_v13 = vcombine.low %v4132_v43, %v4133_v6 }
 0x16e   : > { %v3073_v62 = vsel %vm3047_vm13, %v3040_v22, %v2793_v37  ;;  %v4135_v22 = vld [vmem:[%s4217_s22 + $0x4c] sm:$0xf] }
 0x16f   : > { %v2777_v34 = vpop.permute.xlu0 %2776  ;;  %3995 = vmatprep.mubr.msk.bf16.mxu1 %vm3080_vm14, %v3073_v62  ;;  %v3764_v37 = vcombine.low %v4134_v2, %v4135_v22 }
 0x170   : > { %v3057_v46 = vsel %vm3047_vm13, %v3024_v54, %v2777_v34  ;;  %v3773_v54 = vcombine.low %v5461_v59, %v5469_v33 }
 0x171   : > { %3979 = vmatprep.mubr.msk.bf16.mxu0 %vm3080_vm14, %v3057_v46 }
 0x176   : > { %v2205_v51 = vpop.permute.xlu1 %2204 }
 0x177   : > { %v2845_v62 = vsel %vm2800_vm6, %v3772_v13, %v2205_v51 }
 0x179   : > { %v2189_v41 = vpop.permute.xlu0 %2188 }
 0x17a   : > { %v2795_v55 = vpop.permute.xlu1 %2794  ;;  %v2821_v46 = vsel %vm2800_vm6, %v3764_v37, %v2189_v41 }
 0x17b   : > { %v3075_v26 = vsel %vm3047_vm13, %v3042_v52, %v2795_v55 }
 0x17c   : > { %3996 = vmatmul.mubr.msk.bf16.gmra.mrb[8].mxu1 %vm3080_vm14, %v3075_v26 }
 0x17d   : > { %v2779_v24 = vpop.permute.xlu0 %2778 }
 0x17e   : > { %v3059_v4 = vsel %vm3047_vm13, %v3026_v32, %v2779_v24 }
 0x17f   : > { %3980 = vmatmul.mubr.msk.bf16.gmra.mrb[8].mxu0 %vm3080_vm14, %v3059_v4 }
 0x183   : > { %v2207_v57 = vpop.permute.xlu1 %2206 }
 0x184   : > { %v2848_v8 = vsel %vm2800_vm6, %v3773_v54, %v2207_v57 }
 0x186   : > { %v2191_v61 = vpop.permute.xlu0 %2190 }
 0x187   : > { %v2285_v35 = vpop.permute.xlu1 %2284  ;;  %v2824_v28 = vsel %vm2800_vm6, %v3765_v23, %v2191_v61 }
 0x188   : > { %v2879_v34 = vsel %vm2849_vm7, %v2845_v62, %v2285_v35 }
 0x18a   : > { %v2269_v45 = vpop.permute.xlu0 %2268 }
 0x18b   : > { %v2287_v63 = vpop.permute.xlu1 %2286  ;;  %v2863_v30 = vsel %vm2849_vm7, %v2821_v46, %v2269_v45 }
 0x18c   : > { %v2881_v38 = vsel %vm2849_vm7, %v2848_v8, %v2287_v63 }
 0x18e   : > { %v2271_v12 = vpop.permute.xlu0 %2270 }
 0x18f   : > { %v2381_v18 = vpop.permute.xlu1 %2380  ;;  %v2865_v56 = vsel %vm2849_vm7, %v2824_v28, %v2271_v12 }
 0x190   : > { %v2912_v49 = vsel %vm2882_vm8, %v2879_v34, %v2381_v18 }
 0x192   : > { %v2365_v47 = vpop.permute.xlu0 %2364 }
 0x193   : > { %v2383_v5 = vpop.permute.xlu1 %2382  ;;  %v2896_v59 = vsel %vm2882_vm8, %v2863_v30, %v2365_v47 }
 0x194   : > { %v2914_v7 = vsel %vm2882_vm8, %v2881_v38, %v2383_v5 }
 0x196   : > { %v2367_v21 = vpop.permute.xlu0 %2366 }
 0x197   : > { %v2898_v48 = vsel %vm2882_vm8, %v2865_v56, %v2367_v21 }
 0x19a   : > { %v2461_v40 = vpop.permute.xlu1 %2460 }
 0x19b   : > { %v2445_v29 = vpop.permute.xlu0 %2444  ;;  %v2945_v36 = vsel %vm2915_vm9, %v2912_v49, %v2461_v40 }
 0x19c   : > { %v2929_v51 = vsel %vm2915_vm9, %v2896_v59, %v2445_v29 }
 0x19f   : > { %v2463_v16 = vpop.permute.xlu1 %2462 }
 0x1a0   : > { %v2947_v26 = vsel %vm2915_vm9, %v2914_v7, %v2463_v16 }
 0x1a2   : > { %v2447_v0 = vpop.permute.xlu0 %2446 }
 0x1a3   : > { %v2541_v50 = vpop.permute.xlu1 %2540  ;;  %v2931_v57 = vsel %vm2915_vm9, %v2898_v48, %v2447_v0 }
 0x1a4   : > { %v2978_v60 = vsel %vm2948_vm10, %v2945_v36, %v2541_v50 }
 0x1a6   : > { %v2525_v3 = vpop.permute.xlu0 %2524 }
 0x1a7   : > { %v2543_v31 = vpop.permute.xlu1 %2542  ;;  %v2962_v1 = vsel %vm2948_vm10, %v2929_v51, %v2525_v3 }
 0x1a8   : > { %v2980_v61 = vsel %vm2948_vm10, %v2947_v26, %v2543_v31 }
 0x1aa   : > { %v2527_v39 = vpop.permute.xlu0 %2526 }
 0x1ab   : > { %v2637_v9 = vpop.permute.xlu1 %2636  ;;  %v2964_v18 = vsel %vm2948_vm10, %v2931_v57, %v2527_v39 }
 0x1ac   : > { %v3011_v33 = vsel %vm2981_vm11, %v2978_v60, %v2637_v9 }
 0x1ae   : > { %v2621_v15 = vpop.permute.xlu0 %2620 }
 0x1af   : > { %v2639_v17 = vpop.permute.xlu1 %2638  ;;  %v2995_v20 = vsel %vm2981_vm11, %v2962_v1, %v2621_v15 }
 0x1b0   : > { %v3013_v47 = vsel %vm2981_vm11, %v2980_v61, %v2639_v17 }
 0x1b2   : > { %v5952_v14 = vpop.permute.xlu0 %2622 }
 0x1b3   : > { %v2997_v39 = vsel %vm2981_vm11, %v2964_v18, %v5952_v14 }
 0x1b6   : > { %v2717_v11 = vpop.permute.xlu1 %2716 }
 0x1b7   : > { %v3044_v53 = vsel %vm3014_vm12, %v3011_v33, %v2717_v11 }
 0x1b8   : > { %v2701_v27 = vpop.permute.xlu0 %2700 }
 0x1b9   : > { %v3028_v35 = vsel %vm3014_vm12, %v2995_v20, %v2701_v27 }
 0x1bb   : > { %v2719_v42 = vpop.permute.xlu1 %2718 }
 0x1bc   : > { %v3046_v16 = vsel %vm3014_vm12, %v3013_v47, %v2719_v42 }
 0x1bd   : > { %v2703_v19 = vpop.permute.xlu0 %2702 }
 0x1be   : > { %v3030_v15 = vsel %vm3014_vm12, %v2997_v39, %v2703_v19 }
 0x1bf   : > { %v2797_v25 = vpop.permute.xlu1 %2796  ;;  %v3973_v58 = vpop.f32.mrb[0].mxu0 }
 0x1c0   : > { %v3077_v41 = vsel %vm3047_vm13, %v3044_v53, %v2797_v25  ;;  %v3989_v52 = vpop.f32.mrb[0].mxu1  ;;  %v3212_v55 = vpop.f32.mrb[1].mxu0  ;;  %v3348_v6 = vmul.f32 %v3973_v58, %v5975_v44 }
 0x1c1   : > { %3999 = vmatprep.mubr.msk.bf16.mxu1 %vm3080_vm14, %v3077_v41  ;;  %v3346_v32 = vmul.f32 %v5975_v44, %v3212_v55  ;;  %v3276_v24 = vpop.f32.mrb[1].mxu1  ;;  %v3974_v4 = vpop.f32.mrb[2].mxu0  ;;  %v3364_v11 = vmul.f32 %v3989_v52, %v5975_v44 }
 0x1c2   : > { %v2781_v45 = vpop.permute.xlu0 %2780  ;;  %v3362_v63 = vmul.f32 %v5975_v44, %v3276_v24  ;;  %v3990_v12 = vpop.f32.mrb[2].mxu1  ;;  %v3387_v2 = vadd.f32 %v5988_v10, %v3348_v6  ;;  %v3349_v22 = vmul.f32 %v3974_v4, %v5975_v44 }
 0x1c3   : > { %v3061_v5 = vsel %vm3047_vm13, %v3028_v35, %v2781_v45  ;;  %v3385_v21 = vadd.f32 %v5988_v10, %v3346_v32  ;;  %v3215_v40 = vpop.f32.mrb[3].mxu0  ;;  %v3279_v29 = vpop.f32.mrb[3].mxu1  ;;  %v3403_v37 = vadd.f32 %v5988_v10, %v3364_v11  ;;  %v3365_v27 = vmul.f32 %v3990_v12, %v5975_v44 }
 0x1c4   : > { %3983 = vmatprep.mubr.msk.bf16.mxu0 %vm3080_vm14, %v3061_v5  ;;  %v2799_v0 = vpop.permute.xlu1 %2798  ;;  %v3401_v50 = vadd.f32 %v5988_v10, %v3362_v63  ;;  %v3347_v3 = vmul.f32 %v5975_v44, %v3215_v40  ;;  %v3363_v31 = vmul.f32 %v5975_v44, %v3279_v29  ;;  %v3388_v62 = vadd.f32 %v5988_v10, %v3349_v22 }
 0x1c5   : > { %v3079_v9 = vsel %vm3047_vm13, %v3046_v16, %v2799_v0  ;;  %3417 = vxpose.xlu0.b32.start [1/16] (narrow) %v3385_v21, 8  ;;  %v3404_v54 = vadd.f32 %v5988_v10, %v3365_v27 }
 0x1c6   : > { %v2783_v17 = vpop.permute.xlu0 %2782  ;;  %4000 = vmatmul.mubr.msk.bf16.gmra.mrb[12].mxu1 %vm3080_vm14, %v3079_v9  ;;  %3449 = vxpose.xlu1.b32.start [1/16] (narrow) %v3401_v50, 8  ;;  %v3386_v13 = vadd.f32 %v5988_v10, %v3347_v3  ;;  %v3402_v14 = vadd.f32 %v5988_v10, %v3363_v31 }
 0x1c7   : > { %v3063_v43 = vsel %vm3047_vm13, %v3030_v15, %v2783_v17 }
 0x1c8   : > { %3984 = vmatmul.mubr.msk.bf16.gmra.mrb[12].mxu0 %vm3080_vm14, %v3063_v43 }
 0x1c9   : > { %3418 = vxpose.xlu0.b32.cont [2/16] (narrow) %v3386_v13, 8 }
 0x1ca   : > { %3450 = vxpose.xlu1.b32.cont [2/16] (narrow) %v3402_v14, 8 }
 0x1cd   : > { %3419 = vxpose.xlu0.b32.cont [3/16] (narrow) %v3387_v2, 8 }
 0x1ce   : > { %3451 = vxpose.xlu1.b32.cont [3/16] (narrow) %v3403_v37, 8 }
 0x1d1   : > { %3420 = vxpose.xlu0.b32.cont [4/16] (narrow) %v3388_v62, 8 }
 0x1d2   : > { %3452 = vxpose.xlu1.b32.cont [4/16] (narrow) %v3404_v54, 8 }
 0x210   : > { %v3993_v34 = vpop.f32.mrb[4].mxu1 }
 0x211   : > { %v3292_v23 = vpop.f32.mrb[5].mxu1  ;;  %v3977_v49 = vpop.f32.mrb[4].mxu0  ;;  %v3368_v51 = vmul.f32 %v3993_v34, %v5975_v44 }
 0x212   : > { %v3366_v42 = vmul.f32 %v5975_v44, %v3292_v23  ;;  %v3994_v46 = vpop.f32.mrb[6].mxu1  ;;  %v3228_v36 = vpop.f32.mrb[5].mxu0  ;;  %v3352_v25 = vmul.f32 %v3977_v49, %v5975_v44 }
 0x213   : > { %v3295_v30 = vpop.f32.mrb[7].mxu1  ;;  %v3350_v60 = vmul.f32 %v5975_v44, %v3228_v36  ;;  %v3978_v59 = vpop.f32.mrb[6].mxu0  ;;  %v3407_v56 = vadd.f32 %v5988_v10, %v3368_v51  ;;  %v3369_v7 = vmul.f32 %v3994_v46, %v5975_v44 }
 0x214   : > { %v3405_v8 = vadd.f32 %v5988_v10, %v3366_v42  ;;  %v3367_v33 = vmul.f32 %v5975_v44, %v3295_v30  ;;  %v3231_v19 = vpop.f32.mrb[7].mxu0  ;;  %v3391_v1 = vadd.f32 %v5988_v10, %v3352_v25  ;;  %v3353_v41 = vmul.f32 %v3978_v59, %v5975_v44 }
 0x215   : > { %v3389_v28 = vadd.f32 %v5988_v10, %v3350_v60  ;;  %v3351_v38 = vmul.f32 %v5975_v44, %v3231_v19  ;;  %v3408_v52 = vadd.f32 %v5988_v10, %v3369_v7 }
 0x216   : > { %3453 = vxpose.xlu1.b32.cont [5/16] (narrow) %v3405_v8, 8  ;;  %v3406_v53 = vadd.f32 %v5988_v10, %v3367_v33  ;;  %v3392_v55 = vadd.f32 %v5988_v10, %v3353_v41 }
 0x217   : > { %3421 = vxpose.xlu0.b32.cont [5/16] (narrow) %v3389_v28, 8  ;;  %v3390_v58 = vadd.f32 %v5988_v10, %v3351_v38 }
 0x21a   : > { %3454 = vxpose.xlu1.b32.cont [6/16] (narrow) %v3406_v53, 8 }
 0x21b   : > { %3422 = vxpose.xlu0.b32.cont [6/16] (narrow) %v3390_v58, 8 }
 0x21e   : > { %3455 = vxpose.xlu1.b32.cont [7/16] (narrow) %v3407_v56, 8 }
 0x21f   : > { %3423 = vxpose.xlu0.b32.cont [7/16] (narrow) %v3391_v1, 8 }
 0x222   : > { %3456 = vxpose.xlu1.b32.cont [8/16] (narrow) %v3408_v52, 8 }
 0x223   : > { %3424 = vxpose.xlu0.b32.cont [8/16] (narrow) %v3392_v55, 8 }
 0x24f   : > { %v3997_v48 = vpop.f32.mrb[8].mxu1 }
 0x250   : > { %v3308_v26 = vpop.f32.mrb[9].mxu1  ;;  %v3372_v5 = vmul.f32 %v3997_v48, %v5975_v44 }
 0x251   : > { %v3370_v20 = vmul.f32 %v5975_v44, %v3308_v26  ;;  %v3998_v32 = vpop.f32.mrb[10].mxu1 }
 0x252   : > { %v3981_v24 = vpop.f32.mrb[8].mxu0  ;;  %v3311_v4 = vpop.f32.mrb[11].mxu1  ;;  %v3411_v16 = vadd.f32 %v5988_v10, %v3372_v5  ;;  %v3373_v0 = vmul.f32 %v3998_v32, %v5975_v44 }
 0x253   : > { %v3244_v57 = vpop.f32.mrb[9].mxu0  ;;  %v3409_v61 = vadd.f32 %v5988_v10, %v3370_v20  ;;  %v3371_v35 = vmul.f32 %v5975_v44, %v3311_v4  ;;  %v3356_v40 = vmul.f32 %v3981_v24, %v5975_v44 }
 0x254   : > { %v3354_v45 = vmul.f32 %v5975_v44, %v3244_v57  ;;  %v3982_v63 = vpop.f32.mrb[10].mxu0  ;;  %v3412_v31 = vadd.f32 %v5988_v10, %v3373_v0 }
 0x255   : > { %v3247_v12 = vpop.f32.mrb[11].mxu0  ;;  %3457 = vxpose.xlu1.b32.cont [9/16] (narrow) %v3409_v61, 8  ;;  %v3410_v21 = vadd.f32 %v5988_v10, %v3371_v35  ;;  %v3395_v50 = vadd.f32 %v5988_v10, %v3356_v40  ;;  %v3357_v3 = vmul.f32 %v3982_v63, %v5975_v44 }
 0x256   : > { %v3393_v18 = vadd.f32 %v5988_v10, %v3354_v45  ;;  %v3355_v47 = vmul.f32 %v5975_v44, %v3247_v12 }
 0x257   : > { %v3396_v39 = vadd.f32 %v5988_v10, %v3357_v3 }
 0x258   : > { %3425 = vxpose.xlu0.b32.cont [9/16] (narrow) %v3393_v18, 8  ;;  %v3394_v29 = vadd.f32 %v5988_v10, %v3355_v47 }
 0x259   : > { %3458 = vxpose.xlu1.b32.cont [10/16] (narrow) %v3410_v21, 8 }
 0x25c   : > { %3426 = vxpose.xlu0.b32.cont [10/16] (narrow) %v3394_v29, 8 }
 0x25d   : > { %3459 = vxpose.xlu1.b32.cont [11/16] (narrow) %v3411_v16, 8 }
 0x260   : > { %3427 = vxpose.xlu0.b32.cont [11/16] (narrow) %v3395_v50, 8 }
 0x261   : > { %3460 = vxpose.xlu1.b32.cont [12/16] (narrow) %v3412_v31, 8 }
 0x264   : > { %3428 = vxpose.xlu0.b32.cont [12/16] (narrow) %v3396_v39, 8 }
 0x299   : > { %v4001_v9 = vpop.f32.mrb[12].mxu1 }
 0x29a   : > { %v3324_v15 = vpop.f32.mrb[13].mxu1  ;;  %v3376_v34 = vmul.f32 %v4001_v9, %v5975_v44 }
 0x29b   : > { %v3985_v17 = vpop.f32.mrb[12].mxu0  ;;  %v3374_v43 = vmul.f32 %v5975_v44, %v3324_v15  ;;  %v4002_v6 = vpop.f32.mrb[14].mxu1 }
 0x29c   : > { %v3260_v13 = vpop.f32.mrb[13].mxu0  ;;  %v3327_v11 = vpop.f32.mrb[15].mxu1  ;;  %v3360_v49 = vmul.f32 %v3985_v17, %v5975_v44  ;;  %v3415_v46 = vadd.f32 %v5988_v10, %v3376_v34  ;;  %v3377_v36 = vmul.f32 %v4002_v6, %v5975_v44 }
 0x29d   : > { %v3358_v14 = vmul.f32 %v5975_v44, %v3260_v13  ;;  %v3413_v2 = vadd.f32 %v5988_v10, %v3374_v43  ;;  %v3986_v22 = vpop.f32.mrb[14].mxu0  ;;  %v3375_v37 = vmul.f32 %v5975_v44, %v3327_v11 }
 0x29e   : > { %v3263_v27 = vpop.f32.mrb[15].mxu0  ;;  %v3399_v30 = vadd.f32 %v5988_v10, %v3360_v49  ;;  %v3361_v60 = vmul.f32 %v3986_v22, %v5975_v44  ;;  %v3416_v8 = vadd.f32 %v5988_v10, %v3377_v36 }
 0x29f   : > { %v3397_v62 = vadd.f32 %v5988_v10, %v3358_v14  ;;  %v3359_v54 = vmul.f32 %v5975_v44, %v3263_v27  ;;  %3461 = vxpose.xlu1.b32.cont [13/16] (narrow) %v3413_v2, 8  ;;  %v3414_v23 = vadd.f32 %v5988_v10, %v3375_v37 }
 0x2a0   : > { %v3400_v59 = vadd.f32 %v5988_v10, %v3361_v60 }
 0x2a1   : > { %3429 = vxpose.xlu0.b32.cont [13/16] (narrow) %v3397_v62, 8  ;;  %v3398_v42 = vadd.f32 %v5988_v10, %v3359_v54 }
 0x2a3   : > { %3462 = vxpose.xlu1.b32.cont [14/16] (narrow) %v3414_v23, 8 }
 0x2a5   : > { %3430 = vxpose.xlu0.b32.cont [14/16] (narrow) %v3398_v42, 8 }
 0x2a7   : > { %3463 = vxpose.xlu1.b32.cont [15/16] (narrow) %v3415_v46, 8 }
 0x2a9   : > { %3431 = vxpose.xlu0.b32.cont [15/16] (narrow) %v3399_v30, 8 }
 0x2ab   : > { %3464 = vxpose.xlu1.b32.end [16/16] (narrow) %v3416_v8, 8 }
 0x2ad   : > { %3432 = vxpose.xlu0.b32.end [16/16] (narrow) %v3400_v59, 8 }
 0x2ef   : > { %v3465_v33 = vpop.trf.xlu1 }
 0x2f0   : > { %3482 = vst [vmem:[%s219_s6 + $0x8] sm:$0xff] %v3465_v33 }
 0x2f1   : > { %v3433_v19 = vpop.trf.xlu0 }
 0x2f2   : > { %3481 = vst [vmem:[%s219_s6] sm:$0xff] %v3433_v19 }
 0x2f3 PF: > { %s14_s17 = sadd.s32 1, %s4158_s17   ;;  %s6095_s15 = smov %s4154_s16 }
 0x2f4   : > { %p11_p5 = scmp.ge.s32.totalorder %s14_s17, 4   ;;  %s6096_s16 = smov %s6098_s18 }
 0x2f6   :  { %13 = sbr.rel (!%p11_p5) target bundleno = 2 (0x2), region = 69 }

</bundles_post_ra>
